<compile_context>
chip_gen: v5e
topology: v5e:2x2
jax: 0.10.0
libtpu: 0.0.40
codegen_flags: <defaults>
</compile_context>

<pallas_src>
from functools import partial

import numpy as np
import jax
import jax.numpy as jnp
from jax.experimental import pallas as pl
from jax.experimental.pallas import tpu as pltpu


def _round_up(x, m):
    return ((x + m - 1) // m) * m


def _vmem_budget_bytes():
    """Per-generation resident-VMEM budget (leave headroom for compiler scratch)."""
    try:
        cap = int(pltpu.get_tpu_info().vmem_capacity_bytes)
    except Exception:
        cap = 64 << 20                      # conservative (v7x-sized) fallback
    if cap >= (128 << 20):
        return 100 << 20                    # v5e / v6e: 128 MiB physical VMEM
    return 48 << 20                         # v7x: 64 MiB physical per TensorCore


def emb_onehot_kernel(ids_ref, p_ref, w_ref, out_ref, *, mm_precision):
    # ids_ref: (tb, F)  f32 -- per-field ids already shifted by f*Vp (exact ints).
    # p_ref:   (F, K)   f32 -- 0/1 field-block indicator, P[f, f*Vp:(f+1)*Vp] = 1.
    # w_ref:   (K, EFp) f32 -- block-diagonal gather matrix (VMEM resident).
    # out_ref: (tb, EFp) f32 -- lane-dense output slab for this batch tile.
    tb = ids_ref.shape[0]
    k = w_ref.shape[0]

    # expected[b, j] = shifted id of the field that owns column j of the one-hot.
    # One tiny MXU matmul against the 0/1 indicator (exact with fp32 precision)
    # replaces F separate VPU compare+add sweeps.
    expected = jnp.dot(ids_ref[...], p_ref[...],
                       preferred_element_type=jnp.float32,
                       precision=jax.lax.Precision.HIGHEST)

    # Single VPU sweep: iota -> compare -> cast builds the whole multi-hot
    # (fields hit disjoint lanes, so no accumulation is needed).
    col = jax.lax.broadcasted_iota(jnp.int32, (tb, k), 1).astype(jnp.float32)
    onehot = (col == expected).astype(w_ref.dtype)

    # 0/1 one-hot -> the gather is exact as long as the f32 W values are
    # reconstructed exactly (HIGH = 3 bf16 passes suffices; HIGHEST = 6).
    out_ref[...] = jnp.dot(onehot, w_ref[...],
                           preferred_element_type=jnp.float32,
                           precision=mm_precision).astype(out_ref.dtype)


def build_gather_matrix(emb_table, field_dims):
    """Build the block-diagonal gather matrix W and block indicator P ONCE
    (outside the hot path), in numpy -- no per-call F^2*V*E einsum in XLA."""
    field_dims = tuple(int(d) for d in field_dims)
    num_fields = len(field_dims)
    tbl = np.asarray(emb_table, dtype=np.float32)
    _, embed_dim = tbl.shape
    offsets = np.concatenate(([0], np.cumsum(field_dims)[:-1])).astype(np.int64)

    vp = _round_up(max(field_dims), 128)                 # per-field block (lanes)
    efp = _round_up(embed_dim * num_fields, 128)         # lane-dense output width

    w = np.zeros((num_fields, vp, efp), dtype=np.float32)
    for f, d in enumerate(field_dims):
        # columns e*F + f  ==  slice f : E*F : F
        w[f, :d, f:embed_dim * num_fields:num_fields] = tbl[offsets[f]:offsets[f] + d, :]
    w = w.reshape(num_fields * vp, efp)

    p = np.kron(np.eye(num_fields, dtype=np.float32),
                np.ones((1, vp), dtype=np.float32))      # (F, F*Vp)
    return jnp.asarray(w), jnp.asarray(p), vp


def emb_forward(x_idx, w, p, vp, embed_dim, *, tb=None):
    """x_idx: (B, F) int32 per-field ids, w/p/vp from build_gather_matrix.
    Returns (B, E, F) f32, matching EMB.forward."""
    B, num_fields = x_idx.shape
    K, EFp = w.shape
    EF = embed_dim * num_fields

    # Shift each field's id into its block of W; small ints -> exact in f32.
    ids = (x_idx.astype(jnp.float32)
           + (jnp.arange(num_fields, dtype=jnp.float32) * float(vp))[None, :])

    # ---- tile-size / VMEM policy (per TPU generation) ----------------------
    budget = _vmem_budget_bytes()
    w_bytes = (K * EFp + num_fields * K) * 4             # W + P, single copies

    def tile_bytes(t):
        return (2 * t * num_fields * 4                   # ids tiles (double-buffered)
                + 2 * t * EFp * 4                        # out tiles (double-buffered)
                + 3 * t * K * 4)                         # col / expected / onehot

    if tb is None:
        tb = min(512, _round_up(B, 8))                   # fat, MXU-aligned tiles
        if B > 256:
            # keep >= 2 grid steps so ("parallel",) can shard across v7x's 2 TCs
            tb = min(tb, max(256, _round_up(pl.cdiv(B, 2), 256)))
    while tb > 8 and w_bytes + tile_bytes(tb) > budget:
        tb //= 2
    tb = _round_up(max(tb, 8), 8)

    b_pad = _round_up(B, tb)
    if b_pad != B:
        ids = jnp.pad(ids, ((0, b_pad - B), (0, 0)))     # garbage rows sliced below

    # Generous headroom (also covers the double-buffered-W fallback), capped at
    # the per-generation budget.  Always set explicitly (v5e default is 16 MiB).
    vmem_limit = int(min(budget, max(w_bytes + tile_bytes(tb) + (8 << 20), 16 << 20)))

    def call(single_buffer_w, mm_precision):
        if single_buffer_w:
            # W's index_map is constant -> double-buffering buys nothing.
            w_spec = pl.BlockSpec((K, EFp), lambda i: (0, 0),
                                  pipeline_mode=pl.Buffered(1))
        else:
            w_spec = pl.BlockSpec((K, EFp), lambda i: (0, 0))
        return pl.pallas_call(
            partial(emb_onehot_kernel, mm_precision=mm_precision),
            out_shape=jax.ShapeDtypeStruct((b_pad, EFp), w.dtype),
            grid=(b_pad // tb,),
            in_specs=[
                pl.BlockSpec((tb, num_fields), lambda i: (i, 0)),   # streamed ids
                pl.BlockSpec((num_fields, K), lambda i: (0, 0)),    # tiny indicator P
                w_spec,                                             # resident W
            ],
            out_specs=pl.BlockSpec((tb, EFp), lambda i: (i, 0)),
            compiler_params=pltpu.CompilerParams(
                dimension_semantics=("parallel",),
                vmem_limit_bytes=vmem_limit,
            ),
        )(ids, p, w)

    # Preferred config first; fall back if this JAX build rejects Buffered(1)
    # or Precision.HIGH in the Mosaic lowering.  Last config is the known-good
    # (previous) configuration, so correctness never regresses.
    configs = [
        (True, jax.lax.Precision.HIGH),
        (True, jax.lax.Precision.HIGHEST),
        (False, jax.lax.Precision.HIGH),
        (False, jax.lax.Precision.HIGHEST),
    ]
    out_slab, last_err = None, None
    for single_buf, prec in configs:
        try:
            out_slab = call(single_buf, prec)
            break
        except Exception as e:      # lowering / compile NotImplementedError etc.
            last_err = e
    if out_slab is None:
        raise last_err

    # (B, EFp) lane-dense slab -> (B, E, F): slice padding + row-major reshape;
    # the transpose(1, 2) is already folded into W's column order.
    return out_slab[:B, :EF].reshape(B, embed_dim, num_fields)


def make_params(field_dims, embed_dim, key):
    vocab = int(sum(field_dims))
    # xavier_uniform_ on (vocab, embed_dim): bound = sqrt(6 / (fan_in + fan_out))
    bound = float(np.sqrt(6.0 / (vocab + embed_dim)))
    emb_table = jax.random.uniform(
        key, (vocab, embed_dim), dtype=jnp.float32, minval=-bound, maxval=bound)
    offsets = jnp.asarray(
        np.array((0, *np.cumsum(field_dims)[:-1]), dtype=np.int32))
    return emb_table, offsets


if __name__ == "__main__":
    field_dims = (3, 5, 7, 9)   # sum = 24 rows in the shared embedding table
    embed_dim = 32
    batch = 2
    num_fields = len(field_dims)

    key = jax.random.PRNGKey(0)
    k_emb, k_idx = jax.random.split(key)

    emb_table, offsets = make_params(field_dims, embed_dim, k_emb)
    # Built once, reused across forward calls (hot path never rebuilds W).
    w, p, vp = build_gather_matrix(emb_table, field_dims)

    # per-field categorical ids, each < field_dims[f]
    maxvals = jnp.asarray(field_dims, dtype=jnp.int32)[None, :]
    x = (jax.random.randint(k_idx, (batch, num_fields), 0, 10_000, dtype=jnp.int32)
         % maxvals).astype(jnp.int32)

    out = jax.block_until_ready(emb_forward(x, w, p, vp, embed_dim))

    # reference check in plain JAX (exact f32 gather -> tight tolerance)
    ref = jnp.transpose(emb_table[(x + offsets[None, :])], (0, 2, 1))
    assert out.shape == (batch, embed_dim, num_fields), out.shape
    np.testing.assert_allclose(np.asarray(out), np.asarray(ref),
                               rtol=1e-5, atol=1e-7)

    print("KERNEL_OK")
</pallas_src>

<mosaic_0001>
module attributes {stable_mosaic.version = 11 : i64} {
  func.func @emb_onehot_kernel(%arg0: i32, %arg1: memref<8x4xf32, #tpu.memory_space<vmem>>, %arg2: memref<4x512xf32, #tpu.memory_space<vmem>>, %arg3: memref<512x128xf32, #tpu.memory_space<vmem>>, %arg4: memref<8x128xf32, #tpu.memory_space<vmem>>) attributes {dimension_semantics = [#tpu.dimension_semantics<parallel>], iteration_bounds = array<i64: 1>, scalar_prefetch = 0 : i64, scratch_operands = 0 : i64, tpu.core_type = #tpu.core_type<tc>, window_params = [{transform_indices = @transform_0, window_bounds = array<i64: 8, 4>}, {pipeline_mode = #tpu.pipeline_mode<synchronous>, transform_indices = @transform_1, window_bounds = array<i64: 4, 512>}, {pipeline_mode = #tpu.pipeline_mode<synchronous>, transform_indices = @transform_2, window_bounds = array<i64: 512, 128>}, {transform_indices = @transform_3, window_bounds = array<i64: 8, 128>}]} {
    %c0 = arith.constant 0 : index
    %c0_0 = arith.constant 0 : index
    %0 = vector.load %arg1[%c0, %c0_0] : memref<8x4xf32, #tpu.memory_space<vmem>>, vector<8x4xf32>
    %c0_1 = arith.constant 0 : index
    %c0_2 = arith.constant 0 : index
    %1 = vector.load %arg2[%c0_1, %c0_2] : memref<4x512xf32, #tpu.memory_space<vmem>>, vector<4x512xf32>
    %cst = arith.constant dense<0.000000e+00> : vector<8x512xf32>
    %2 = tpu.matmul %0, %1, %cst {dimension_numbers = #tpu.dot_dimension_numbers<[1], [0], [0], [1], [0, 0, 1, 1], [], []>, precision = #tpu.contract_precision<fp32>} : vector<8x4xf32>, vector<4x512xf32>, vector<8x512xf32> -> vector<8x512xf32>
    %3 = tpu.iota {dimensions = array<i32: 1>} : vector<8x512xi32>
    %4 = arith.sitofp %3 : vector<8x512xi32> to vector<8x512xf32>
    %5 = arith.cmpf oeq, %4, %2 : vector<8x512xf32>
    %6 = arith.extui %5 : vector<8x512xi1> to vector<8x512xi32>
    %7 = arith.sitofp %6 : vector<8x512xi32> to vector<8x512xf32>
    %c0_3 = arith.constant 0 : index
    %c0_4 = arith.constant 0 : index
    %8 = vector.load %arg3[%c0_3, %c0_4] : memref<512x128xf32, #tpu.memory_space<vmem>>, vector<512x128xf32>
    %cst_5 = arith.constant dense<0.000000e+00> : vector<8x128xf32>
    %9 = tpu.matmul %7, %8, %cst_5 {dimension_numbers = #tpu.dot_dimension_numbers<[1], [0], [0], [1], [0, 0, 1, 1], [], []>, precision = #tpu.contract_precision<fp32>} : vector<8x512xf32>, vector<512x128xf32>, vector<8x128xf32> -> vector<8x128xf32>
    %c0_6 = arith.constant 0 : index
    %c0_7 = arith.constant 0 : index
    %10 = vector.load %arg4[%c0_6, %c0_7] : memref<8x128xf32, #tpu.memory_space<vmem>>, vector<8x128xf32>
    tpu.vector_store %arg4[%c0_6, %c0_7], %9 {strides = array<i32>} : memref<8x128xf32, #tpu.memory_space<vmem>>, vector<8x128xf32>,
    return
  }
  func.func @transform_0(%arg0: i32) -> (i32, i32) {
    %c0_i32 = arith.constant 0 : i32
    %c0_i32_0 = arith.constant 0 : i32
    return %arg0, %c0_i32 : i32, i32
  }
  func.func @transform_1(%arg0: i32) -> (i32, i32) {
    %c0_i32 = arith.constant 0 : i32
    %c0_i32_0 = arith.constant 0 : i32
    %c0_i32_1 = arith.constant 0 : i32
    return %c0_i32, %c0_i32_0 : i32, i32
  }
  func.func @transform_2(%arg0: i32) -> (i32, i32) {
    %c0_i32 = arith.constant 0 : i32
    %c0_i32_0 = arith.constant 0 : i32
    %c0_i32_1 = arith.constant 0 : i32
    return %c0_i32, %c0_i32_0 : i32, i32
  }
  func.func @transform_3(%arg0: i32) -> (i32, i32) {
    %c0_i32 = arith.constant 0 : i32
    %c0_i32_0 = arith.constant 0 : i32
    return %arg0, %c0_i32 : i32, i32
  }
}

module attributes {stable_mosaic.version = 11 : i64} {
  func.func @emb_onehot_kernel(%arg0: i32, %arg1: memref<8x4xf32, #tpu.memory_space<vmem>>, %arg2: memref<4x512xf32, #tpu.memory_space<vmem>>, %arg3: memref<512x128xf32, #tpu.memory_space<vmem>>, %arg4: memref<8x128xf32, #tpu.memory_space<vmem>>) attributes {dimension_semantics = [#tpu.dimension_semantics<parallel>], iteration_bounds = array<i64: 1>, scalar_prefetch = 0 : i64, scratch_operands = 0 : i64, tpu.core_type = #tpu.core_type<tc>, window_params = [{transform_indices = @transform_0, window_bounds = array<i64: 8, 4>}, {pipeline_mode = #tpu.pipeline_mode<synchronous>, transform_indices = @transform_1, window_bounds = array<i64: 4, 512>}, {pipeline_mode = #tpu.pipeline_mode<synchronous>, transform_indices = @transform_2, window_bounds = array<i64: 512, 128>}, {transform_indices = @transform_3, window_bounds = array<i64: 8, 128>}]} {
    %c0 = arith.constant 0 : index
    %c0_0 = arith.constant 0 : index
    %0 = vector.load %arg1[%c0, %c0_0] : memref<8x4xf32, #tpu.memory_space<vmem>>, vector<8x4xf32>
    %c0_1 = arith.constant 0 : index
    %c0_2 = arith.constant 0 : index
    %1 = vector.load %arg2[%c0_1, %c0_2] : memref<4x512xf32, #tpu.memory_space<vmem>>, vector<4x512xf32>
    %cst = arith.constant dense<0.000000e+00> : vector<8x512xf32>
    %2 = tpu.matmul %0, %1, %cst {dimension_numbers = #tpu.dot_dimension_numbers<[1], [0], [0], [1], [0, 0, 1, 1], [], []>, precision = #tpu.contract_precision<fp32>} : vector<8x4xf32>, vector<4x512xf32>, vector<8x512xf32> -> vector<8x512xf32>
    %3 = tpu.iota {dimensions = array<i32: 1>} : vector<8x512xi32>
    %4 = arith.sitofp %3 : vector<8x512xi32> to vector<8x512xf32>
    %5 = arith.cmpf oeq, %4, %2 : vector<8x512xf32>
    %6 = arith.extui %5 : vector<8x512xi1> to vector<8x512xi32>
    %7 = arith.sitofp %6 : vector<8x512xi32> to vector<8x512xf32>
    %c0_3 = arith.constant 0 : index
    %c0_4 = arith.constant 0 : index
    %8 = vector.load %arg3[%c0_3, %c0_4] : memref<512x128xf32, #tpu.memory_space<vmem>>, vector<512x128xf32>
    %cst_5 = arith.constant dense<0.000000e+00> : vector<8x128xf32>
    %9 = tpu.matmul %7, %8, %cst_5 {dimension_numbers = #tpu.dot_dimension_numbers<[1], [0], [0], [1], [0, 0, 1, 1], [], []>, precision = #tpu.contract_precision<fp32>} : vector<8x512xf32>, vector<512x128xf32>, vector<8x128xf32> -> vector<8x128xf32>
    %c0_6 = arith.constant 0 : index
    %c0_7 = arith.constant 0 : index
    %10 = vector.load %arg4[%c0_6, %c0_7] : memref<8x128xf32, #tpu.memory_space<vmem>>, vector<8x128xf32>
    tpu.vector_store %arg4[%c0_6, %c0_7], %9 {strides = array<i32>} : memref<8x128xf32, #tpu.memory_space<vmem>>, vector<8x128xf32>,
    return
  }
  func.func @transform_0(%arg0: i32) -> (i32, i32) {
    %c0_i32 = arith.constant 0 : i32
    %c0_i32_0 = arith.constant 0 : i32
    return %arg0, %c0_i32 : i32, i32
  }
  func.func @transform_1(%arg0: i32) -> (i32, i32) {
    %c0_i32 = arith.constant 0 : i32
    %c0_i32_0 = arith.constant 0 : i32
    %c0_i32_1 = arith.constant 0 : i32
    return %c0_i32, %c0_i32_0 : i32, i32
  }
  func.func @transform_2(%arg0: i32) -> (i32, i32) {
    %c0_i32 = arith.constant 0 : i32
    %c0_i32_0 = arith.constant 0 : i32
    %c0_i32_1 = arith.constant 0 : i32
    return %c0_i32, %c0_i32_0 : i32, i32
  }
  func.func @transform_3(%arg0: i32) -> (i32, i32) {
    %c0_i32 = arith.constant 0 : i32
    %c0_i32_0 = arith.constant 0 : i32
    return %arg0, %c0_i32 : i32, i32
  }
}

</mosaic_0001>

<bundles_post_ra>
// kernel: tpu_custom_call.1
= control target key start
LH: loop header
LB: loop body
LE: loop exit
PB: predicated region body
PF: predicated region fallthrough
CT: control target
= control target key end

     0   :  { %8 = vsyncpa [#allocation3], 0  ;;  %s3359_s0 = inlined_call_operand.vmem [shape: f32[8,4], index: 0, kind: input, shape index: {}]   ;;  %s3360_s1 = inlined_call_operand.hbm [shape: f32[4,512], index: 1, kind: input, shape index: {}]   ;;  %s3361_s2 = inlined_call_operand.hbm [shape: f32[512,128], index: 2, kind: input, shape index: {}]   ;;  %s3362_s3 = inlined_call_operand.hbm [shape: f32[8,128], index: 3, kind: output, shape index: {}]  }
   0x1   :  { %9 = vsyncpa [#allocation6], 0 }
   0x2   :  { %10 = vsyncpa [#allocation4], 0  ;;  %s18_s14 = sshll.u32 %s3360_s1, 4  ;;  %s2223_s15 = smov [#allocation2]   ;;  %s19_s14 = int_to_ptr.hbm [resolvable:$true] %s18_s14 }
   0x3   :  { %s20_s16 = sshll.u32 %s2223_s15, 4  ;;  %s28_s19 = sshll.u32 %s3361_s2, 4  ;;  %s21_s16 = int_to_ptr.vmem [resolvable:$true] %s20_s16  ;;  %s29_s19 = int_to_ptr.hbm [resolvable:$true] %s28_s19 }
   0x4   :  { %23 = dma.hbm_to_vmem [thread:$0]  %s19_s14, 256, %s21_s16, [#allocation3]  }
   0x5   :  { %s2224_s20 = smov [#allocation5]   ;;  %s2225_s22 = smov 128  }
   0x6   :  { %s30_s21 = sshll.u32 %s2224_s20, 4  ;;  %s2226_s23 = smov 8   ;;  %s31_s21 = int_to_ptr.vmem [resolvable:$true] %s30_s21 }
   0x7   :  { %36 = dma.hbm_to_vmem [thread:$0]  %s29_s19, 8192, %s31_s21, [#allocation6], %s2225_s22, %s2225_s22, %s2226_s23  }
   0x8   :  { %2217 = dma.done.wait [#allocation3], 256  }
   0x9   :  { %2218 = vsyncadd [#allocation3], 4294967040 }
   0xa   :  { %2219 = dma.done.wait [#allocation6], 8192  }
   0xb   :  { %2220 = vsyncadd [#allocation6], 4294959104  ;;  %vm57_vm0 = vcmask 31744   ;;  %v46_v0 = vld [vmem:[#allocation2] sm:$0xff]  ;;  %v45_v1 = vld [vmem:[%s3359_s0] sm:$0xff]  ;;  %vm61_vm1 = vcmask 1043456  }
   0xc   :  { %50 = vst [vmem:[#allocation1] ss:$2 sm:$0xff] %v46_v0  ;;  %v59_v2 = vsel %vm57_vm0, %v45_v1, 0  ;;  %v47_v5 = vld [vmem:[#allocation2 + $0x8] sm:$0xff]  ;;  %v689_v38 = vld [vmem:[#allocation5 + $0x70] sm:$0xff]  ;;  %v688_v40 = vld [vmem:[#allocation5 + $0x68] sm:$0xff] }
   0xd   :  { %v2259_v3 = vand.u32 4294901760, %v59_v2  ;;  %52 = vst [vmem:[#allocation1 + $0x10] ss:$2 sm:$0xff] %v47_v5  ;;  %v690_v36 = vld [vmem:[#allocation5 + $0x78] sm:$0xff]  ;;  %v2288_v41 = vand.u32 4294901760, %v689_v38  ;;  %v687_v42 = vld [vmem:[#allocation5 + $0x60] sm:$0xff] }
   0xe   :  { %v2286_v39 = vand.u32 4294901760, %v690_v36  ;;  %v2296_v44 = vand.u32 4294901760, %v688_v40  ;;  %v686_v45 = vld [vmem:[#allocation5 + $0x58] sm:$0xff]  ;;  %v2302_v47 = vand.u32 4294901760, %v687_v42  ;;  %v685_v48 = vld [vmem:[#allocation5 + $0x50] sm:$0xff]  ;;  %v684_v52 = vld [vmem:[#allocation5 + $0x48] sm:$0xff] }
   0xf   :  { %v2262_v4 = vsub.f32 %v59_v2, %v2259_v3  ;;  %v2300_v46 = vsub.f32 %v689_v38, %v2288_v41  ;;  %v2308_v51 = vand.u32 4294901760, %v686_v45  ;;  %v2314_v55 = vand.u32 4294901760, %v685_v48  ;;  %v683_v56 = vld [vmem:[#allocation5 + $0x40] sm:$0xff]  ;;  %v682_v61 = vld [vmem:[#allocation5 + $0x38] sm:$0xff]  ;;  %v681_v2 = vld [vmem:[#allocation5 + $0x30] sm:$0xff]  ;;  %s2229_s0 = smov [#allocation7]  }
  0x10   :  { %v2294_v43 = vsub.f32 %v690_v36, %v2286_v39  ;;  %v2306_v50 = vsub.f32 %v688_v40, %v2296_v44  ;;  %v2312_v54 = vsub.f32 %v687_v42, %v2302_v47  ;;  %v2318_v57 = vand.u32 4294901760, %v684_v52  ;;  %v706_v36 = vld [vmem:[#allocation5 + $0xf8] sm:$0xff]  ;;  %s2109_s2 = sshll.u32 %s2229_s0, 4  ;;  %s2111_s27 = sshll.u32 %s3362_s3, 4  ;;  %s2110_s2 = int_to_ptr.vmem [resolvable:$true] %s2109_s2  ;;  %s2112_s27 = int_to_ptr.hbm [resolvable:$true] %s2111_s27 }
  0x11   :  { %v2265_v6 = vand.u32 4294901760, %v2262_v4  ;;  %v788_v53 = vand.u32 4294901760, %v2300_v46  ;;  %v2326_v60 = vsub.f32 %v686_v45, %v2308_v51  ;;  %v2330_v62 = vand.u32 4294901760, %v683_v56 }
  0x12   :  { %v782_v49 = vand.u32 4294901760, %v2294_v43  ;;  %v794_v59 = vand.u32 4294901760, %v2306_v50  ;;  %v800_v0 = vand.u32 4294901760, %v2312_v54  ;;  %v2339_v1 = vsub.f32 %v685_v48, %v2314_v55  ;;  %v675_v48 = vld [vmem:[#allocation5] sm:$0xff] }
  0x13   :  { %v53_v7 = vld.sshfl [vmem:[#allocation1] sm:$0xff pattern:$0x75316420]  ;;  %v90_v8 = vsub.f32 %v2262_v4, %v2265_v6  ;;  %v54_v9 = vld.sshfl [vmem:[#allocation1 + $0x8] sm:$0xff pattern:$0x75316420]  ;;  %v789_v63 = vsub.f32 %v2300_v46, %v788_v53  ;;  %v2343_v5 = vsub.f32 %v684_v52, %v2318_v57 }
  0x14   :  { %v62_v10 = vsel %vm61_vm1, %v53_v7, 0  ;;  %v64_v11 = vsel %vm61_vm1, %v54_v9, 0  ;;  %v55_v17 = vld.sshfl [vmem:[#allocation1 + $0x10] sm:$0xff pattern:$0x75316420]  ;;  %v783_v58 = vsub.f32 %v2294_v43, %v782_v49  ;;  %v2345_v7 = vand.u32 4294901760, %v682_v61 }
  0x15   :  { %v85_v12 = vand.u32 4294901760, %v62_v10  ;;  %v2271_v13 = vand.u32 4294901760, %v90_v8  ;;  %v231_v14 = vand.u32 4294901760, %v64_v11  ;;  %v66_v20 = vsel %vm61_vm1, %v55_v17, 0  ;;  %v705_v52 = vld [vmem:[#allocation5 + $0xf0] sm:$0xff] }
  0x16   :  { %v377_v21 = vand.u32 4294901760, %v66_v20  ;;  %v56_v28 = vld.sshfl [vmem:[#allocation1 + $0x18] sm:$0xff pattern:$0x75316420]  ;;  %v784_v8 = vand.u32 4294901760, %v783_v58  ;;  %v795_v9 = vsub.f32 %v2306_v50, %v794_v59  ;;  %v3374_v17 = vand.u32 4294901760, %v2343_v5 }
  0x17   :  { %v112_v15 = vsub.f32 %v62_v10, %v85_v12  ;;  %86 = vmatpush.msra.mxu0 %v85_v12  ;;  %162 = vmatpush.msra.mxu3 %v85_v12  ;;  %v258_v16 = vsub.f32 %v64_v11, %v231_v14  ;;  %v68_v30 = vsel %vm61_vm1, %v56_v28, 0  ;;  %v806_v10 = vand.u32 4294901760, %v2326_v60 }
  0x18   :  { %92 = vmatmul.f32.vlgmr.msra.gmra.mxu0 %v2271_v13  ;;  %166 = vmatmul.f32.vlgmr.msra.gmra.mxu3 %v2265_v6  ;;  %v404_v24 = vsub.f32 %v66_v20, %v377_v21  ;;  %v523_v31 = vand.u32 4294901760, %v68_v30  ;;  %v2355_v11 = vsub.f32 %v683_v56, %v2330_v62  ;;  %v796_v20 = vand.u32 4294901760, %v795_v9 }
  0x19   :  { %139 = vmatpush.msra.mxu2 %v112_v15  ;;  %v113_v18 = vand.u32 4294901760, %v112_v15  ;;  %v259_v19 = vand.u32 4294901760, %v258_v16 }
  0x1a   :  { %142 = vmatmul.f32.vlgmr.msra.gmra.mxu2 %v2262_v4  ;;  %v405_v27 = vand.u32 4294901760, %v404_v24  ;;  %v550_v32 = vsub.f32 %v68_v30, %v523_v31  ;;  %v677_v30 = vld [vmem:[#allocation5 + $0x10] sm:$0xff] }
  0x1b   :  { %v114_v22 = vsub.f32 %v112_v15, %v113_v18  ;;  %232 = vmatpush.msrb.mxu2 %v231_v14  ;;  %188 = vmatpush.msrb.mxu0 %v113_v18  ;;  %v260_v23 = vsub.f32 %v258_v16, %v259_v19  ;;  %v801_v15 = vsub.f32 %v2312_v54, %v800_v0  ;;  %v2411_v40 = vand.u32 4294901760, %v677_v30 }
  0x1c   :  { %v406_v29 = vsub.f32 %v404_v24, %v405_v27  ;;  %v551_v34 = vand.u32 4294901760, %v550_v32  ;;  %v2369_v18 = vsub.f32 %v682_v61, %v2345_v7 }
  0x1d   :  { %334 = vmatpush.msra.mxu2 %v259_v19  ;;  %285 = vmatpush.msra.mxu0 %v258_v16  ;;  %v115_v25 = vand.u32 4294901760, %v114_v22  ;;  %v261_v26 = vand.u32 4294901760, %v260_v23  ;;  %v812_v16 = vand.u32 4294901760, %v2339_v1  ;;  %v679_v19 = vld [vmem:[#allocation5 + $0x20] sm:$0xff]  ;;  %v3369_v23 = vand.u32 4294901760, %v2355_v11 }
  0x1e   :  { %v407_v33 = vand.u32 4294901760, %v406_v29  ;;  %v552_v35 = vsub.f32 %v550_v32, %v551_v34  ;;  %v2387_v28 = vand.u32 4294901760, %v679_v19  ;;  %v3367_v29 = vand.u32 4294901760, %v2369_v18 }
  0x1f   :  { %116 = vmatpush.msra.mxu1 %v115_v25  ;;  %262 = vmatpush.msrb.mxu3 %v261_v26  ;;  %v678_v25 = vld [vmem:[#allocation5 + $0x18] sm:$0xff]  ;;  %v802_v26 = vand.u32 4294901760, %v801_v15  ;;  %v2435_v9 = vsub.f32 %v677_v30, %v2411_v40  ;;  %v704_v15 = vld [vmem:[#allocation5 + $0xe8] sm:$0xff] }
  0x20   :  { %118 = vmatmul.f32.vlgmr.msra.gmra.mxu1 %v2259_v3  ;;  %190 = vmatmul.f32.vlgmr.msrb.gmra.mxu0 %v2259_v3  ;;  %v553_v37 = vand.u32 4294901760, %v552_v35  ;;  %v676_v35 = vld [vmem:[#allocation5 + $0x8] sm:$0xff]  ;;  %v2409_v38 = vsub.f32 %v679_v19, %v2387_v28  ;;  %v831_v45 = vsub.f32 %v2369_v18, %v3367_v29  ;;  %v2456_v30 = vand.u32 4294901760, %v704_v15 }
  0x21   :  { %264 = vmatmul.f32.vlgmr.msrb.gmra.mxu3 %v2259_v3  ;;  %210 = vmatpush.msrb.mxu1 %v85_v12  ;;  %v2357_v12 = vand.u32 4294901760, %v681_v2  ;;  %v2423_v61 = vand.u32 4294901760, %v676_v35 }
  0x22   :  { %238 = vmatmul.f32.vlgmr.msrb.gmra.mxu2 %v2271_v13  ;;  %356 = vmatpush.msra.mxu3 %v231_v14  ;;  %v832_v19 = vand.u32 4294901760, %v831_v45 }
  0x23   :  { %308 = vmatpush.msra.mxu1 %v231_v14  ;;  %431 = vmatpush.msrb.mxu2 %v404_v24  ;;  %v790_v14 = vand.u32 4294901760, %v789_v63  ;;  %v2381_v24 = vsub.f32 %v681_v2, %v2357_v12  ;;  %v2425_v63 = vand.u32 4294901760, %v706_v36 }
  0x24   :  { %378 = vmatpush.msrb.mxu0 %v377_v21  ;;  %454 = vmatpush.msrb.mxu3 %v377_v21 }
  0x28   :  { %212 = vmatmul.f32.vlgmr.msrb.gmra.mxu1 %v2259_v3  ;;  %288 = vmatmul.f32.vlgmr.msra.gmra.mxu0 %v2262_v4 }
  0x29   :  { %358 = vmatmul.f32.vlgmr.msra.gmra.mxu3 %v2259_v3  ;;  %408 = vmatpush.msrb.mxu1 %v407_v33  ;;  %v2399_v33 = vand.u32 4294901760, %v678_v25 }
  0x2a   :  { %336 = vmatmul.f32.vlgmr.msra.gmra.mxu2 %v2259_v3  ;;  %480 = vmatpush.msra.mxu0 %v405_v27  ;;  %v813_v27 = vsub.f32 %v2339_v1, %v812_v16 }
  0x2b   :  { %524 = vmatpush.msra.mxu2 %v523_v31  ;;  %554 = vmatpush.msra.mxu3 %v553_v37  ;;  %v2421_v58 = vsub.f32 %v678_v25, %v2399_v33  ;;  %v2449_v25 = vsub.f32 %v676_v35, %v2423_v61 }
  0x2c   :  { %v814_v37 = vand.u32 4294901760, %v813_v27  ;;  %v703_v27 = vld [vmem:[#allocation5 + $0xe0] sm:$0xff] }
  0x30   :  { %312 = vmatmul.f32.vlgmr.msra.gmra.mxu1 %v2265_v6  ;;  %384 = vmatmul.f32.vlgmr.msrb.gmra.mxu0 %v2271_v13 }
  0x31   :  { %458 = vmatmul.f32.vlgmr.msrb.gmra.mxu3 %v2265_v6  ;;  %502 = vmatpush.msra.mxu1 %v377_v21  ;;  %v807_v21 = vsub.f32 %v2326_v60, %v806_v10 }
  0x32   :  { %434 = vmatmul.f32.vlgmr.msrb.gmra.mxu2 %v2262_v4  ;;  %648 = vmatpush.msrb.mxu3 %v523_v31 }
  0x33   :  { %626 = vmatpush.msrb.mxu2 %v551_v34  ;;  %577 = vmatpush.msrb.mxu0 %v550_v32  ;;  %v3366_v34 = vand.u32 4294901760, %v2381_v24 }
  0x35   :  { %v837_v2 = vsub.f32 %v2381_v24, %v3366_v34 }
  0x38   :  { %410 = vmatmul.f32.vlgmr.msrb.gmra.mxu1 %v2259_v3  ;;  %482 = vmatmul.f32.vlgmr.msra.gmra.mxu0 %v2259_v3 }
  0x39   :  { %600 = vmatpush.msrb.mxu1 %v523_v31  ;;  %556 = vmatmul.f32.vlgmr.msra.gmra.mxu3 %v2259_v3  ;;  %v808_v31 = vand.u32 4294901760, %v807_v21  ;;  %v3364_v21 = vand.u32 4294901760, %v2421_v58 }
  0x3a   :  { %530 = vmatmul.f32.vlgmr.msra.gmra.mxu2 %v2271_v13  ;;  %936 = vmatpush.msra.mxu3 %v2286_v39  ;;  %v680_v13 = vld [vmem:[#allocation5 + $0x28] sm:$0xff] }
  0x3b   :  { %883 = vmatpush.msra.mxu2 %v2294_v43  ;;  %740 = vmatpush.msra.mxu0 %v2286_v39  ;;  %v2375_v22 = vand.u32 4294901760, %v680_v13 }
  0x3c   :  { %938 = vmatpush.msra.mxu3 %v2288_v41 }
  0x3d   :  { %886 = vmatpush.msra.mxu2 %v2300_v46  ;;  %742 = vmatpush.msra.mxu0 %v2288_v41  ;;  %v2397_v32 = vsub.f32 %v680_v13, %v2375_v22  ;;  %v2437_v13 = vand.u32 4294901760, %v675_v48  ;;  %v3410_v46 = vand.u32 4294901760, %v2369_v18 }
  0x3e   :  { %940 = vmatpush.msra.mxu3 %v2296_v44 }
  0x3f   :  { %889 = vmatpush.msra.mxu2 %v2306_v50  ;;  %744 = vmatpush.msra.mxu0 %v2296_v44  ;;  %v3365_v56 = vand.u32 4294901760, %v2397_v32  ;;  %v2464_v35 = vsub.f32 %v675_v48, %v2437_v13  ;;  %v3371_v48 = vand.u32 4294901760, %v2449_v25 }
  0x40   :  { %504 = vmatmul.f32.vlgmr.msra.gmra.mxu1 %v2259_v3  ;;  %942 = vmatpush.msra.mxu3 %v2302_v47 }
  0x41   :  { %785 = vmatpush.msra.mxu1 %v784_v8  ;;  %892 = vmatpush.msra.mxu2 %v2312_v54  ;;  %v3363_v8 = vand.u32 4294901760, %v2409_v38 }
  0x42   :  { %628 = vmatmul.f32.vlgmr.msrb.gmra.mxu2 %v2259_v3  ;;  %580 = vmatmul.f32.vlgmr.msrb.gmra.mxu0 %v2262_v4  ;;  %v819_v4 = vsub.f32 %v2343_v5, %v3374_v17 }
  0x43   :  { %791 = vmatpush.msra.mxu1 %v790_v14  ;;  %895 = vmatpush.msra.mxu2 %v2326_v60  ;;  %v2439_v14 = vand.u32 4294901760, %v705_v52  ;;  %v697_v60 = vld [vmem:[#allocation5 + $0xb0] sm:$0xff] }
  0x44   :  { %650 = vmatmul.f32.vlgmr.msrb.gmra.mxu3 %v2259_v3  ;;  %746 = vmatpush.msra.mxu0 %v2302_v47  ;;  %v825_v3 = vsub.f32 %v2355_v11, %v3369_v23  ;;  %v820_v42 = vand.u32 4294901760, %v819_v4  ;;  %v838_v4 = vand.u32 4294901760, %v837_v2  ;;  %v701_v2 = vld [vmem:[#allocation5 + $0xd0] sm:$0xff] }
  0x45   :  { %797 = vmatpush.msra.mxu1 %v796_v20  ;;  %898 = vmatpush.msra.mxu2 %v2339_v1  ;;  %v843_v20 = vsub.f32 %v2397_v32, %v3365_v56  ;;  %v3373_v56 = vand.u32 4294901760, %v2464_v35  ;;  %v2497_v29 = vand.u32 4294901760, %v701_v2  ;;  %v2605_v1 = vand.u32 4294901760, %v697_v60 }
  0x46   :  { %944 = vmatpush.msra.mxu3 %v2308_v51  ;;  %748 = vmatpush.msra.mxu0 %v2308_v51 }
  0x47   :  { %803 = vmatpush.msra.mxu1 %v802_v26  ;;  %901 = vmatpush.msra.mxu2 %v2343_v5  ;;  %v2452_v26 = vsub.f32 %v706_v36, %v2425_v63  ;;  %v2467_v36 = vsub.f32 %v705_v52, %v2439_v14  ;;  %v844_v45 = vand.u32 4294901760, %v843_v20 }
  0x48   :  { %604 = vmatmul.f32.vlgmr.msrb.gmra.mxu1 %v2265_v6  ;;  %946 = vmatpush.msra.mxu3 %v2314_v55  ;;  %v826_v6 = vand.u32 4294901760, %v825_v3  ;;  %v3368_v3 = vand.u32 4294901760, %v2435_v9 }
  0x49   :  { %809 = vmatpush.msra.mxu1 %v808_v31  ;;  %904 = vmatpush.msra.mxu2 %v2355_v11  ;;  %v849_v31 = vsub.f32 %v2409_v38, %v3363_v8  ;;  %v3370_v52 = vand.u32 4294901760, %v2452_v26  ;;  %v2482_v8 = vsub.f32 %v704_v15, %v2456_v30  ;;  %v3372_v34 = vand.u32 4294901760, %v2467_v36 }
  0x4a   :  { %948 = vmatpush.msra.mxu3 %v2318_v57  ;;  %750 = vmatpush.msra.mxu0 %v2314_v55 }
  0x4b   :  { %815 = vmatpush.msra.mxu1 %v814_v37  ;;  %907 = vmatpush.msra.mxu2 %v2369_v18  ;;  %v702_v37 = vld [vmem:[#allocation5 + $0xd8] sm:$0xff]  ;;  %v850_v20 = vand.u32 4294901760, %v849_v31  ;;  %v867_v31 = vsub.f32 %v2449_v25, %v3371_v48 }
  0x4c   :  { %950 = vmatpush.msra.mxu3 %v2330_v62  ;;  %752 = vmatpush.msra.mxu0 %v2318_v57 }
  0x4d   :  { %821 = vmatpush.msra.mxu1 %v820_v42  ;;  %910 = vmatpush.msra.mxu2 %v2381_v24  ;;  %v2471_v42 = vand.u32 4294901760, %v703_v27 }
  0x4e   :  { %952 = vmatpush.msra.mxu3 %v2345_v7  ;;  %754 = vmatpush.msra.mxu0 %v2330_v62 }
  0x4f   :  { %827 = vmatpush.msra.mxu1 %v826_v6  ;;  %913 = vmatpush.msra.mxu2 %v2397_v32  ;;  %v855_v6 = vsub.f32 %v2421_v58, %v3364_v21  ;;  %v861_v21 = vsub.f32 %v2435_v9, %v3368_v3  ;;  %v2495_v15 = vsub.f32 %v703_v27, %v2471_v42  ;;  %v1135_v27 = vand.u32 4294901760, %v2482_v8 }
  0x50   :  { %954 = vmatpush.msra.mxu3 %v2357_v12  ;;  %756 = vmatpush.msra.mxu0 %v2345_v7  ;;  %v1124_v3 = vsub.f32 %v2452_v26, %v3370_v52  ;;  %v1130_v52 = vsub.f32 %v2467_v36, %v3372_v34 }
  0x51   :  { %833 = vmatpush.msra.mxu1 %v832_v19  ;;  %916 = vmatpush.msra.mxu2 %v2409_v38  ;;  %v2484_v19 = vand.u32 4294901760, %v702_v37  ;;  %v1141_v48 = vand.u32 4294901760, %v2495_v15  ;;  %v1136_v34 = vsub.f32 %v2482_v8, %v1135_v27 }
  0x52   :  { %956 = vmatpush.msra.mxu3 %v2375_v22  ;;  %758 = vmatpush.msra.mxu0 %v2357_v12 }
  0x53   :  { %839 = vmatpush.msra.mxu1 %v838_v4  ;;  %919 = vmatpush.msra.mxu2 %v2421_v58  ;;  %v856_v4 = vand.u32 4294901760, %v855_v6  ;;  %v2510_v23 = vsub.f32 %v702_v37, %v2484_v19  ;;  %v873_v6 = vsub.f32 %v2464_v35, %v3373_v56  ;;  %v2523_v37 = vsub.f32 %v701_v2, %v2497_v29 }
  0x54   :  { %958 = vmatpush.msra.mxu3 %v2387_v28  ;;  %760 = vmatpush.msra.mxu0 %v2375_v22  ;;  %v1131_v2 = vand.u32 4294901760, %v1130_v52 }
  0x55   :  { %845 = vmatpush.msra.mxu1 %v844_v45  ;;  %922 = vmatpush.msra.mxu2 %v2435_v9  ;;  %v862_v45 = vand.u32 4294901760, %v861_v21  ;;  %v868_v21 = vand.u32 4294901760, %v867_v31  ;;  %v1147_v56 = vand.u32 4294901760, %v2510_v23  ;;  %v874_v17 = vand.u32 4294901760, %v873_v6 }
  0x56   :  { %960 = vmatpush.msra.mxu3 %v2399_v33  ;;  %762 = vmatpush.msra.mxu0 %v2387_v28  ;;  %v1137_v31 = vand.u32 4294901760, %v1136_v34 }
  0x57   :  { %851 = vmatpush.msra.mxu1 %v850_v20  ;;  %925 = vmatpush.msra.mxu2 %v2449_v25  ;;  %v1125_v20 = vand.u32 4294901760, %v1124_v3  ;;  %v1142_v3 = vsub.f32 %v2495_v15, %v1141_v48  ;;  %v1148_v52 = vsub.f32 %v2510_v23, %v1147_v56 }
  0x58   :  { %962 = vmatpush.msra.mxu3 %v2411_v40  ;;  %764 = vmatpush.msra.mxu0 %v2399_v33 }
  0x59   :  { %857 = vmatpush.msra.mxu1 %v856_v4  ;;  %928 = vmatpush.msra.mxu2 %v2464_v35  ;;  %v1153_v4 = vand.u32 4294901760, %v2523_v37  ;;  %v1149_v34 = vand.u32 4294901760, %v1148_v52 }
  0x5a   :  { %964 = vmatpush.msra.mxu3 %v2423_v61  ;;  %766 = vmatpush.msra.mxu0 %v2411_v40 }
  0x5b   :  { %1081 = vmatpush.msrb.mxu2 %v2425_v63  ;;  %863 = vmatpush.msra.mxu1 %v862_v45  ;;  %v1143_v45 = vand.u32 4294901760, %v1142_v3  ;;  %v1154_v6 = vsub.f32 %v2523_v37, %v1153_v4 }
  0x5c   :  { %966 = vmatpush.msra.mxu3 %v2437_v13  ;;  %768 = vmatpush.msra.mxu0 %v2423_v61 }
  0x5d   :  { %1083 = vmatpush.msrb.mxu2 %v2439_v14  ;;  %869 = vmatpush.msra.mxu1 %v868_v21 }
  0x5e   :  { %1126 = vmatpush.msrb.mxu3 %v1125_v20  ;;  %770 = vmatpush.msra.mxu0 %v2437_v13  ;;  %v694_v20 = vld [vmem:[#allocation5 + $0x98] sm:$0xff] }
  0x5f   :  { %1085 = vmatpush.msrb.mxu2 %v2456_v30  ;;  %875 = vmatpush.msra.mxu1 %v874_v17  ;;  %v700_v17 = vld [vmem:[#allocation5 + $0xc8] sm:$0xff] }
  0x60   :  { %1132 = vmatpush.msrb.mxu3 %v1131_v2  ;;  %977 = vmatpush.msrb.mxu0 %v782_v49  ;;  %v2560_v43 = vand.u32 4294901760, %v700_v17 }
  0x61   :  { %1044 = vmatpush.msrb.mxu1 %v2286_v39  ;;  %1087 = vmatpush.msrb.mxu2 %v2471_v42  ;;  %v1155_v39 = vand.u32 4294901760, %v1154_v6  ;;  %v693_v6 = vld [vmem:[#allocation5 + $0x90] sm:$0xff] }
  0x62   :  { %1138 = vmatpush.msrb.mxu3 %v1137_v31  ;;  %981 = vmatpush.msrb.mxu0 %v788_v53  ;;  %v2585_v50 = vsub.f32 %v700_v17, %v2560_v43  ;;  %v698_v53 = vld [vmem:[#allocation5 + $0xb8] sm:$0xff]  ;;  %v2641_v31 = vand.u32 4294901760, %v694_v20  ;;  %v2657_v17 = vand.u32 4294901760, %v693_v6 }
  0x63   :  { %1046 = vmatpush.msrb.mxu1 %v2288_v41  ;;  %1089 = vmatpush.msrb.mxu2 %v2484_v19  ;;  %v3408_v41 = vand.u32 4294901760, %v2343_v5 }
  0x64   :  { %1144 = vmatpush.msrb.mxu3 %v1143_v45  ;;  %985 = vmatpush.msrb.mxu0 %v794_v59  ;;  %v1159_v54 = vand.u32 4294901760, %v2585_v50  ;;  %v3412_v59 = vand.u32 4294901760, %v2397_v32 }
  0x65   :  { %1048 = vmatpush.msrb.mxu1 %v2296_v44  ;;  %1091 = vmatpush.msrb.mxu2 %v2497_v29  ;;  %v3409_v44 = vand.u32 4294901760, %v2355_v11 }
  0x66   :  { %1150 = vmatpush.msrb.mxu3 %v1149_v34  ;;  %989 = vmatpush.msrb.mxu0 %v800_v0 }
  0x67   :  { %1050 = vmatpush.msrb.mxu1 %v2302_v47  ;;  %1093 = vmatpush.msrb.mxu2 %v2560_v43  ;;  %v699_v47 = vld [vmem:[#allocation5 + $0xc0] sm:$0xff] }
  0x68   :  { %1156 = vmatpush.msrb.mxu3 %v1155_v39  ;;  %993 = vmatpush.msrb.mxu0 %v806_v10  ;;  %v2582_v49 = vand.u32 4294901760, %v699_v47  ;;  %v696_v10 = vld [vmem:[#allocation5 + $0xa8] sm:$0xff]  ;;  %v2660_v39 = vsub.f32 %v694_v20, %v2641_v31 }
  0x69   :  { %1052 = vmatpush.msrb.mxu1 %v2308_v51  ;;  %v3411_v51 = vand.u32 4294901760, %v2381_v24  ;;  %v2618_v18 = vand.u32 4294901760, %v696_v10  ;;  %v2623_v24 = vsub.f32 %v697_v60, %v2605_v1  ;;  %v691_v60 = vld [vmem:[#allocation5 + $0x80] sm:$0xff] }
  0x6a   :  { %997 = vmatpush.msrb.mxu0 %v812_v16  ;;  %1095 = vmatpush.msrb.mxu2 %v2582_v49 }
  0x6b   :  { %1054 = vmatpush.msrb.mxu1 %v2314_v55  ;;  %v2592_v55 = vand.u32 4294901760, %v698_v53  ;;  %v2633_v21 = vsub.f32 %v696_v10, %v2618_v18 }
  0x6c   :  { %1001 = vmatpush.msrb.mxu0 %v3408_v41 }
  0x6d   :  { %1056 = vmatpush.msrb.mxu1 %v2318_v57  ;;  %v2595_v57 = vsub.f32 %v699_v47, %v2582_v49  ;;  %1097 = vmatpush.msrb.mxu2 %v2592_v55  ;;  %v2608_v5 = vsub.f32 %v698_v53, %v2592_v55  ;;  %v1183_v3 = vand.u32 4294901760, %v2633_v21  ;;  %v1195_v47 = vand.u32 4294901760, %v2660_v39 }
  0x6e   :  { %1005 = vmatpush.msrb.mxu0 %v3409_v44  ;;  %v692_v44 = vld [vmem:[#allocation5 + $0x88] sm:$0xff]  ;;  %v2672_v53 = vsub.f32 %v693_v6, %v2657_v17 }
  0x6f   :  { %1058 = vmatpush.msrb.mxu1 %v2330_v62  ;;  %v1160_v62 = vsub.f32 %v2585_v50, %v1159_v54  ;;  %v1165_v0 = vand.u32 4294901760, %v2595_v57  ;;  %1099 = vmatpush.msrb.mxu2 %v2605_v1  ;;  %v1171_v16 = vand.u32 4294901760, %v2608_v5 }
  0x70   :  { %1009 = vmatpush.msrb.mxu0 %v3410_v46 }
  0x71   :  { %1060 = vmatpush.msrb.mxu1 %v2345_v7  ;;  %v3413_v7 = vand.u32 4294901760, %v2409_v38  ;;  %v1161_v11 = vand.u32 4294901760, %v1160_v62  ;;  %1101 = vmatpush.msrb.mxu2 %v2618_v18  ;;  %v1201_v62 = vand.u32 4294901760, %v2672_v53 }
  0x72   :  { %1013 = vmatpush.msrb.mxu0 %v3411_v51  ;;  %v2669_v51 = vand.u32 4294901760, %v692_v44 }
  0x73   :  { %1062 = vmatpush.msrb.mxu1 %v2357_v12  ;;  %v1166_v12 = vsub.f32 %v2595_v57, %v1165_v0  ;;  %1162 = vmatpush.msrb.mxu3 %v1161_v11 }
  0x74   :  { %1017 = vmatpush.msrb.mxu0 %v3412_v59  ;;  %v2682_v10 = vsub.f32 %v692_v44, %v2669_v51 }
  0x75   :  { %1064 = vmatpush.msrb.mxu1 %v2375_v22  ;;  %v3414_v22 = vand.u32 4294901760, %v2421_v58  ;;  %v1167_v32 = vand.u32 4294901760, %v1166_v12  ;;  %v1177_v58 = vand.u32 4294901760, %v2623_v24  ;;  %v1202_v12 = vsub.f32 %v2672_v53, %v1201_v62 }
  0x76   :  { %1021 = vmatpush.msrb.mxu0 %v3413_v7  ;;  %v2679_v7 = vand.u32 4294901760, %v691_v60 }
  0x77   :  { %1066 = vmatpush.msrb.mxu1 %v2387_v28  ;;  %v695_v28 = vld [vmem:[#allocation5 + $0xa0] sm:$0xff]  ;;  %1168 = vmatpush.msrb.mxu3 %v1167_v32  ;;  %v1178_v45 = vsub.f32 %v2623_v24, %v1177_v58  ;;  %v1203_v32 = vand.u32 4294901760, %v1202_v12 }
  0x78   :  { %1025 = vmatpush.msrb.mxu0 %v3414_v22  ;;  %v2630_v38 = vand.u32 4294901760, %v695_v28  ;;  %v3376_v22 = vand.u32 4294901760, %v2682_v10 }
  0x79   :  { %1068 = vmatpush.msrb.mxu1 %v2399_v33  ;;  %v1172_v33 = vsub.f32 %v2608_v5, %v1171_v16  ;;  %v1179_v41 = vand.u32 4294901760, %v1178_v45 }
  0x7a   :  { %1103 = vmatpush.msrb.mxu2 %v2630_v38  ;;  %v2644_v52 = vsub.f32 %v695_v28, %v2630_v38  ;;  %v2690_v28 = vsub.f32 %v691_v60, %v2679_v7 }
  0x7b   :  { %1070 = vmatpush.msrb.mxu1 %v2411_v40  ;;  %v3415_v40 = vand.u32 4294901760, %v2435_v9  ;;  %v1173_v2 = vand.u32 4294901760, %v1172_v33  ;;  %v1184_v9 = vsub.f32 %v2633_v21, %v1183_v3  ;;  %v1208_v33 = vsub.f32 %v2682_v10, %v3376_v22 }
  0x7c   :  { %1105 = vmatpush.msrb.mxu2 %v2641_v31  ;;  %v1189_v34 = vand.u32 4294901760, %v2644_v52  ;;  %v3375_v20 = vand.u32 4294901760, %v2690_v28  ;;  %v3390_v22 = vmov 0.0  }
  0x7d   :  { %1072 = vmatpush.msrb.mxu1 %v2423_v61  ;;  %1029 = vmatpush.msrb.mxu0 %v3415_v40  ;;  %v3416_v61 = vand.u32 4294901760, %v2449_v25  ;;  %v1185_v25 = vand.u32 4294901760, %v1184_v9  ;;  %v1209_v40 = vand.u32 4294901760, %v1208_v33  ;;  %v654_v9 = vlaneseq }
  0x7e   :  { %1174 = vmatpush.msrb.mxu3 %v1173_v2  ;;  %v1190_v46 = vsub.f32 %v2644_v52, %v1189_v34  ;;  %1107 = vmatpush.msrb.mxu2 %v2657_v17  ;;  %v1214_v2 = vsub.f32 %v2690_v28, %v3375_v20 }
  0x7f   :  { %1074 = vmatpush.msrb.mxu1 %v2437_v13  ;;  %1033 = vmatpush.msrb.mxu0 %v3416_v61  ;;  %v3417_v13 = vand.u32 4294901760, %v2464_v35  ;;  %v1196_v35 = vsub.f32 %v2660_v39, %v1195_v47 }
  0x80   :  { %1180 = vmatpush.msrb.mxu3 %v1179_v41  ;;  %v1191_v59 = vand.u32 4294901760, %v1190_v46  ;;  %1109 = vmatpush.msrb.mxu2 %v2669_v51  ;;  %v1215_v45 = vand.u32 4294901760, %v1214_v2 }
  0x81   :  { %1037 = vmatpush.msrb.mxu0 %v3417_v13  ;;  %v1197_v11 = vand.u32 4294901760, %v1196_v35 }
  0x82   :  { %1186 = vmatpush.msrb.mxu3 %v1185_v25  ;;  %1111 = vmatpush.msrb.mxu2 %v2679_v7 }
  0x84   :  { %1192 = vmatpush.msrb.mxu3 %v1191_v59  ;;  %v2699_v59 = vand.u32 127, %v654_v9  ;;  %v3394_v9 = vmov 1.0  }
  0x86   :  { %1198 = vmatpush.msrb.mxu3 %v1197_v11  ;;  %v659_v11 = vcvt.s32.f32 %v2699_v59 }
  0x88   :  { %1204 = vmatpush.msrb.mxu3 %v1203_v32 }
  0x8a   :  { %1210 = vmatpush.msrb.mxu3 %v1209_v40 }
  0x8c   :  { %1216 = vmatpush.msrb.mxu3 %v1215_v45 }
  0x95   :  { %v93_v6 = vpop.f32.mrf.mxu0 }
  0x9b   :  { %v167_v61 = vpop.f32.mrf.mxu3 }
  0x9d   :  { %v119_v41 = vpop.f32.mrf.mxu1  ;;  %v143_v44 = vpop.f32.mrf.mxu2 }
  0x9e   :  { %v120_v13 = vadd.f32 %v119_v41, %v93_v6  ;;  %v191_v25 = vpop.f32.mrf.mxu0 }
  0xa0   :  { %v144_v46 = vadd.f32 %v143_v44, %v120_v13  ;;  %v656_v13 = vadd.s32 128, %v2699_v59 }
  0xa2   :  { %v168_v35 = vadd.f32 %v167_v61, %v144_v46 }
  0xa4   :  { %v192_v60 = vadd.f32 %v191_v25, %v168_v35  ;;  %v265_v12 = vpop.f32.mrf.mxu3  ;;  %v3420_v25 = vand.u32 4294901760, %v2452_v26 }
  0xa5   :  { %v213_v32 = vpop.f32.mrf.mxu1  ;;  %v239_v33 = vpop.f32.mrf.mxu2 }
  0xa6   :  { %v214_v40 = vadd.f32 %v213_v32, %v192_v60  ;;  %v266_v2 = vadd.f32 %v265_v12, %v239_v33  ;;  %v289_v45 = vpop.f32.mrf.mxu0  ;;  %v3421_v12 = vand.u32 4294901760, %v2467_v36 }
  0xa8   :  { %vm2702_vm2 = vcmp.eq.f32.partialorder %v659_v11, %v214_v40  ;;  %v290_v41 = vadd.f32 %v289_v45, %v266_v2  ;;  %v660_v40 = vcvt.s32.f32 %v656_v13 }
  0xa9   :  { %v2122_v6 = vsel %vm2702_vm2, 1.0, %v3390_v22  ;;  %2126 = vmatmul.msk.f32.vlgmr.msra.gmra.mxu1 %vm2702_vm2, %v3394_v9 }
  0xaa   :  { %v772_v61 = vsub.f32 %v2122_v6, %v2122_v6  ;;  %1277 = vmatpush.msra.mxu1 %v2425_v63 }
  0xac   :  { %1279 = vmatpush.msra.mxu1 %v2439_v14  ;;  %931 = vmatmul.f32.vlgmr.msra.gmra.mxu2 %v772_v61  ;;  %v773_v44 = vand.u32 4294901760, %v772_v61  ;;  %v359_v32 = vpop.f32.mrf.mxu3 }
  0xad   :  { %1318 = vmatpush.msra.mxu2 %v3420_v25  ;;  %v313_v46 = vpop.f32.mrf.mxu1  ;;  %v337_v35 = vpop.f32.mrf.mxu2 }
  0xae   :  { %v314_v60 = vadd.f32 %v313_v46, %v290_v41  ;;  %1281 = vmatpush.msra.mxu1 %v2456_v30  ;;  %970 = vmatmul.f32.vlgmr.msra.gmra.mxu3 %v773_v44  ;;  %v774_v11 = vsub.f32 %v772_v61, %v773_v44  ;;  %v715_v61 = vld [vmem:[#allocation5 + $0x140] sm:$0xff]  ;;  %v714_v41 = vld [vmem:[#allocation5 + $0x138] sm:$0xff] }
  0xaf   :  { %1322 = vmatpush.msra.mxu2 %v3421_v12  ;;  %1385 = vmatpush.msra.mxu3 %v2425_v63  ;;  %v2854_v46 = vand.u32 4294901760, %v714_v41 }
  0xb0   :  { %v338_v33 = vadd.f32 %v337_v35, %v314_v60  ;;  %1283 = vmatpush.msra.mxu1 %v2471_v42  ;;  %v775_v2 = vand.u32 4294901760, %v774_v11  ;;  %v712_v11 = vld [vmem:[#allocation5 + $0x128] sm:$0xff] }
  0xb1   :  { %1326 = vmatpush.msra.mxu2 %v1135_v27  ;;  %1387 = vmatpush.msra.mxu3 %v2439_v14  ;;  %v722_v27 = vld [vmem:[#allocation5 + $0x178] sm:$0xff] }
  0xb2   :  { %v360_v45 = vadd.f32 %v359_v32, %v338_v33  ;;  %2128 = vmatmul.msk.f32.vlgmr.msrb.gmra.mxu1 %vm2702_vm2, %v3394_v9  ;;  %776 = vmatmul.f32.vlgmr.msra.gmra.mxu0 %v775_v2  ;;  %v385_v32 = vpop.f32.mrf.mxu0 }
  0xb3   :  { %1285 = vmatpush.msra.mxu1 %v2484_v19  ;;  %1224 = vmatpush.msra.mxu0 %v2452_v26 }
  0xb4   :  { %vm2730_vm3 = vcmp.eq.f32.partialorder %v660_v40, %v360_v45  ;;  %1330 = vmatpush.msra.mxu2 %v1141_v48  ;;  %1389 = vmatpush.msra.mxu3 %v2456_v30  ;;  %v2753_v30 = vand.u32 4294901760, %v722_v27  ;;  %v3425_v45 = vand.u32 4294901760, %v2690_v28 }
  0xb5   :  { %v2123_v14 = vsel %vm2730_vm3, 1.0, %v3390_v22  ;;  %1287 = vmatpush.msra.mxu1 %v2497_v29  ;;  %1227 = vmatpush.msra.mxu0 %v2467_v36  ;;  %v721_v36 = vld [vmem:[#allocation5 + $0x170] sm:$0xff] }
  0xb6   :  { %v2742_v6 = vsub.f32 %v2123_v14, %v2123_v14  ;;  %1334 = vmatpush.msra.mxu2 %v1147_v56  ;;  %1391 = vmatpush.msra.mxu3 %v2471_v42  ;;  %v2767_v42 = vand.u32 4294901760, %v721_v36 }
  0xb7   :  { %1289 = vmatpush.msra.mxu1 %v2560_v43  ;;  %1230 = vmatpush.msra.mxu0 %v2482_v8  ;;  %v720_v8 = vld [vmem:[#allocation5 + $0x168] sm:$0xff] }
  0xb8   :  { %1338 = vmatpush.msra.mxu2 %v1153_v4  ;;  %1393 = vmatpush.msra.mxu3 %v2484_v19  ;;  %v1114_v26 = vand.u32 4294901760, %v2742_v6  ;;  %v2777_v19 = vand.u32 4294901760, %v720_v8  ;;  %v718_v4 = vld [vmem:[#allocation5 + $0x158] sm:$0xff] }
  0xb9   :  { %1291 = vmatpush.msra.mxu1 %v2582_v49  ;;  %1233 = vmatpush.msra.mxu0 %v2495_v15  ;;  %v719_v15 = vld [vmem:[#allocation5 + $0x160] sm:$0xff] }
  0xba   :  { %1342 = vmatpush.msra.mxu2 %v1159_v54  ;;  %1395 = vmatpush.msra.mxu3 %v2497_v29  ;;  %v1115_v56 = vsub.f32 %v2742_v6, %v1114_v26  ;;  %v2773_v29 = vsub.f32 %v722_v27, %v2753_v30  ;;  %v2789_v54 = vand.u32 4294901760, %v719_v15  ;;  %v2880_v27 = vsub.f32 %v714_v41, %v2854_v46  ;;  %v708_v41 = vld [vmem:[#allocation5 + $0x108] sm:$0xff] }
  0xbb   :  { %1293 = vmatpush.msra.mxu1 %v2592_v55  ;;  %2127 = vmatmul.msk.f32.vlgmr.msrb.gmra.mxu0 %vm2702_vm2, %v3394_v9 }
  0xbc   :  { %1236 = vmatpush.msra.mxu0 %v2510_v23  ;;  %1346 = vmatpush.msra.mxu2 %v1165_v0  ;;  %v1116_v48 = vand.u32 4294901760, %v1115_v56  ;;  %v2785_v23 = vsub.f32 %v721_v36, %v2767_v42  ;;  %v716_v0 = vld [vmem:[#allocation5 + $0x148] sm:$0xff]  ;;  %v710_v56 = vld [vmem:[#allocation5 + $0x118] sm:$0xff] }
  0xbd   :  { %1397 = vmatpush.msra.mxu3 %v2560_v43  ;;  %1295 = vmatpush.msra.mxu1 %v2605_v1  ;;  %v3397_v43 = vand.u32 4294901760, %v2773_v29 }
  0xbe   :  { %1239 = vmatpush.msra.mxu0 %v2523_v37  ;;  %1350 = vmatpush.msra.mxu2 %v1171_v16  ;;  %v2795_v37 = vsub.f32 %v720_v8, %v2777_v19 }
  0xbf   :  { %1399 = vmatpush.msra.mxu3 %v2582_v49  ;;  %1297 = vmatpush.msra.mxu1 %v2618_v18  ;;  %v717_v49 = vld [vmem:[#allocation5 + $0x150] sm:$0xff]  ;;  %v1465_v16 = vsub.f32 %v2773_v29, %v3397_v43 }
  0xc0   :  { %1117 = vmatmul.f32.vlgmr.msrb.gmra.mxu2 %v1116_v48  ;;  %1242 = vmatpush.msra.mxu0 %v2585_v50  ;;  %v2801_v50 = vand.u32 4294901760, %v718_v4  ;;  %v2815_v20 = vand.u32 4294901760, %v717_v49 }
  0xc1   :  { %1354 = vmatpush.msra.mxu2 %v1177_v58  ;;  %1401 = vmatpush.msra.mxu3 %v2592_v55  ;;  %v3396_v55 = vand.u32 4294901760, %v2785_v23  ;;  %v2813_v58 = vsub.f32 %v719_v15, %v2789_v54 }
  0xc2   :  { %1299 = vmatpush.msra.mxu1 %v2630_v38  ;;  %2129 = vmatmul.msk.f32.vlgmr.msrb.gmra.mxu3 %vm2730_vm3, %v3394_v9  ;;  %v2840_v13 = vsub.f32 %v717_v49, %v2815_v20 }
  0xc3   :  { %1245 = vmatpush.msra.mxu0 %v2595_v57  ;;  %1358 = vmatpush.msra.mxu2 %v1183_v3  ;;  %v3392_v57 = vand.u32 4294901760, %v2795_v37  ;;  %v2826_v3 = vsub.f32 %v718_v4, %v2801_v50  ;;  %v3391_v44 = vand.u32 4294901760, %v2813_v58 }
  0xc4   :  { %1403 = vmatpush.msra.mxu3 %v2605_v1  ;;  %1301 = vmatpush.msra.mxu1 %v2641_v31  ;;  %v2821_v1 = vand.u32 4294901760, %v716_v0  ;;  %v3387_v12 = vand.u32 4294901760, %v2840_v13 }
  0xc5   :  { %1248 = vmatpush.msra.mxu0 %v2608_v5  ;;  %1362 = vmatpush.msra.mxu2 %v1189_v34  ;;  %v1471_v5 = vsub.f32 %v2785_v23, %v3396_v55  ;;  %v2834_v34 = vand.u32 4294901760, %v715_v61  ;;  %v3388_v25 = vand.u32 4294901760, %v2826_v3 }
  0xc6   :  { %1405 = vmatpush.msra.mxu3 %v2618_v18  ;;  %1303 = vmatpush.msra.mxu1 %v2657_v17  ;;  %v1466_v18 = vand.u32 4294901760, %v1465_v16  ;;  %v1495_v8 = vsub.f32 %v2840_v13, %v3387_v12  ;;  %v3384_v16 = vand.u32 4294901760, %v2880_v27 }
  0xc7   :  { %1251 = vmatpush.msra.mxu0 %v2623_v24  ;;  %1366 = vmatpush.msra.mxu2 %v1195_v47  ;;  %v1477_v24 = vsub.f32 %v2795_v37, %v3392_v57  ;;  %v2849_v47 = vsub.f32 %v716_v0, %v2821_v1  ;;  %v1472_v35 = vand.u32 4294901760, %v1471_v5  ;;  %v2860_v60 = vsub.f32 %v715_v61, %v2834_v34  ;;  %v709_v0 = vld [vmem:[#allocation5 + $0x110] sm:$0xff] }
  0xc8   :  { %1407 = vmatpush.msra.mxu3 %v2630_v38  ;;  %1305 = vmatpush.msra.mxu1 %v2669_v51  ;;  %v713_v38 = vld [vmem:[#allocation5 + $0x130] sm:$0xff]  ;;  %v1489_v14 = vsub.f32 %v2826_v3, %v3388_v25  ;;  %v2910_v5 = vand.u32 4294901760, %v710_v56 }
  0xc9   :  { %1254 = vmatpush.msra.mxu0 %v2633_v21  ;;  %1370 = vmatpush.msra.mxu2 %v1201_v62  ;;  %v411_v21 = vpop.f32.mrf.mxu1  ;;  %v3424_v62 = vand.u32 4294901760, %v2682_v10  ;;  %v2867_v33 = vand.u32 4294901760, %v713_v38  ;;  %v3386_v40 = vand.u32 4294901760, %v2849_v47  ;;  %v3385_v36 = vand.u32 4294901760, %v2860_v60 }
  0xca   :  { %1409 = vmatpush.msra.mxu3 %v2641_v31  ;;  %1307 = vmatpush.msra.mxu1 %v2679_v7  ;;  %v1483_v31 = vsub.f32 %v2813_v58, %v3391_v44  ;;  %v412_v2 = vadd.f32 %v411_v21, %v385_v32  ;;  %v2922_v21 = vand.u32 4294901760, %v709_v0  ;;  %v2932_v32 = vsub.f32 %v710_v56, %v2910_v5 }
  0xcb   :  { %1257 = vmatpush.msra.mxu0 %v2644_v52  ;;  %1374 = vmatpush.msra.mxu2 %v3424_v62  ;;  %v1478_v52 = vand.u32 4294901760, %v1477_v24  ;;  %v2894_v48 = vsub.f32 %v713_v38, %v2867_v33  ;;  %v1501_v4 = vsub.f32 %v2849_v47, %v3386_v40  ;;  %v1507_v63 = vsub.f32 %v2860_v60, %v3385_v36  ;;  %v733_v36 = vld [vmem:[#allocation5 + $0x1d0] sm:$0xff] }
  0xcc   :  { %1411 = vmatpush.msra.mxu3 %v2657_v17  ;;  %1467 = vmatpush.msrb.mxu1 %v1466_v18  ;;  %v711_v17 = vld [vmem:[#allocation5 + $0x120] sm:$0xff]  ;;  %v1496_v18 = vand.u32 4294901760, %v1495_v8  ;;  %v657_v56 = vadd.s32 256, %v2699_v59 }
  0xcd   :  { %1311 = vmatmul.f32.vlgmr.msra.gmra.mxu1 %v1114_v26  ;;  %1260 = vmatpush.msra.mxu0 %v2660_v39  ;;  %v2882_v26 = vand.u32 4294901760, %v712_v11  ;;  %v435_v39 = vpop.f32.mrf.mxu2  ;;  %v2896_v15 = vand.u32 4294901760, %v711_v17  ;;  %v3383_v24 = vand.u32 4294901760, %v2894_v48 }
  0xce   :  { %1378 = vmatpush.msra.mxu2 %v3425_v45  ;;  %1413 = vmatpush.msra.mxu3 %v2669_v51  ;;  %v1484_v51 = vand.u32 4294901760, %v1483_v31  ;;  %v436_v49 = vadd.f32 %v435_v39, %v412_v2  ;;  %v2934_v2 = vand.u32 4294901760, %v708_v41  ;;  %v2944_v45 = vsub.f32 %v709_v0, %v2922_v21 }
  0xcf   :  { %1473 = vmatpush.msrb.mxu1 %v1472_v35  ;;  %2130 = vmatmul.msk.f32.vlgmr.msra.gmra.mxu2 %vm2730_vm3, %v3394_v9  ;;  %v2908_v61 = vsub.f32 %v712_v11, %v2882_v26  ;;  %v2920_v38 = vsub.f32 %v711_v17, %v2896_v15  ;;  %v707_v35 = vld [vmem:[#allocation5 + $0x100] sm:$0xff]  ;;  %v1513_v11 = vsub.f32 %v2880_v27, %v3384_v16 }
  0xd0   :  { %1565 = vmatpush.msrb.mxu2 %v2773_v29  ;;  %1263 = vmatpush.msra.mxu0 %v2672_v53  ;;  %v1490_v53 = vand.u32 4294901760, %v1489_v14  ;;  %v2946_v14 = vand.u32 4294901760, %v707_v35  ;;  %v2957_v0 = vsub.f32 %v708_v41, %v2934_v2 }
  0xd1   :  { %1415 = vmatpush.msra.mxu3 %v2679_v7  ;;  %1479 = vmatpush.msrb.mxu1 %v1478_v52  ;;  %v459_v7 = vpop.f32.mrf.mxu3  ;;  %v3382_v31 = vand.u32 4294901760, %v2908_v61  ;;  %v483_v52 = vpop.f32.mrf.mxu0  ;;  %v3381_v17 = vand.u32 4294901760, %v2920_v38 }
  0xd2   :  { %2131 = vmatmul.msk.f32.vlgmr.msra.gmra.mxu3 %vm2730_vm3, %v3394_v9  ;;  %1568 = vmatpush.msrb.mxu2 %v2785_v23  ;;  %v460_v62 = vadd.f32 %v459_v7, %v436_v49  ;;  %v505_v49 = vpop.f32.mrf.mxu1  ;;  %3426 = vst [vmem:[#allocation11_spill] sm:$0xff] %v2957_v0 }
  0xd3   :  { %1618 = vmatpush.msrb.mxu3 %v2753_v30  ;;  %1266 = vmatpush.msra.mxu0 %v2682_v10  ;;  %v1502_v10 = vand.u32 4294901760, %v1501_v4  ;;  %v1525_v8 = vsub.f32 %v2908_v61, %v3382_v31  ;;  %v3379_v4 = vand.u32 4294901760, %v2932_v32  ;;  %v1531_v7 = vsub.f32 %v2920_v38, %v3381_v17  ;;  %v734_v31 = vld [vmem:[#allocation5 + $0x1d8] sm:$0xff] }
  0xd4   :  { %1485 = vmatpush.msrb.mxu1 %v1484_v51  ;;  %1571 = vmatpush.msrb.mxu2 %v2795_v37  ;;  %v484_v39 = vadd.f32 %v483_v52, %v460_v62  ;;  %v1514_v51 = vand.u32 4294901760, %v1513_v11  ;;  %v661_v62 = vcvt.s32.f32 %v657_v56  ;;  %v3032_v40 = vand.u32 4294901760, %v734_v31 }
  0xd5   :  { %1620 = vmatpush.msrb.mxu3 %v2767_v42  ;;  %1269 = vmatpush.msra.mxu0 %v2690_v28  ;;  %v1508_v28 = vand.u32 4294901760, %v1507_v63  ;;  %v3377_v63 = vand.u32 4294901760, %v2944_v45  ;;  %v1526_v11 = vand.u32 4294901760, %v1525_v8  ;;  %v1537_v52 = vsub.f32 %v2932_v32, %v3379_v4  ;;  %v735_v4 = vld [vmem:[#allocation5 + $0x1e0] sm:$0xff]  ;;  %v531_v16 = vpop.f32.mrf.mxu2 }
  0xd6   :  { %1491 = vmatpush.msrb.mxu1 %v1490_v53  ;;  %1272 = vmatmul.f32.vlgmr.msra.gmra.mxu0 %v2742_v6  ;;  %v1519_v6 = vsub.f32 %v2894_v48, %v3383_v24  ;;  %v506_v41 = vadd.f32 %v505_v49, %v484_v39  ;;  %v1532_v39 = vand.u32 4294901760, %v1531_v7  ;;  %v3023_v24 = vand.u32 4294901760, %v735_v4 }
  0xd7   :  { %1422 = vmatpush.msrb.mxu0 %v2753_v30  ;;  %1574 = vmatpush.msrb.mxu2 %v2813_v58  ;;  %v1543_v56 = vsub.f32 %v2944_v45, %v3377_v63  ;;  %v736_v63 = vld [vmem:[#allocation5 + $0x1e8] sm:$0xff] }
  0xd8   :  { %1622 = vmatpush.msrb.mxu3 %v2777_v19  ;;  %1497 = vmatpush.msrb.mxu1 %v1496_v18  ;;  %v1520_v53 = vand.u32 4294901760, %v1519_v6  ;;  %v2967_v18 = vsub.f32 %v707_v35, %v2946_v14  ;;  %v737_v6 = vld [vmem:[#allocation5 + $0x1f0] sm:$0xff]  ;;  %vm2987_vm4 = vcmp.eq.f32.partialorder %v661_v62, %v506_v41 }
  0xd9   :  { %1424 = vmatpush.msrb.mxu0 %v2767_v42  ;;  %1577 = vmatpush.msrb.mxu2 %v2826_v3  ;;  %v2991_v49 = vand.u32 4294901760, %v737_v6  ;;  %v1544_v62 = vand.u32 4294901760, %v1543_v56  ;;  %v557_v56 = vpop.f32.mrf.mxu3 }
  0xda   :  { %1624 = vmatpush.msrb.mxu3 %v2789_v54  ;;  %1503 = vmatpush.msrb.mxu1 %v1502_v10  ;;  %3427 = vst [vmem:[#allocation12_spill] sm:$0xff] %v2967_v18  ;;  %v738_v10 = vld [vmem:[#allocation5 + $0x1f8] sm:$0xff] }
  0xdb   :  { %1426 = vmatpush.msrb.mxu0 %v2777_v19  ;;  %1580 = vmatpush.msrb.mxu2 %v2840_v13  ;;  %v2978_v35 = vand.u32 4294901760, %v738_v10 }
  0xdc   :  { %1626 = vmatpush.msrb.mxu3 %v2801_v50  ;;  %1509 = vmatpush.msrb.mxu1 %v1508_v28  ;;  %v3378_v28 = vand.u32 4294901760, %v2957_v0 }
  0xdd   :  { %1428 = vmatpush.msrb.mxu0 %v2789_v54  ;;  %1583 = vmatpush.msrb.mxu2 %v2849_v47  ;;  %v3000_v41 = vsub.f32 %v738_v10, %v2978_v35  ;;  %v3014_v10 = vsub.f32 %v737_v6, %v2991_v49 }
  0xde   :  { %1628 = vmatpush.msrb.mxu3 %v2815_v20  ;;  %1515 = vmatpush.msrb.mxu1 %v1514_v51  ;;  %v3380_v51 = vand.u32 4294901760, %v2967_v18  ;;  %v1549_v7 = vsub.f32 %v2957_v0, %v3378_v28  ;;  %v3011_v28 = vand.u32 4294901760, %v736_v63 }
  0xdf   :  { %1430 = vmatpush.msrb.mxu0 %v2801_v50  ;;  %1586 = vmatpush.msrb.mxu2 %v2860_v60  ;;  %v3389_v17 = vand.u32 4294901760, %v3000_v41 }
  0xe0   :  { %1630 = vmatpush.msrb.mxu3 %v2821_v1  ;;  %1521 = vmatpush.msrb.mxu1 %v1520_v53  ;;  %v1538_v53 = vand.u32 4294901760, %v1537_v52  ;;  %v1555_v52 = vsub.f32 %v2967_v18, %v3380_v51 }
  0xe1   :  { %1432 = vmatpush.msrb.mxu0 %v2815_v20  ;;  %1589 = vmatpush.msrb.mxu2 %v2880_v27  ;;  %v1806_v12 = vsub.f32 %v3000_v41, %v3389_v17 }
  0xe2   :  { %1632 = vmatpush.msrb.mxu3 %v2834_v34  ;;  %1527 = vmatpush.msrb.mxu1 %v1526_v11  ;;  %v2124_v11 = vsel %vm2987_vm4, 1.0, %v3390_v22  ;;  %v1556_v6 = vand.u32 4294901760, %v1555_v52  ;;  %v732_v52 = vld [vmem:[#allocation5 + $0x1c8] sm:$0xff] }
  0xe3   :  { %1434 = vmatpush.msrb.mxu0 %v2821_v1  ;;  %1592 = vmatpush.msrb.mxu2 %v2894_v48  ;;  %v3019_v51 = vsub.f32 %v2124_v11, %v2124_v11  ;;  %v558_v11 = vadd.f32 %v557_v56, %v531_v16  ;;  %v3042_v16 = vsub.f32 %v735_v4, %v3023_v24  ;;  %v731_v56 = vld [vmem:[#allocation5 + $0x1c0] sm:$0xff]  ;;  %v3052_v44 = vand.u32 4294901760, %v732_v52 }
  0xe4   :  { %1634 = vmatpush.msrb.mxu3 %v2854_v46  ;;  %1533 = vmatpush.msrb.mxu1 %v1532_v39  ;;  %v1550_v39 = vand.u32 4294901760, %v1549_v7  ;;  %v3029_v7 = vsub.f32 %v736_v63, %v3011_v28  ;;  %v3057_v4 = vsub.f32 %v734_v31, %v3032_v40  ;;  %v1807_v57 = vand.u32 4294901760, %v1806_v12 }
  0xe5   :  { %1436 = vmatpush.msrb.mxu0 %v2834_v34  ;;  %1595 = vmatpush.msrb.mxu2 %v2908_v61  ;;  %v3398_v63 = vand.u32 4294901760, %v3019_v51  ;;  %3431 = vst [vmem:[#allocation14_spill] sm:$0xff] %v3042_v16  ;;  %v3078_v43 = vsub.f32 %v732_v52, %v3052_v44  ;;  %v3433_v52 = vand.u32 4294901760, %v3042_v16 }
  0xe6   :  { %1636 = vmatpush.msrb.mxu3 %v2867_v33  ;;  %1539 = vmatpush.msrb.mxu1 %v1538_v53  ;;  %v3393_v53 = vand.u32 4294901760, %v3014_v10  ;;  %3430 = vst [vmem:[#allocation13_spill] sm:$0xff] %v3029_v7  ;;  %v3399_v17 = vand.u32 4294901760, %v3029_v7 }
  0xe7   :  { %1438 = vmatpush.msrb.mxu0 %v2854_v46  ;;  %1598 = vmatpush.msrb.mxu2 %v2920_v38  ;;  %3432 = vst [vmem:[#allocation15_spill] sm:$0xff] %v3057_v4 }
  0xe8   :  { %1638 = vmatpush.msrb.mxu3 %v2882_v26  ;;  %1545 = vmatpush.msrb.mxu1 %v1544_v62  ;;  %v581_v62 = vpop.f32.mrf.mxu0  ;;  %v1812_v25 = vsub.f32 %v3014_v10, %v3393_v53  ;;  %v1456_v53 = vsub.f32 %v3019_v51, %v3398_v63  ;;  %v1818_v9 = vsub.f32 %v3029_v7, %v3399_v17  ;;  %v729_v63 = vld [vmem:[#allocation5 + $0x1b0] sm:$0xff]  ;;  %v727_v7 = vld [vmem:[#allocation5 + $0x1a0] sm:$0xff] }
  0xe9   :  { %1440 = vmatpush.msrb.mxu0 %v2867_v33  ;;  %1601 = vmatpush.msrb.mxu2 %v2932_v32  ;;  %v582_v22 = vadd.f32 %v581_v62, %v558_v11  ;;  %v3064_v11 = vand.u32 4294901760, %v731_v56  ;;  %v730_v62 = vld [vmem:[#allocation5 + $0x1b8] sm:$0xff] }
  0xea   :  { %1640 = vmatpush.msrb.mxu3 %v2896_v15  ;;  %1551 = vmatpush.msrb.mxu1 %v1550_v39  ;;  %v3044_v39 = vand.u32 4294901760, %v733_v36  ;;  %v1813_v12 = vand.u32 4294901760, %v1812_v25  ;;  %v1457_v25 = vand.u32 4294901760, %v1456_v53 }
  0xeb   :  { %1442 = vmatpush.msrb.mxu0 %v2882_v26  ;;  %1604 = vmatpush.msrb.mxu2 %v2944_v45  ;;  %v3087_v17 = vsub.f32 %v731_v56, %v3064_v11 }
  0xec   :  { %1642 = vmatpush.msrb.mxu3 %v2910_v5  ;;  %1557 = vmatpush.msrb.mxu1 %v1556_v6  ;;  %v605_v6 = vpop.f32.mrf.mxu1  ;;  %v3070_v31 = vsub.f32 %v733_v36, %v3044_v39  ;;  %v629_v36 = vpop.f32.mrf.mxu2 }
  0xed   :  { %1444 = vmatpush.msrb.mxu0 %v2896_v15  ;;  %1607 = vmatpush.msrb.mxu2 %v2957_v0  ;;  %v606_v55 = vadd.f32 %v605_v6, %v582_v22  ;;  %v728_v22 = vld [vmem:[#allocation5 + $0x1a8] sm:$0xff]  ;;  %v651_v6 = vpop.f32.mrf.mxu3  ;;  %v3122_v0 = vand.u32 4294901760, %v727_v7 }
  0xee   :  { %1644 = vmatpush.msrb.mxu3 %v2922_v21  ;;  %1726 = vmatpush.msra.mxu1 %v2753_v30  ;;  %v3083_v30 = vand.u32 4294901760, %v730_v62  ;;  %v3469_v8 = vand.u32 4294901760, %v3070_v31 }
  0xef   :  { %1446 = vmatpush.msrb.mxu0 %v2910_v5  ;;  %1610 = vmatpush.msrb.mxu2 %v2967_v18  ;;  %v630_v56 = vadd.f32 %v629_v36, %v606_v55  ;;  %v658_v18 = vadd.s32 384, %v2699_v59  ;;  %v3435_v55 = vand.u32 4294901760, %v3019_v51  ;;  %v3436_v36 = vand.u32 4294901760, %v2773_v29 }
  0xf0   :  { %1646 = vmatpush.msrb.mxu3 %v2934_v2  ;;  %1728 = vmatpush.msra.mxu1 %v2767_v42  ;;  %v3095_v42 = vand.u32 4294901760, %v729_v63 }
  0xf1   :  { %1763 = vmatpush.msra.mxu2 %v2978_v35  ;;  %1448 = vmatpush.msrb.mxu0 %v2922_v21  ;;  %v662_v29 = vcvt.s32.f32 %v658_v18  ;;  %v3441_v18 = vand.u32 4294901760, %v3087_v17 }
  0xf2   :  { %1648 = vmatpush.msrb.mxu3 %v2946_v14  ;;  %1730 = vmatpush.msra.mxu1 %v2777_v19  ;;  %v1824_v19 = vsub.f32 %v3042_v16, %v3433_v52  ;;  %v3106_v16 = vsub.f32 %v730_v62, %v3083_v30 }
  0xf3   :  { %1765 = vmatpush.msra.mxu2 %v2991_v49  ;;  %1450 = vmatpush.msrb.mxu0 %v2934_v2 }
  0xf4   :  { %1808 = vmatpush.msra.mxu3 %v1807_v57  ;;  %1732 = vmatpush.msra.mxu1 %v2789_v54  ;;  %v1819_v57 = vand.u32 4294901760, %v1818_v9  ;;  %v3434_v54 = vand.u32 4294901760, %v3057_v4  ;;  %v726_v9 = vld [vmem:[#allocation5 + $0x198] sm:$0xff]  ;;  %v1825_v53 = vand.u32 4294901760, %v1824_v19  ;;  %v3439_v19 = vand.u32 4294901760, %v2785_v23  ;;  %v724_v23 = vld [vmem:[#allocation5 + $0x188] sm:$0xff] }
  0xf5   :  { %1613 = vmatmul.f32.vlgmr.msrb.gmra.mxu2 %v3019_v51  ;;  %1452 = vmatpush.msrb.mxu0 %v2946_v14  ;;  %v3135_v59 = vand.u32 4294901760, %v726_v9 }
  0xf6   :  { %1814 = vmatpush.msra.mxu3 %v1813_v12  ;;  %1767 = vmatpush.msra.mxu2 %v3011_v28  ;;  %v1830_v52 = vsub.f32 %v3057_v4, %v3434_v54  ;;  %v3108_v12 = vand.u32 4294901760, %v728_v22  ;;  %v3437_v54 = vand.u32 4294901760, %v3070_v31  ;;  %v3120_v4 = vsub.f32 %v729_v63, %v3095_v42 }
  0xf7   :  { %1734 = vmatpush.msra.mxu1 %v2801_v50  ;;  %1458 = vmatmul.f32.vlgmr.msrb.gmra.mxu0 %v1457_v25  ;;  %v3438_v50 = vand.u32 4294901760, %v3078_v43  ;;  %v652_v25 = vadd.f32 %v651_v6, %v630_v56  ;;  %v1853_v63 = vand.u32 4294901760, %v3106_v16  ;;  %v3147_v56 = vsub.f32 %v727_v7, %v3122_v0 }
  0xf8   :  { %1652 = vmatmul.f32.vlgmr.msrb.gmra.mxu3 %v3435_v55  ;;  %1659 = vmatpush.msra.mxu0 %v3436_v36  ;;  %v1836_v62 = vsub.f32 %v3070_v31, %v3437_v54  ;;  %v725_v55 = vld [vmem:[#allocation5 + $0x190] sm:$0xff]  ;;  %v1831_v36 = vand.u32 4294901760, %v1830_v52  ;;  %v3133_v54 = vsub.f32 %v728_v22, %v3108_v12  ;;  %v1859_v22 = vand.u32 4294901760, %v3120_v4 }
  0xf9   :  { %1769 = vmatpush.msra.mxu2 %v3023_v24  ;;  %1820 = vmatpush.msra.mxu3 %v1819_v57  ;;  %v1842_v51 = vsub.f32 %v3078_v43, %v3438_v50  ;;  %v3440_v57 = vmov 1.0   ;;  %v3149_v52 = vand.u32 4294901760, %v725_v55  ;;  %v3442_v50 = vand.u32 4294901760, %v2795_v37 }
  0xfa   :  { %1736 = vmatpush.msra.mxu1 %v2815_v20  ;;  %1663 = vmatpush.msra.mxu0 %v3439_v19  ;;  %v1848_v20 = vsub.f32 %v3087_v17, %v3441_v18  ;;  %v1837_v6 = vand.u32 4294901760, %v1836_v62  ;;  %vm3154_vm5 = vcmp.eq.f32.partialorder %v662_v29, %v652_v25  ;;  %v1865_v7 = vand.u32 4294901760, %v3133_v54  ;;  %v723_v62 = vld [vmem:[#allocation5 + $0x180] sm:$0xff] }
  0xfb   :  { %2132 = vmatmul.msk.f32.vlgmr.msrb.gmra.mxu1 %vm2987_vm4, %v3440_v57  ;;  %1771 = vmatpush.msra.mxu2 %v3032_v40  ;;  %v1843_v19 = vand.u32 4294901760, %v1842_v51  ;;  %v3166_v37 = vand.u32 4294901760, %v724_v23  ;;  %v3445_v51 = vand.u32 4294901760, %v2813_v58  ;;  %v3447_v58 = vand.u32 4294901760, %v2826_v3 }
  0xfc   :  { %1826 = vmatpush.msra.mxu3 %v1825_v53  ;;  %1738 = vmatpush.msra.mxu1 %v2821_v1  ;;  %v1854_v1 = vsub.f32 %v3106_v16, %v1853_v63  ;;  %v3164_v53 = vsub.f32 %v726_v9, %v3135_v59  ;;  %v1849_v25 = vand.u32 4294901760, %v1848_v20  ;;  %v1860_v9 = vsub.f32 %v3120_v4, %v1859_v22 }
  0xfd   :  { %1667 = vmatpush.msra.mxu0 %v3442_v50  ;;  %1773 = vmatpush.msra.mxu2 %v3044_v39  ;;  %v3180_v50 = vsub.f32 %v725_v55, %v3149_v52  ;;  %v3185_v20 = vand.u32 4294901760, %v723_v62  ;;  %v3193_v55 = vsub.f32 %v724_v23, %v3166_v37  ;;  %v3448_v3 = vand.u32 4294901760, %v2840_v13 }
  0xfe   :  { %1832 = vmatpush.msra.mxu3 %v1831_v36  ;;  %1740 = vmatpush.msra.mxu1 %v2834_v34  ;;  %v3446_v34 = vmov 0.0   ;;  %v1871_v36 = vand.u32 4294901760, %v3147_v56  ;;  %v3449_v23 = vand.u32 4294901760, %v2849_v47 }
  0xff   :  { %1671 = vmatpush.msra.mxu0 %v3445_v51  ;;  %1775 = vmatpush.msra.mxu2 %v3052_v44  ;;  %v2125_v29 = vsel %vm3154_vm5, 1.0, %v3446_v34  ;;  %v1877_v51 = vand.u32 4294901760, %v3164_v53  ;;  %v3209_v13 = vsub.f32 %v723_v62, %v3185_v20 }
 0x100   :  { %1838 = vmatpush.msra.mxu3 %v1837_v6  ;;  %1742 = vmatpush.msra.mxu1 %v2854_v46  ;;  %v1855_v46 = vand.u32 4294901760, %v1854_v1  ;;  %v1866_v6 = vsub.f32 %v3133_v54, %v1865_v7  ;;  %v3198_v34 = vsub.f32 %v2125_v29, %v2125_v29  ;;  %v1883_v1 = vand.u32 4294901760, %v3180_v50 }
 0x101   :  { %1675 = vmatpush.msra.mxu0 %v3447_v58  ;;  %1777 = vmatpush.msra.mxu2 %v3064_v11  ;;  %v1889_v29 = vand.u32 4294901760, %v3193_v55  ;;  %v3451_v58 = vand.u32 4294901760, %v2880_v27 }
 0x102   :  { %1844 = vmatpush.msra.mxu3 %v1843_v19  ;;  %1744 = vmatpush.msra.mxu1 %v2867_v33  ;;  %v1861_v33 = vand.u32 4294901760, %v1860_v9  ;;  %v1872_v19 = vsub.f32 %v3147_v56, %v1871_v36  ;;  %v3450_v9 = vand.u32 4294901760, %v2860_v60  ;;  %v1796_v47 = vand.u32 4294901760, %v3198_v34 }
 0x103   :  { %1679 = vmatpush.msra.mxu0 %v3448_v3  ;;  %1779 = vmatpush.msra.mxu2 %v3083_v30  ;;  %v1895_v60 = vand.u32 4294901760, %v3209_v13 }
 0x104   :  { %1850 = vmatpush.msra.mxu3 %v1849_v25  ;;  %1746 = vmatpush.msra.mxu1 %v2882_v26  ;;  %v1867_v25 = vand.u32 4294901760, %v1866_v6  ;;  %v1878_v26 = vsub.f32 %v3164_v53, %v1877_v51  ;;  %v1873_v62 = vand.u32 4294901760, %v1872_v19  ;;  %v3452_v6 = vand.u32 4294901760, %v2894_v48 }
 0x105   :  { %1683 = vmatpush.msra.mxu0 %v3449_v23  ;;  %1781 = vmatpush.msra.mxu2 %v3095_v42  ;;  %v1797_v27 = vsub.f32 %v3198_v34, %v1796_v47  ;;  %v1896_v48 = vsub.f32 %v3209_v13, %v1895_v60  ;;  %v3454_v19 = vand.u32 4294901760, %v2920_v38  ;;  %v3456_v38 = vand.u32 4294901760, %v3000_v41 }
 0x106   :  { %1856 = vmatpush.msra.mxu3 %v1855_v46  ;;  %1748 = vmatpush.msra.mxu1 %v2896_v15  ;;  %v1884_v15 = vsub.f32 %v3180_v50, %v1883_v1  ;;  %v1879_v46 = vand.u32 4294901760, %v1878_v26 }
 0x107   :  { %1687 = vmatpush.msra.mxu0 %v3450_v9  ;;  %1783 = vmatpush.msra.mxu2 %v3108_v12  ;;  %v1897_v23 = vand.u32 4294901760, %v1896_v48  ;;  %v3461_v9 = vld [vmem:[#allocation13_spill] sm:$0xff] }
 0x108   :  { %1862 = vmatpush.msra.mxu3 %v1861_v33  ;;  %1750 = vmatpush.msra.mxu1 %v2910_v5  ;;  %v1890_v5 = vsub.f32 %v3193_v55, %v1889_v29  ;;  %v1885_v3 = vand.u32 4294901760, %v1884_v15 }
 0x109   :  { %1691 = vmatpush.msra.mxu0 %v3451_v58  ;;  %1785 = vmatpush.msra.mxu2 %v3122_v0 }
 0x10a   :  { %1868 = vmatpush.msra.mxu3 %v1867_v25  ;;  %1752 = vmatpush.msra.mxu1 %v2922_v21  ;;  %v3453_v21 = vand.u32 4294901760, %v2908_v61  ;;  %v1891_v33 = vand.u32 4294901760, %v1890_v5  ;;  %v3455_v61 = vand.u32 4294901760, %v2932_v32  ;;  %v3458_v32 = vand.u32 4294901760, %v3014_v10  ;;  %v3459_v25 = vld [vmem:[#allocation11_spill] sm:$0xff] }
 0x10b   :  { %1695 = vmatpush.msra.mxu0 %v3452_v6  ;;  %1787 = vmatpush.msra.mxu2 %v3135_v59  ;;  %v3460_v26 = vand.u32 4294901760, %v3459_v25 }
 0x10c   :  { %1874 = vmatpush.msra.mxu3 %v1873_v62  ;;  %1754 = vmatpush.msra.mxu1 %v2934_v2  ;;  %v1798_v2 = vand.u32 4294901760, %v1797_v27  ;;  %v3463_v62 = vld [vmem:[#allocation12_spill] sm:$0xff] }
 0x10d   :  { %1699 = vmatpush.msra.mxu0 %v3453_v21  ;;  %1789 = vmatpush.msra.mxu2 %v3149_v52  ;;  %v3464_v15 = vand.u32 4294901760, %v3463_v62 }
 0x10e   :  { %1880 = vmatpush.msra.mxu3 %v1879_v46  ;;  %1756 = vmatpush.msra.mxu1 %v2946_v14  ;;  %v3457_v14 = vand.u32 4294901760, %v2944_v45  ;;  %v3462_v45 = vand.u32 4294901760, %v3461_v9 }
 0x10f   :  { %1703 = vmatpush.msra.mxu0 %v3454_v19  ;;  %2134 = vmatmul.msk.f32.vlgmr.msra.gmra.mxu1 %vm2987_vm4, %v3440_v57 }
 0x110   :  { %1791 = vmatpush.msra.mxu2 %v3166_v37  ;;  %1886 = vmatpush.msra.mxu3 %v1885_v3 }
 0x111   :  { %1959 = vmatpush.msrb.mxu1 %v2978_v35  ;;  %1707 = vmatpush.msra.mxu0 %v3455_v61 }
 0x112   :  { %1793 = vmatpush.msra.mxu2 %v3185_v20  ;;  %1892 = vmatpush.msra.mxu3 %v1891_v33 }
 0x113   :  { %1961 = vmatpush.msrb.mxu1 %v2991_v49  ;;  %1799 = vmatmul.f32.vlgmr.msra.gmra.mxu2 %v1798_v2 }
 0x114   :  { %2000 = vmatpush.msrb.mxu2 %v3456_v38  ;;  %1711 = vmatpush.msra.mxu0 %v3457_v14 }
 0x115   :  { %1898 = vmatpush.msra.mxu3 %v1897_v23  ;;  %1963 = vmatpush.msrb.mxu1 %v3011_v28 }
 0x116   :  { %2135 = vmatmul.msk.f32.vlgmr.msra.gmra.mxu3 %vm3154_vm5, %v3440_v57  ;;  %2004 = vmatpush.msrb.mxu2 %v3458_v32 }
 0x117   :  { %2067 = vmatpush.msrb.mxu3 %v2978_v35  ;;  %1715 = vmatpush.msra.mxu0 %v3460_v26  ;;  %v3465_v35 = vld [vmem:[#allocation14_spill] sm:$0xff] }
 0x118   :  { %1965 = vmatpush.msrb.mxu1 %v3023_v24  ;;  %2008 = vmatpush.msrb.mxu2 %v3462_v45  ;;  %v3466_v58 = vand.u32 4294901760, %v3465_v35 }
 0x119   :  { %2069 = vmatpush.msrb.mxu3 %v2991_v49  ;;  %1719 = vmatpush.msra.mxu0 %v3464_v15  ;;  %v3467_v49 = vld [vmem:[#allocation15_spill] sm:$0xff] }
 0x11a   :  { %1967 = vmatpush.msrb.mxu1 %v3032_v40  ;;  %2133 = vmatmul.msk.f32.vlgmr.msra.gmra.mxu0 %vm2987_vm4, %v3440_v57  ;;  %v3468_v46 = vand.u32 4294901760, %v3467_v49 }
 0x11b   :  { %1906 = vmatpush.msrb.mxu0 %v3000_v41  ;;  %2012 = vmatpush.msrb.mxu2 %v3466_v58 }
 0x11c   :  { %2071 = vmatpush.msrb.mxu3 %v3011_v28  ;;  %1969 = vmatpush.msrb.mxu1 %v3044_v39  ;;  %v3470_v28 = vand.u32 4294901760, %v3078_v43 }
 0x11d   :  { %1909 = vmatpush.msrb.mxu0 %v3014_v10  ;;  %2016 = vmatpush.msrb.mxu2 %v3468_v46 }
 0x11e   :  { %2073 = vmatpush.msrb.mxu3 %v3023_v24  ;;  %1971 = vmatpush.msrb.mxu1 %v3052_v44  ;;  %v3471_v24 = vand.u32 4294901760, %v3087_v17 }
 0x11f   :  { %1912 = vmatpush.msrb.mxu0 %v3461_v9  ;;  %2020 = vmatpush.msrb.mxu2 %v3469_v8 }
 0x120   :  { %2075 = vmatpush.msrb.mxu3 %v3032_v40  ;;  %1973 = vmatpush.msrb.mxu1 %v3064_v11 }
 0x121   :  { %1915 = vmatpush.msrb.mxu0 %v3465_v35  ;;  %2024 = vmatpush.msrb.mxu2 %v3470_v28 }
 0x122   :  { %2077 = vmatpush.msrb.mxu3 %v3044_v39  ;;  %1975 = vmatpush.msrb.mxu1 %v3083_v30 }
 0x123   :  { %1918 = vmatpush.msrb.mxu0 %v3467_v49  ;;  %2028 = vmatpush.msrb.mxu2 %v3471_v24 }
 0x124   :  { %2079 = vmatpush.msrb.mxu3 %v3052_v44  ;;  %1977 = vmatpush.msrb.mxu1 %v3095_v42 }
 0x125   :  { %1921 = vmatpush.msrb.mxu0 %v3070_v31  ;;  %2032 = vmatpush.msrb.mxu2 %v1853_v63 }
 0x126   :  { %2081 = vmatpush.msrb.mxu3 %v3064_v11  ;;  %1979 = vmatpush.msrb.mxu1 %v3108_v12  ;;  %v878_v44 = vpop.f32.mrf.mxu1 }
 0x127   :  { %1924 = vmatpush.msrb.mxu0 %v3078_v43  ;;  %2036 = vmatpush.msrb.mxu2 %v1859_v22 }
 0x128   :  { %2083 = vmatpush.msrb.mxu3 %v3083_v30  ;;  %1981 = vmatpush.msrb.mxu1 %v3122_v0 }
 0x129   :  { %1927 = vmatpush.msrb.mxu0 %v3087_v17  ;;  %2040 = vmatpush.msrb.mxu2 %v1865_v7 }
 0x12a   :  { %2085 = vmatpush.msrb.mxu3 %v3095_v42  ;;  %1983 = vmatpush.msrb.mxu1 %v3135_v59 }
 0x12b   :  { %1930 = vmatpush.msrb.mxu0 %v3106_v16  ;;  %2044 = vmatpush.msrb.mxu2 %v1871_v36 }
 0x12c   :  { %2087 = vmatpush.msrb.mxu3 %v3108_v12  ;;  %1985 = vmatpush.msrb.mxu1 %v3149_v52 }
 0x12d   :  { %1933 = vmatpush.msrb.mxu0 %v3120_v4  ;;  %2048 = vmatpush.msrb.mxu2 %v1877_v51 }
 0x12e   :  { %2089 = vmatpush.msrb.mxu3 %v3122_v0  ;;  %1987 = vmatpush.msrb.mxu1 %v3166_v37 }
 0x12f   :  { %1936 = vmatpush.msrb.mxu0 %v3133_v54  ;;  %2052 = vmatpush.msrb.mxu2 %v1883_v1  ;;  %v777_v43 = vpop.f32.mrf.mxu0  ;;  %v932_v17 = vpop.f32.mrf.mxu2 }
 0x130   :  { %2091 = vmatpush.msrb.mxu3 %v3135_v59  ;;  %1989 = vmatpush.msrb.mxu1 %v3185_v20  ;;  %v879_v40 = vadd.f32 %v878_v44, %v777_v43  ;;  %v1077_v4 = vpop.f32.mrf.mxu1 }
 0x131   :  { %1939 = vmatpush.msrb.mxu0 %v3147_v56  ;;  %1993 = vmatmul.f32.vlgmr.msrb.gmra.mxu1 %v1796_v47  ;;  %v971_v41 = vpop.f32.mrf.mxu3 }
 0x132   :  { %2056 = vmatpush.msrb.mxu2 %v1889_v29  ;;  %2093 = vmatpush.msrb.mxu3 %v3149_v52  ;;  %v933_v0 = vadd.f32 %v932_v17, %v879_v40 }
 0x133   :  { %1942 = vmatpush.msrb.mxu0 %v3164_v53 }
 0x134   :  { %2060 = vmatpush.msrb.mxu2 %v1895_v60  ;;  %2095 = vmatpush.msrb.mxu3 %v3166_v37  ;;  %v972_v16 = vadd.f32 %v971_v41, %v933_v0 }
 0x135   :  { %2136 = vmatmul.msk.f32.vlgmr.msrb.gmra.mxu2 %vm3154_vm5, %v3440_v57  ;;  %1945 = vmatpush.msrb.mxu0 %v3180_v50 }
 0x136   :  { %2097 = vmatpush.msrb.mxu3 %v3185_v20 }
 0x137   :  { %2137 = vmatmul.msk.f32.vlgmr.msrb.gmra.mxu3 %vm3154_vm5, %v3440_v57  ;;  %1948 = vmatpush.msrb.mxu0 %v3193_v55 }
 0x138   :  { %v1040_v10 = vpop.f32.mrf.mxu0 }
 0x139   :  { %1951 = vmatpush.msrb.mxu0 %v3209_v13  ;;  %v1041_v39 = vadd.f32 %v1040_v10, %v972_v16 }
 0x13a   :  { %1954 = vmatmul.f32.vlgmr.msrb.gmra.mxu0 %v3198_v34 }
 0x13b   :  { %v1078_v30 = vadd.f32 %v1077_v4, %v1041_v39 }
 0x143   :  { %v1118_v11 = vpop.f32.mrf.mxu2 }
 0x144   :  { %v1119_v31 = vadd.f32 %v1118_v11, %v1078_v30 }
 0x145   :  { %v1219_v42 = vpop.f32.mrf.mxu3 }
 0x146   :  { %v1220_v59 = vadd.f32 %v1219_v42, %v1119_v31 }
 0x14a   :  { %v1312_v54 = vpop.f32.mrf.mxu1 }
 0x152   :  { %v1381_v22 = vpop.f32.mrf.mxu2 }
 0x153   :  { %v1273_v12 = vpop.f32.mrf.mxu0 }
 0x154   :  { %v1274_v63 = vadd.f32 %v1273_v12, %v1220_v59 }
 0x155   :  { %v1418_v52 = vpop.f32.mrf.mxu3 }
 0x156   :  { %v1313_v57 = vadd.f32 %v1312_v54, %v1274_v63 }
 0x158   :  { %v1382_v56 = vadd.f32 %v1381_v22, %v1313_v57 }
 0x15a   :  { %v1419_v7 = vadd.f32 %v1418_v52, %v1382_v56 }
 0x174   :  { %v1459_v18 = vpop.f32.mrf.mxu0 }
 0x175   :  { %v1460_v53 = vadd.f32 %v1459_v18, %v1419_v7 }
 0x178   :  { %v1560_v37 = vpop.f32.mrf.mxu1  ;;  %v1614_v50 = vpop.f32.mrf.mxu2 }
 0x179   :  { %v1561_v36 = vadd.f32 %v1560_v37, %v1460_v53 }
 0x17b   :  { %v1615_v20 = vadd.f32 %v1614_v50, %v1561_v36  ;;  %v1653_v51 = vpop.f32.mrf.mxu3 }
 0x17d   :  { %v1654_v34 = vadd.f32 %v1653_v51, %v1615_v20 }
 0x18c   :  { %v1759_v13 = vpop.f32.mrf.mxu1 }
 0x196   :  { %v1800_v47 = vpop.f32.mrf.mxu2 }
 0x197   :  { %v1722_v55 = vpop.f32.mrf.mxu0 }
 0x198   :  { %v1723_v1 = vadd.f32 %v1722_v55, %v1654_v34 }
 0x199   :  { %v1901_v5 = vpop.f32.mrf.mxu3 }
 0x19a   :  { %v1760_v29 = vadd.f32 %v1759_v13, %v1723_v1 }
 0x19c   :  { %v1801_v60 = vadd.f32 %v1800_v47, %v1760_v29 }
 0x19e   :  { %v1902_v6 = vadd.f32 %v1901_v5, %v1801_v60 }
 0x1ae   :  { %v1994_v21 = vpop.f32.mrf.mxu1 }
 0x1b7   :  { %v1955_v27 = vpop.f32.mrf.mxu0 }
 0x1b8   :  { %v1956_v3 = vadd.f32 %v1955_v27, %v1902_v6  ;;  %v2063_v33 = vpop.f32.mrf.mxu2 }
 0x1ba   :  { %v1995_v48 = vadd.f32 %v1994_v21, %v1956_v3  ;;  %v2100_v2 = vpop.f32.mrf.mxu3 }
 0x1bc   :  { %v2064_v19 = vadd.f32 %v2063_v33, %v1995_v48 }
 0x1be   :  { %v2101_v61 = vadd.f32 %v2100_v2, %v2064_v19 }
 0x1c0   :  { %2103 = vst [vmem:[#allocation7] sm:$0xff] %v2101_v61 }
 0x1c1   :  { %2114 = dma.vmem_to_hbm [thread:$0]  %s2110_s2, 128, %s2112_s27, [#allocation4]  }
 0x1c2   :  { %2221 = dma.done.wait [#allocation4], 128  }
 0x1c3   :  { %2222 = vsyncadd [#allocation4], 4294967168 }
 0x1c4   :  { %2119 = vsyncpa [#allocation3], 1 }
 0x1c5   :  { %2120 = vsyncpa [#allocation6], 1 }
 0x1c6   :  { %2121 = vsyncpa [#allocation4], 1 }

// kernel: tpu_custom_call.1
= control target key start
LH: loop header
LB: loop body
LE: loop exit
PB: predicated region body
PF: predicated region fallthrough
CT: control target
= control target key end

     0   :  { %8 = vsyncpa [#allocation3], 0  ;;  %s3359_s0 = inlined_call_operand.vmem [shape: f32[8,4], index: 0, kind: input, shape index: {}]   ;;  %s3360_s1 = inlined_call_operand.hbm [shape: f32[4,512], index: 1, kind: input, shape index: {}]   ;;  %s3361_s2 = inlined_call_operand.hbm [shape: f32[512,128], index: 2, kind: input, shape index: {}]   ;;  %s3362_s3 = inlined_call_operand.hbm [shape: f32[8,128], index: 3, kind: output, shape index: {}]  }
   0x1   :  { %9 = vsyncpa [#allocation6], 0 }
   0x2   :  { %10 = vsyncpa [#allocation4], 0  ;;  %s18_s14 = sshll.u32 %s3360_s1, 4  ;;  %s2223_s15 = smov [#allocation2]   ;;  %s19_s14 = int_to_ptr.hbm [resolvable:$true] %s18_s14 }
   0x3   :  { %s20_s16 = sshll.u32 %s2223_s15, 4  ;;  %s28_s19 = sshll.u32 %s3361_s2, 4  ;;  %s21_s16 = int_to_ptr.vmem [resolvable:$true] %s20_s16  ;;  %s29_s19 = int_to_ptr.hbm [resolvable:$true] %s28_s19 }
   0x4   :  { %23 = dma.hbm_to_vmem [thread:$0]  %s19_s14, 256, %s21_s16, [#allocation3]  }
   0x5   :  { %s2224_s20 = smov [#allocation5]   ;;  %s2225_s22 = smov 128  }
   0x6   :  { %s30_s21 = sshll.u32 %s2224_s20, 4  ;;  %s2226_s23 = smov 8   ;;  %s31_s21 = int_to_ptr.vmem [resolvable:$true] %s30_s21 }
   0x7   :  { %36 = dma.hbm_to_vmem [thread:$0]  %s29_s19, 8192, %s31_s21, [#allocation6], %s2225_s22, %s2225_s22, %s2226_s23  }
   0x8   :  { %2217 = dma.done.wait [#allocation3], 256  }
   0x9   :  { %2218 = vsyncadd [#allocation3], 4294967040 }
   0xa   :  { %2219 = dma.done.wait [#allocation6], 8192  }
   0xb   :  { %2220 = vsyncadd [#allocation6], 4294959104  ;;  %vm57_vm0 = vcmask 31744   ;;  %v46_v0 = vld [vmem:[#allocation2] sm:$0xff]  ;;  %v45_v1 = vld [vmem:[%s3359_s0] sm:$0xff]  ;;  %vm61_vm1 = vcmask 1043456  }
   0xc   :  { %50 = vst [vmem:[#allocation1] ss:$2 sm:$0xff] %v46_v0  ;;  %v59_v2 = vsel %vm57_vm0, %v45_v1, 0  ;;  %v47_v5 = vld [vmem:[#allocation2 + $0x8] sm:$0xff]  ;;  %v689_v38 = vld [vmem:[#allocation5 + $0x70] sm:$0xff]  ;;  %v688_v40 = vld [vmem:[#allocation5 + $0x68] sm:$0xff] }
   0xd   :  { %v2259_v3 = vand.u32 4294901760, %v59_v2  ;;  %52 = vst [vmem:[#allocation1 + $0x10] ss:$2 sm:$0xff] %v47_v5  ;;  %v690_v36 = vld [vmem:[#allocation5 + $0x78] sm:$0xff]  ;;  %v2288_v41 = vand.u32 4294901760, %v689_v38  ;;  %v687_v42 = vld [vmem:[#allocation5 + $0x60] sm:$0xff] }
   0xe   :  { %v2286_v39 = vand.u32 4294901760, %v690_v36  ;;  %v2296_v44 = vand.u32 4294901760, %v688_v40  ;;  %v686_v45 = vld [vmem:[#allocation5 + $0x58] sm:$0xff]  ;;  %v2302_v47 = vand.u32 4294901760, %v687_v42  ;;  %v685_v48 = vld [vmem:[#allocation5 + $0x50] sm:$0xff]  ;;  %v684_v52 = vld [vmem:[#allocation5 + $0x48] sm:$0xff] }
   0xf   :  { %v2262_v4 = vsub.f32 %v59_v2, %v2259_v3  ;;  %v2300_v46 = vsub.f32 %v689_v38, %v2288_v41  ;;  %v2308_v51 = vand.u32 4294901760, %v686_v45  ;;  %v2314_v55 = vand.u32 4294901760, %v685_v48  ;;  %v683_v56 = vld [vmem:[#allocation5 + $0x40] sm:$0xff]  ;;  %v682_v61 = vld [vmem:[#allocation5 + $0x38] sm:$0xff]  ;;  %v681_v2 = vld [vmem:[#allocation5 + $0x30] sm:$0xff]  ;;  %s2229_s0 = smov [#allocation7]  }
  0x10   :  { %v2294_v43 = vsub.f32 %v690_v36, %v2286_v39  ;;  %v2306_v50 = vsub.f32 %v688_v40, %v2296_v44  ;;  %v2312_v54 = vsub.f32 %v687_v42, %v2302_v47  ;;  %v2318_v57 = vand.u32 4294901760, %v684_v52  ;;  %v706_v36 = vld [vmem:[#allocation5 + $0xf8] sm:$0xff]  ;;  %s2109_s2 = sshll.u32 %s2229_s0, 4  ;;  %s2111_s27 = sshll.u32 %s3362_s3, 4  ;;  %s2110_s2 = int_to_ptr.vmem [resolvable:$true] %s2109_s2  ;;  %s2112_s27 = int_to_ptr.hbm [resolvable:$true] %s2111_s27 }
  0x11   :  { %v2265_v6 = vand.u32 4294901760, %v2262_v4  ;;  %v788_v53 = vand.u32 4294901760, %v2300_v46  ;;  %v2326_v60 = vsub.f32 %v686_v45, %v2308_v51  ;;  %v2330_v62 = vand.u32 4294901760, %v683_v56 }
  0x12   :  { %v782_v49 = vand.u32 4294901760, %v2294_v43  ;;  %v794_v59 = vand.u32 4294901760, %v2306_v50  ;;  %v800_v0 = vand.u32 4294901760, %v2312_v54  ;;  %v2339_v1 = vsub.f32 %v685_v48, %v2314_v55  ;;  %v675_v48 = vld [vmem:[#allocation5] sm:$0xff] }
  0x13   :  { %v53_v7 = vld.sshfl [vmem:[#allocation1] sm:$0xff pattern:$0x75316420]  ;;  %v90_v8 = vsub.f32 %v2262_v4, %v2265_v6  ;;  %v54_v9 = vld.sshfl [vmem:[#allocation1 + $0x8] sm:$0xff pattern:$0x75316420]  ;;  %v789_v63 = vsub.f32 %v2300_v46, %v788_v53  ;;  %v2343_v5 = vsub.f32 %v684_v52, %v2318_v57 }
  0x14   :  { %v62_v10 = vsel %vm61_vm1, %v53_v7, 0  ;;  %v64_v11 = vsel %vm61_vm1, %v54_v9, 0  ;;  %v55_v17 = vld.sshfl [vmem:[#allocation1 + $0x10] sm:$0xff pattern:$0x75316420]  ;;  %v783_v58 = vsub.f32 %v2294_v43, %v782_v49  ;;  %v2345_v7 = vand.u32 4294901760, %v682_v61 }
  0x15   :  { %v85_v12 = vand.u32 4294901760, %v62_v10  ;;  %v2271_v13 = vand.u32 4294901760, %v90_v8  ;;  %v231_v14 = vand.u32 4294901760, %v64_v11  ;;  %v66_v20 = vsel %vm61_vm1, %v55_v17, 0  ;;  %v705_v52 = vld [vmem:[#allocation5 + $0xf0] sm:$0xff] }
  0x16   :  { %v377_v21 = vand.u32 4294901760, %v66_v20  ;;  %v56_v28 = vld.sshfl [vmem:[#allocation1 + $0x18] sm:$0xff pattern:$0x75316420]  ;;  %v784_v8 = vand.u32 4294901760, %v783_v58  ;;  %v795_v9 = vsub.f32 %v2306_v50, %v794_v59  ;;  %v3374_v17 = vand.u32 4294901760, %v2343_v5 }
  0x17   :  { %v112_v15 = vsub.f32 %v62_v10, %v85_v12  ;;  %86 = vmatpush.msra.mxu0 %v85_v12  ;;  %162 = vmatpush.msra.mxu3 %v85_v12  ;;  %v258_v16 = vsub.f32 %v64_v11, %v231_v14  ;;  %v68_v30 = vsel %vm61_vm1, %v56_v28, 0  ;;  %v806_v10 = vand.u32 4294901760, %v2326_v60 }
  0x18   :  { %92 = vmatmul.f32.vlgmr.msra.gmra.mxu0 %v2271_v13  ;;  %166 = vmatmul.f32.vlgmr.msra.gmra.mxu3 %v2265_v6  ;;  %v404_v24 = vsub.f32 %v66_v20, %v377_v21  ;;  %v523_v31 = vand.u32 4294901760, %v68_v30  ;;  %v2355_v11 = vsub.f32 %v683_v56, %v2330_v62  ;;  %v796_v20 = vand.u32 4294901760, %v795_v9 }
  0x19   :  { %139 = vmatpush.msra.mxu2 %v112_v15  ;;  %v113_v18 = vand.u32 4294901760, %v112_v15  ;;  %v259_v19 = vand.u32 4294901760, %v258_v16 }
  0x1a   :  { %142 = vmatmul.f32.vlgmr.msra.gmra.mxu2 %v2262_v4  ;;  %v405_v27 = vand.u32 4294901760, %v404_v24  ;;  %v550_v32 = vsub.f32 %v68_v30, %v523_v31  ;;  %v677_v30 = vld [vmem:[#allocation5 + $0x10] sm:$0xff] }
  0x1b   :  { %v114_v22 = vsub.f32 %v112_v15, %v113_v18  ;;  %232 = vmatpush.msrb.mxu2 %v231_v14  ;;  %188 = vmatpush.msrb.mxu0 %v113_v18  ;;  %v260_v23 = vsub.f32 %v258_v16, %v259_v19  ;;  %v801_v15 = vsub.f32 %v2312_v54, %v800_v0  ;;  %v2411_v40 = vand.u32 4294901760, %v677_v30 }
  0x1c   :  { %v406_v29 = vsub.f32 %v404_v24, %v405_v27  ;;  %v551_v34 = vand.u32 4294901760, %v550_v32  ;;  %v2369_v18 = vsub.f32 %v682_v61, %v2345_v7 }
  0x1d   :  { %334 = vmatpush.msra.mxu2 %v259_v19  ;;  %285 = vmatpush.msra.mxu0 %v258_v16  ;;  %v115_v25 = vand.u32 4294901760, %v114_v22  ;;  %v261_v26 = vand.u32 4294901760, %v260_v23  ;;  %v812_v16 = vand.u32 4294901760, %v2339_v1  ;;  %v679_v19 = vld [vmem:[#allocation5 + $0x20] sm:$0xff]  ;;  %v3369_v23 = vand.u32 4294901760, %v2355_v11 }
  0x1e   :  { %v407_v33 = vand.u32 4294901760, %v406_v29  ;;  %v552_v35 = vsub.f32 %v550_v32, %v551_v34  ;;  %v2387_v28 = vand.u32 4294901760, %v679_v19  ;;  %v3367_v29 = vand.u32 4294901760, %v2369_v18 }
  0x1f   :  { %116 = vmatpush.msra.mxu1 %v115_v25  ;;  %262 = vmatpush.msrb.mxu3 %v261_v26  ;;  %v678_v25 = vld [vmem:[#allocation5 + $0x18] sm:$0xff]  ;;  %v802_v26 = vand.u32 4294901760, %v801_v15  ;;  %v2435_v9 = vsub.f32 %v677_v30, %v2411_v40  ;;  %v704_v15 = vld [vmem:[#allocation5 + $0xe8] sm:$0xff] }
  0x20   :  { %118 = vmatmul.f32.vlgmr.msra.gmra.mxu1 %v2259_v3  ;;  %190 = vmatmul.f32.vlgmr.msrb.gmra.mxu0 %v2259_v3  ;;  %v553_v37 = vand.u32 4294901760, %v552_v35  ;;  %v676_v35 = vld [vmem:[#allocation5 + $0x8] sm:$0xff]  ;;  %v2409_v38 = vsub.f32 %v679_v19, %v2387_v28  ;;  %v831_v45 = vsub.f32 %v2369_v18, %v3367_v29  ;;  %v2456_v30 = vand.u32 4294901760, %v704_v15 }
  0x21   :  { %264 = vmatmul.f32.vlgmr.msrb.gmra.mxu3 %v2259_v3  ;;  %210 = vmatpush.msrb.mxu1 %v85_v12  ;;  %v2357_v12 = vand.u32 4294901760, %v681_v2  ;;  %v2423_v61 = vand.u32 4294901760, %v676_v35 }
  0x22   :  { %238 = vmatmul.f32.vlgmr.msrb.gmra.mxu2 %v2271_v13  ;;  %356 = vmatpush.msra.mxu3 %v231_v14  ;;  %v832_v19 = vand.u32 4294901760, %v831_v45 }
  0x23   :  { %308 = vmatpush.msra.mxu1 %v231_v14  ;;  %431 = vmatpush.msrb.mxu2 %v404_v24  ;;  %v790_v14 = vand.u32 4294901760, %v789_v63  ;;  %v2381_v24 = vsub.f32 %v681_v2, %v2357_v12  ;;  %v2425_v63 = vand.u32 4294901760, %v706_v36 }
  0x24   :  { %378 = vmatpush.msrb.mxu0 %v377_v21  ;;  %454 = vmatpush.msrb.mxu3 %v377_v21 }
  0x28   :  { %212 = vmatmul.f32.vlgmr.msrb.gmra.mxu1 %v2259_v3  ;;  %288 = vmatmul.f32.vlgmr.msra.gmra.mxu0 %v2262_v4 }
  0x29   :  { %358 = vmatmul.f32.vlgmr.msra.gmra.mxu3 %v2259_v3  ;;  %408 = vmatpush.msrb.mxu1 %v407_v33  ;;  %v2399_v33 = vand.u32 4294901760, %v678_v25 }
  0x2a   :  { %336 = vmatmul.f32.vlgmr.msra.gmra.mxu2 %v2259_v3  ;;  %480 = vmatpush.msra.mxu0 %v405_v27  ;;  %v813_v27 = vsub.f32 %v2339_v1, %v812_v16 }
  0x2b   :  { %524 = vmatpush.msra.mxu2 %v523_v31  ;;  %554 = vmatpush.msra.mxu3 %v553_v37  ;;  %v2421_v58 = vsub.f32 %v678_v25, %v2399_v33  ;;  %v2449_v25 = vsub.f32 %v676_v35, %v2423_v61 }
  0x2c   :  { %v814_v37 = vand.u32 4294901760, %v813_v27  ;;  %v703_v27 = vld [vmem:[#allocation5 + $0xe0] sm:$0xff] }
  0x30   :  { %312 = vmatmul.f32.vlgmr.msra.gmra.mxu1 %v2265_v6  ;;  %384 = vmatmul.f32.vlgmr.msrb.gmra.mxu0 %v2271_v13 }
  0x31   :  { %458 = vmatmul.f32.vlgmr.msrb.gmra.mxu3 %v2265_v6  ;;  %502 = vmatpush.msra.mxu1 %v377_v21  ;;  %v807_v21 = vsub.f32 %v2326_v60, %v806_v10 }
  0x32   :  { %434 = vmatmul.f32.vlgmr.msrb.gmra.mxu2 %v2262_v4  ;;  %648 = vmatpush.msrb.mxu3 %v523_v31 }
  0x33   :  { %626 = vmatpush.msrb.mxu2 %v551_v34  ;;  %577 = vmatpush.msrb.mxu0 %v550_v32  ;;  %v3366_v34 = vand.u32 4294901760, %v2381_v24 }
  0x35   :  { %v837_v2 = vsub.f32 %v2381_v24, %v3366_v34 }
  0x38   :  { %410 = vmatmul.f32.vlgmr.msrb.gmra.mxu1 %v2259_v3  ;;  %482 = vmatmul.f32.vlgmr.msra.gmra.mxu0 %v2259_v3 }
  0x39   :  { %600 = vmatpush.msrb.mxu1 %v523_v31  ;;  %556 = vmatmul.f32.vlgmr.msra.gmra.mxu3 %v2259_v3  ;;  %v808_v31 = vand.u32 4294901760, %v807_v21  ;;  %v3364_v21 = vand.u32 4294901760, %v2421_v58 }
  0x3a   :  { %530 = vmatmul.f32.vlgmr.msra.gmra.mxu2 %v2271_v13  ;;  %936 = vmatpush.msra.mxu3 %v2286_v39  ;;  %v680_v13 = vld [vmem:[#allocation5 + $0x28] sm:$0xff] }
  0x3b   :  { %883 = vmatpush.msra.mxu2 %v2294_v43  ;;  %740 = vmatpush.msra.mxu0 %v2286_v39  ;;  %v2375_v22 = vand.u32 4294901760, %v680_v13 }
  0x3c   :  { %938 = vmatpush.msra.mxu3 %v2288_v41 }
  0x3d   :  { %886 = vmatpush.msra.mxu2 %v2300_v46  ;;  %742 = vmatpush.msra.mxu0 %v2288_v41  ;;  %v2397_v32 = vsub.f32 %v680_v13, %v2375_v22  ;;  %v2437_v13 = vand.u32 4294901760, %v675_v48  ;;  %v3410_v46 = vand.u32 4294901760, %v2369_v18 }
  0x3e   :  { %940 = vmatpush.msra.mxu3 %v2296_v44 }
  0x3f   :  { %889 = vmatpush.msra.mxu2 %v2306_v50  ;;  %744 = vmatpush.msra.mxu0 %v2296_v44  ;;  %v3365_v56 = vand.u32 4294901760, %v2397_v32  ;;  %v2464_v35 = vsub.f32 %v675_v48, %v2437_v13  ;;  %v3371_v48 = vand.u32 4294901760, %v2449_v25 }
  0x40   :  { %504 = vmatmul.f32.vlgmr.msra.gmra.mxu1 %v2259_v3  ;;  %942 = vmatpush.msra.mxu3 %v2302_v47 }
  0x41   :  { %785 = vmatpush.msra.mxu1 %v784_v8  ;;  %892 = vmatpush.msra.mxu2 %v2312_v54  ;;  %v3363_v8 = vand.u32 4294901760, %v2409_v38 }
  0x42   :  { %628 = vmatmul.f32.vlgmr.msrb.gmra.mxu2 %v2259_v3  ;;  %580 = vmatmul.f32.vlgmr.msrb.gmra.mxu0 %v2262_v4  ;;  %v819_v4 = vsub.f32 %v2343_v5, %v3374_v17 }
  0x43   :  { %791 = vmatpush.msra.mxu1 %v790_v14  ;;  %895 = vmatpush.msra.mxu2 %v2326_v60  ;;  %v2439_v14 = vand.u32 4294901760, %v705_v52  ;;  %v697_v60 = vld [vmem:[#allocation5 + $0xb0] sm:$0xff] }
  0x44   :  { %650 = vmatmul.f32.vlgmr.msrb.gmra.mxu3 %v2259_v3  ;;  %746 = vmatpush.msra.mxu0 %v2302_v47  ;;  %v825_v3 = vsub.f32 %v2355_v11, %v3369_v23  ;;  %v820_v42 = vand.u32 4294901760, %v819_v4  ;;  %v838_v4 = vand.u32 4294901760, %v837_v2  ;;  %v701_v2 = vld [vmem:[#allocation5 + $0xd0] sm:$0xff] }
  0x45   :  { %797 = vmatpush.msra.mxu1 %v796_v20  ;;  %898 = vmatpush.msra.mxu2 %v2339_v1  ;;  %v843_v20 = vsub.f32 %v2397_v32, %v3365_v56  ;;  %v3373_v56 = vand.u32 4294901760, %v2464_v35  ;;  %v2497_v29 = vand.u32 4294901760, %v701_v2  ;;  %v2605_v1 = vand.u32 4294901760, %v697_v60 }
  0x46   :  { %944 = vmatpush.msra.mxu3 %v2308_v51  ;;  %748 = vmatpush.msra.mxu0 %v2308_v51 }
  0x47   :  { %803 = vmatpush.msra.mxu1 %v802_v26  ;;  %901 = vmatpush.msra.mxu2 %v2343_v5  ;;  %v2452_v26 = vsub.f32 %v706_v36, %v2425_v63  ;;  %v2467_v36 = vsub.f32 %v705_v52, %v2439_v14  ;;  %v844_v45 = vand.u32 4294901760, %v843_v20 }
  0x48   :  { %604 = vmatmul.f32.vlgmr.msrb.gmra.mxu1 %v2265_v6  ;;  %946 = vmatpush.msra.mxu3 %v2314_v55  ;;  %v826_v6 = vand.u32 4294901760, %v825_v3  ;;  %v3368_v3 = vand.u32 4294901760, %v2435_v9 }
  0x49   :  { %809 = vmatpush.msra.mxu1 %v808_v31  ;;  %904 = vmatpush.msra.mxu2 %v2355_v11  ;;  %v849_v31 = vsub.f32 %v2409_v38, %v3363_v8  ;;  %v3370_v52 = vand.u32 4294901760, %v2452_v26  ;;  %v2482_v8 = vsub.f32 %v704_v15, %v2456_v30  ;;  %v3372_v34 = vand.u32 4294901760, %v2467_v36 }
  0x4a   :  { %948 = vmatpush.msra.mxu3 %v2318_v57  ;;  %750 = vmatpush.msra.mxu0 %v2314_v55 }
  0x4b   :  { %815 = vmatpush.msra.mxu1 %v814_v37  ;;  %907 = vmatpush.msra.mxu2 %v2369_v18  ;;  %v702_v37 = vld [vmem:[#allocation5 + $0xd8] sm:$0xff]  ;;  %v850_v20 = vand.u32 4294901760, %v849_v31  ;;  %v867_v31 = vsub.f32 %v2449_v25, %v3371_v48 }
  0x4c   :  { %950 = vmatpush.msra.mxu3 %v2330_v62  ;;  %752 = vmatpush.msra.mxu0 %v2318_v57 }
  0x4d   :  { %821 = vmatpush.msra.mxu1 %v820_v42  ;;  %910 = vmatpush.msra.mxu2 %v2381_v24  ;;  %v2471_v42 = vand.u32 4294901760, %v703_v27 }
  0x4e   :  { %952 = vmatpush.msra.mxu3 %v2345_v7  ;;  %754 = vmatpush.msra.mxu0 %v2330_v62 }
  0x4f   :  { %827 = vmatpush.msra.mxu1 %v826_v6  ;;  %913 = vmatpush.msra.mxu2 %v2397_v32  ;;  %v855_v6 = vsub.f32 %v2421_v58, %v3364_v21  ;;  %v861_v21 = vsub.f32 %v2435_v9, %v3368_v3  ;;  %v2495_v15 = vsub.f32 %v703_v27, %v2471_v42  ;;  %v1135_v27 = vand.u32 4294901760, %v2482_v8 }
  0x50   :  { %954 = vmatpush.msra.mxu3 %v2357_v12  ;;  %756 = vmatpush.msra.mxu0 %v2345_v7  ;;  %v1124_v3 = vsub.f32 %v2452_v26, %v3370_v52  ;;  %v1130_v52 = vsub.f32 %v2467_v36, %v3372_v34 }
  0x51   :  { %833 = vmatpush.msra.mxu1 %v832_v19  ;;  %916 = vmatpush.msra.mxu2 %v2409_v38  ;;  %v2484_v19 = vand.u32 4294901760, %v702_v37  ;;  %v1141_v48 = vand.u32 4294901760, %v2495_v15  ;;  %v1136_v34 = vsub.f32 %v2482_v8, %v1135_v27 }
  0x52   :  { %956 = vmatpush.msra.mxu3 %v2375_v22  ;;  %758 = vmatpush.msra.mxu0 %v2357_v12 }
  0x53   :  { %839 = vmatpush.msra.mxu1 %v838_v4  ;;  %919 = vmatpush.msra.mxu2 %v2421_v58  ;;  %v856_v4 = vand.u32 4294901760, %v855_v6  ;;  %v2510_v23 = vsub.f32 %v702_v37, %v2484_v19  ;;  %v873_v6 = vsub.f32 %v2464_v35, %v3373_v56  ;;  %v2523_v37 = vsub.f32 %v701_v2, %v2497_v29 }
  0x54   :  { %958 = vmatpush.msra.mxu3 %v2387_v28  ;;  %760 = vmatpush.msra.mxu0 %v2375_v22  ;;  %v1131_v2 = vand.u32 4294901760, %v1130_v52 }
  0x55   :  { %845 = vmatpush.msra.mxu1 %v844_v45  ;;  %922 = vmatpush.msra.mxu2 %v2435_v9  ;;  %v862_v45 = vand.u32 4294901760, %v861_v21  ;;  %v868_v21 = vand.u32 4294901760, %v867_v31  ;;  %v1147_v56 = vand.u32 4294901760, %v2510_v23  ;;  %v874_v17 = vand.u32 4294901760, %v873_v6 }
  0x56   :  { %960 = vmatpush.msra.mxu3 %v2399_v33  ;;  %762 = vmatpush.msra.mxu0 %v2387_v28  ;;  %v1137_v31 = vand.u32 4294901760, %v1136_v34 }
  0x57   :  { %851 = vmatpush.msra.mxu1 %v850_v20  ;;  %925 = vmatpush.msra.mxu2 %v2449_v25  ;;  %v1125_v20 = vand.u32 4294901760, %v1124_v3  ;;  %v1142_v3 = vsub.f32 %v2495_v15, %v1141_v48  ;;  %v1148_v52 = vsub.f32 %v2510_v23, %v1147_v56 }
  0x58   :  { %962 = vmatpush.msra.mxu3 %v2411_v40  ;;  %764 = vmatpush.msra.mxu0 %v2399_v33 }
  0x59   :  { %857 = vmatpush.msra.mxu1 %v856_v4  ;;  %928 = vmatpush.msra.mxu2 %v2464_v35  ;;  %v1153_v4 = vand.u32 4294901760, %v2523_v37  ;;  %v1149_v34 = vand.u32 4294901760, %v1148_v52 }
  0x5a   :  { %964 = vmatpush.msra.mxu3 %v2423_v61  ;;  %766 = vmatpush.msra.mxu0 %v2411_v40 }
  0x5b   :  { %1081 = vmatpush.msrb.mxu2 %v2425_v63  ;;  %863 = vmatpush.msra.mxu1 %v862_v45  ;;  %v1143_v45 = vand.u32 4294901760, %v1142_v3  ;;  %v1154_v6 = vsub.f32 %v2523_v37, %v1153_v4 }
  0x5c   :  { %966 = vmatpush.msra.mxu3 %v2437_v13  ;;  %768 = vmatpush.msra.mxu0 %v2423_v61 }
  0x5d   :  { %1083 = vmatpush.msrb.mxu2 %v2439_v14  ;;  %869 = vmatpush.msra.mxu1 %v868_v21 }
  0x5e   :  { %1126 = vmatpush.msrb.mxu3 %v1125_v20  ;;  %770 = vmatpush.msra.mxu0 %v2437_v13  ;;  %v694_v20 = vld [vmem:[#allocation5 + $0x98] sm:$0xff] }
  0x5f   :  { %1085 = vmatpush.msrb.mxu2 %v2456_v30  ;;  %875 = vmatpush.msra.mxu1 %v874_v17  ;;  %v700_v17 = vld [vmem:[#allocation5 + $0xc8] sm:$0xff] }
  0x60   :  { %1132 = vmatpush.msrb.mxu3 %v1131_v2  ;;  %977 = vmatpush.msrb.mxu0 %v782_v49  ;;  %v2560_v43 = vand.u32 4294901760, %v700_v17 }
  0x61   :  { %1044 = vmatpush.msrb.mxu1 %v2286_v39  ;;  %1087 = vmatpush.msrb.mxu2 %v2471_v42  ;;  %v1155_v39 = vand.u32 4294901760, %v1154_v6  ;;  %v693_v6 = vld [vmem:[#allocation5 + $0x90] sm:$0xff] }
  0x62   :  { %1138 = vmatpush.msrb.mxu3 %v1137_v31  ;;  %981 = vmatpush.msrb.mxu0 %v788_v53  ;;  %v2585_v50 = vsub.f32 %v700_v17, %v2560_v43  ;;  %v698_v53 = vld [vmem:[#allocation5 + $0xb8] sm:$0xff]  ;;  %v2641_v31 = vand.u32 4294901760, %v694_v20  ;;  %v2657_v17 = vand.u32 4294901760, %v693_v6 }
  0x63   :  { %1046 = vmatpush.msrb.mxu1 %v2288_v41  ;;  %1089 = vmatpush.msrb.mxu2 %v2484_v19  ;;  %v3408_v41 = vand.u32 4294901760, %v2343_v5 }
  0x64   :  { %1144 = vmatpush.msrb.mxu3 %v1143_v45  ;;  %985 = vmatpush.msrb.mxu0 %v794_v59  ;;  %v1159_v54 = vand.u32 4294901760, %v2585_v50  ;;  %v3412_v59 = vand.u32 4294901760, %v2397_v32 }
  0x65   :  { %1048 = vmatpush.msrb.mxu1 %v2296_v44  ;;  %1091 = vmatpush.msrb.mxu2 %v2497_v29  ;;  %v3409_v44 = vand.u32 4294901760, %v2355_v11 }
  0x66   :  { %1150 = vmatpush.msrb.mxu3 %v1149_v34  ;;  %989 = vmatpush.msrb.mxu0 %v800_v0 }
  0x67   :  { %1050 = vmatpush.msrb.mxu1 %v2302_v47  ;;  %1093 = vmatpush.msrb.mxu2 %v2560_v43  ;;  %v699_v47 = vld [vmem:[#allocation5 + $0xc0] sm:$0xff] }
  0x68   :  { %1156 = vmatpush.msrb.mxu3 %v1155_v39  ;;  %993 = vmatpush.msrb.mxu0 %v806_v10  ;;  %v2582_v49 = vand.u32 4294901760, %v699_v47  ;;  %v696_v10 = vld [vmem:[#allocation5 + $0xa8] sm:$0xff]  ;;  %v2660_v39 = vsub.f32 %v694_v20, %v2641_v31 }
  0x69   :  { %1052 = vmatpush.msrb.mxu1 %v2308_v51  ;;  %v3411_v51 = vand.u32 4294901760, %v2381_v24  ;;  %v2618_v18 = vand.u32 4294901760, %v696_v10  ;;  %v2623_v24 = vsub.f32 %v697_v60, %v2605_v1  ;;  %v691_v60 = vld [vmem:[#allocation5 + $0x80] sm:$0xff] }
  0x6a   :  { %997 = vmatpush.msrb.mxu0 %v812_v16  ;;  %1095 = vmatpush.msrb.mxu2 %v2582_v49 }
  0x6b   :  { %1054 = vmatpush.msrb.mxu1 %v2314_v55  ;;  %v2592_v55 = vand.u32 4294901760, %v698_v53  ;;  %v2633_v21 = vsub.f32 %v696_v10, %v2618_v18 }
  0x6c   :  { %1001 = vmatpush.msrb.mxu0 %v3408_v41 }
  0x6d   :  { %1056 = vmatpush.msrb.mxu1 %v2318_v57  ;;  %v2595_v57 = vsub.f32 %v699_v47, %v2582_v49  ;;  %1097 = vmatpush.msrb.mxu2 %v2592_v55  ;;  %v2608_v5 = vsub.f32 %v698_v53, %v2592_v55  ;;  %v1183_v3 = vand.u32 4294901760, %v2633_v21  ;;  %v1195_v47 = vand.u32 4294901760, %v2660_v39 }
  0x6e   :  { %1005 = vmatpush.msrb.mxu0 %v3409_v44  ;;  %v692_v44 = vld [vmem:[#allocation5 + $0x88] sm:$0xff]  ;;  %v2672_v53 = vsub.f32 %v693_v6, %v2657_v17 }
  0x6f   :  { %1058 = vmatpush.msrb.mxu1 %v2330_v62  ;;  %v1160_v62 = vsub.f32 %v2585_v50, %v1159_v54  ;;  %v1165_v0 = vand.u32 4294901760, %v2595_v57  ;;  %1099 = vmatpush.msrb.mxu2 %v2605_v1  ;;  %v1171_v16 = vand.u32 4294901760, %v2608_v5 }
  0x70   :  { %1009 = vmatpush.msrb.mxu0 %v3410_v46 }
  0x71   :  { %1060 = vmatpush.msrb.mxu1 %v2345_v7  ;;  %v3413_v7 = vand.u32 4294901760, %v2409_v38  ;;  %v1161_v11 = vand.u32 4294901760, %v1160_v62  ;;  %1101 = vmatpush.msrb.mxu2 %v2618_v18  ;;  %v1201_v62 = vand.u32 4294901760, %v2672_v53 }
  0x72   :  { %1013 = vmatpush.msrb.mxu0 %v3411_v51  ;;  %v2669_v51 = vand.u32 4294901760, %v692_v44 }
  0x73   :  { %1062 = vmatpush.msrb.mxu1 %v2357_v12  ;;  %v1166_v12 = vsub.f32 %v2595_v57, %v1165_v0  ;;  %1162 = vmatpush.msrb.mxu3 %v1161_v11 }
  0x74   :  { %1017 = vmatpush.msrb.mxu0 %v3412_v59  ;;  %v2682_v10 = vsub.f32 %v692_v44, %v2669_v51 }
  0x75   :  { %1064 = vmatpush.msrb.mxu1 %v2375_v22  ;;  %v3414_v22 = vand.u32 4294901760, %v2421_v58  ;;  %v1167_v32 = vand.u32 4294901760, %v1166_v12  ;;  %v1177_v58 = vand.u32 4294901760, %v2623_v24  ;;  %v1202_v12 = vsub.f32 %v2672_v53, %v1201_v62 }
  0x76   :  { %1021 = vmatpush.msrb.mxu0 %v3413_v7  ;;  %v2679_v7 = vand.u32 4294901760, %v691_v60 }
  0x77   :  { %1066 = vmatpush.msrb.mxu1 %v2387_v28  ;;  %v695_v28 = vld [vmem:[#allocation5 + $0xa0] sm:$0xff]  ;;  %1168 = vmatpush.msrb.mxu3 %v1167_v32  ;;  %v1178_v45 = vsub.f32 %v2623_v24, %v1177_v58  ;;  %v1203_v32 = vand.u32 4294901760, %v1202_v12 }
  0x78   :  { %1025 = vmatpush.msrb.mxu0 %v3414_v22  ;;  %v2630_v38 = vand.u32 4294901760, %v695_v28  ;;  %v3376_v22 = vand.u32 4294901760, %v2682_v10 }
  0x79   :  { %1068 = vmatpush.msrb.mxu1 %v2399_v33  ;;  %v1172_v33 = vsub.f32 %v2608_v5, %v1171_v16  ;;  %v1179_v41 = vand.u32 4294901760, %v1178_v45 }
  0x7a   :  { %1103 = vmatpush.msrb.mxu2 %v2630_v38  ;;  %v2644_v52 = vsub.f32 %v695_v28, %v2630_v38  ;;  %v2690_v28 = vsub.f32 %v691_v60, %v2679_v7 }
  0x7b   :  { %1070 = vmatpush.msrb.mxu1 %v2411_v40  ;;  %v3415_v40 = vand.u32 4294901760, %v2435_v9  ;;  %v1173_v2 = vand.u32 4294901760, %v1172_v33  ;;  %v1184_v9 = vsub.f32 %v2633_v21, %v1183_v3  ;;  %v1208_v33 = vsub.f32 %v2682_v10, %v3376_v22 }
  0x7c   :  { %1105 = vmatpush.msrb.mxu2 %v2641_v31  ;;  %v1189_v34 = vand.u32 4294901760, %v2644_v52  ;;  %v3375_v20 = vand.u32 4294901760, %v2690_v28  ;;  %v3390_v22 = vmov 0.0  }
  0x7d   :  { %1072 = vmatpush.msrb.mxu1 %v2423_v61  ;;  %1029 = vmatpush.msrb.mxu0 %v3415_v40  ;;  %v3416_v61 = vand.u32 4294901760, %v2449_v25  ;;  %v1185_v25 = vand.u32 4294901760, %v1184_v9  ;;  %v1209_v40 = vand.u32 4294901760, %v1208_v33  ;;  %v654_v9 = vlaneseq }
  0x7e   :  { %1174 = vmatpush.msrb.mxu3 %v1173_v2  ;;  %v1190_v46 = vsub.f32 %v2644_v52, %v1189_v34  ;;  %1107 = vmatpush.msrb.mxu2 %v2657_v17  ;;  %v1214_v2 = vsub.f32 %v2690_v28, %v3375_v20 }
  0x7f   :  { %1074 = vmatpush.msrb.mxu1 %v2437_v13  ;;  %1033 = vmatpush.msrb.mxu0 %v3416_v61  ;;  %v3417_v13 = vand.u32 4294901760, %v2464_v35  ;;  %v1196_v35 = vsub.f32 %v2660_v39, %v1195_v47 }
  0x80   :  { %1180 = vmatpush.msrb.mxu3 %v1179_v41  ;;  %v1191_v59 = vand.u32 4294901760, %v1190_v46  ;;  %1109 = vmatpush.msrb.mxu2 %v2669_v51  ;;  %v1215_v45 = vand.u32 4294901760, %v1214_v2 }
  0x81   :  { %1037 = vmatpush.msrb.mxu0 %v3417_v13  ;;  %v1197_v11 = vand.u32 4294901760, %v1196_v35 }
  0x82   :  { %1186 = vmatpush.msrb.mxu3 %v1185_v25  ;;  %1111 = vmatpush.msrb.mxu2 %v2679_v7 }
  0x84   :  { %1192 = vmatpush.msrb.mxu3 %v1191_v59  ;;  %v2699_v59 = vand.u32 127, %v654_v9  ;;  %v3394_v9 = vmov 1.0  }
  0x86   :  { %1198 = vmatpush.msrb.mxu3 %v1197_v11  ;;  %v659_v11 = vcvt.s32.f32 %v2699_v59 }
  0x88   :  { %1204 = vmatpush.msrb.mxu3 %v1203_v32 }
  0x8a   :  { %1210 = vmatpush.msrb.mxu3 %v1209_v40 }
  0x8c   :  { %1216 = vmatpush.msrb.mxu3 %v1215_v45 }
  0x95   :  { %v93_v6 = vpop.f32.mrf.mxu0 }
  0x9b   :  { %v167_v61 = vpop.f32.mrf.mxu3 }
  0x9d   :  { %v119_v41 = vpop.f32.mrf.mxu1  ;;  %v143_v44 = vpop.f32.mrf.mxu2 }
  0x9e   :  { %v120_v13 = vadd.f32 %v119_v41, %v93_v6  ;;  %v191_v25 = vpop.f32.mrf.mxu0 }
  0xa0   :  { %v144_v46 = vadd.f32 %v143_v44, %v120_v13  ;;  %v656_v13 = vadd.s32 128, %v2699_v59 }
  0xa2   :  { %v168_v35 = vadd.f32 %v167_v61, %v144_v46 }
  0xa4   :  { %v192_v60 = vadd.f32 %v191_v25, %v168_v35  ;;  %v265_v12 = vpop.f32.mrf.mxu3  ;;  %v3420_v25 = vand.u32 4294901760, %v2452_v26 }
  0xa5   :  { %v213_v32 = vpop.f32.mrf.mxu1  ;;  %v239_v33 = vpop.f32.mrf.mxu2 }
  0xa6   :  { %v214_v40 = vadd.f32 %v213_v32, %v192_v60  ;;  %v266_v2 = vadd.f32 %v265_v12, %v239_v33  ;;  %v289_v45 = vpop.f32.mrf.mxu0  ;;  %v3421_v12 = vand.u32 4294901760, %v2467_v36 }
  0xa8   :  { %vm2702_vm2 = vcmp.eq.f32.partialorder %v659_v11, %v214_v40  ;;  %v290_v41 = vadd.f32 %v289_v45, %v266_v2  ;;  %v660_v40 = vcvt.s32.f32 %v656_v13 }
  0xa9   :  { %v2122_v6 = vsel %vm2702_vm2, 1.0, %v3390_v22  ;;  %2126 = vmatmul.msk.f32.vlgmr.msra.gmra.mxu1 %vm2702_vm2, %v3394_v9 }
  0xaa   :  { %v772_v61 = vsub.f32 %v2122_v6, %v2122_v6  ;;  %1277 = vmatpush.msra.mxu1 %v2425_v63 }
  0xac   :  { %1279 = vmatpush.msra.mxu1 %v2439_v14  ;;  %931 = vmatmul.f32.vlgmr.msra.gmra.mxu2 %v772_v61  ;;  %v773_v44 = vand.u32 4294901760, %v772_v61  ;;  %v359_v32 = vpop.f32.mrf.mxu3 }
  0xad   :  { %1318 = vmatpush.msra.mxu2 %v3420_v25  ;;  %v313_v46 = vpop.f32.mrf.mxu1  ;;  %v337_v35 = vpop.f32.mrf.mxu2 }
  0xae   :  { %v314_v60 = vadd.f32 %v313_v46, %v290_v41  ;;  %1281 = vmatpush.msra.mxu1 %v2456_v30  ;;  %970 = vmatmul.f32.vlgmr.msra.gmra.mxu3 %v773_v44  ;;  %v774_v11 = vsub.f32 %v772_v61, %v773_v44  ;;  %v715_v61 = vld [vmem:[#allocation5 + $0x140] sm:$0xff]  ;;  %v714_v41 = vld [vmem:[#allocation5 + $0x138] sm:$0xff] }
  0xaf   :  { %1322 = vmatpush.msra.mxu2 %v3421_v12  ;;  %1385 = vmatpush.msra.mxu3 %v2425_v63  ;;  %v2854_v46 = vand.u32 4294901760, %v714_v41 }
  0xb0   :  { %v338_v33 = vadd.f32 %v337_v35, %v314_v60  ;;  %1283 = vmatpush.msra.mxu1 %v2471_v42  ;;  %v775_v2 = vand.u32 4294901760, %v774_v11  ;;  %v712_v11 = vld [vmem:[#allocation5 + $0x128] sm:$0xff] }
  0xb1   :  { %1326 = vmatpush.msra.mxu2 %v1135_v27  ;;  %1387 = vmatpush.msra.mxu3 %v2439_v14  ;;  %v722_v27 = vld [vmem:[#allocation5 + $0x178] sm:$0xff] }
  0xb2   :  { %v360_v45 = vadd.f32 %v359_v32, %v338_v33  ;;  %2128 = vmatmul.msk.f32.vlgmr.msrb.gmra.mxu1 %vm2702_vm2, %v3394_v9  ;;  %776 = vmatmul.f32.vlgmr.msra.gmra.mxu0 %v775_v2  ;;  %v385_v32 = vpop.f32.mrf.mxu0 }
  0xb3   :  { %1285 = vmatpush.msra.mxu1 %v2484_v19  ;;  %1224 = vmatpush.msra.mxu0 %v2452_v26 }
  0xb4   :  { %vm2730_vm3 = vcmp.eq.f32.partialorder %v660_v40, %v360_v45  ;;  %1330 = vmatpush.msra.mxu2 %v1141_v48  ;;  %1389 = vmatpush.msra.mxu3 %v2456_v30  ;;  %v2753_v30 = vand.u32 4294901760, %v722_v27  ;;  %v3425_v45 = vand.u32 4294901760, %v2690_v28 }
  0xb5   :  { %v2123_v14 = vsel %vm2730_vm3, 1.0, %v3390_v22  ;;  %1287 = vmatpush.msra.mxu1 %v2497_v29  ;;  %1227 = vmatpush.msra.mxu0 %v2467_v36  ;;  %v721_v36 = vld [vmem:[#allocation5 + $0x170] sm:$0xff] }
  0xb6   :  { %v2742_v6 = vsub.f32 %v2123_v14, %v2123_v14  ;;  %1334 = vmatpush.msra.mxu2 %v1147_v56  ;;  %1391 = vmatpush.msra.mxu3 %v2471_v42  ;;  %v2767_v42 = vand.u32 4294901760, %v721_v36 }
  0xb7   :  { %1289 = vmatpush.msra.mxu1 %v2560_v43  ;;  %1230 = vmatpush.msra.mxu0 %v2482_v8  ;;  %v720_v8 = vld [vmem:[#allocation5 + $0x168] sm:$0xff] }
  0xb8   :  { %1338 = vmatpush.msra.mxu2 %v1153_v4  ;;  %1393 = vmatpush.msra.mxu3 %v2484_v19  ;;  %v1114_v26 = vand.u32 4294901760, %v2742_v6  ;;  %v2777_v19 = vand.u32 4294901760, %v720_v8  ;;  %v718_v4 = vld [vmem:[#allocation5 + $0x158] sm:$0xff] }
  0xb9   :  { %1291 = vmatpush.msra.mxu1 %v2582_v49  ;;  %1233 = vmatpush.msra.mxu0 %v2495_v15  ;;  %v719_v15 = vld [vmem:[#allocation5 + $0x160] sm:$0xff] }
  0xba   :  { %1342 = vmatpush.msra.mxu2 %v1159_v54  ;;  %1395 = vmatpush.msra.mxu3 %v2497_v29  ;;  %v1115_v56 = vsub.f32 %v2742_v6, %v1114_v26  ;;  %v2773_v29 = vsub.f32 %v722_v27, %v2753_v30  ;;  %v2789_v54 = vand.u32 4294901760, %v719_v15  ;;  %v2880_v27 = vsub.f32 %v714_v41, %v2854_v46  ;;  %v708_v41 = vld [vmem:[#allocation5 + $0x108] sm:$0xff] }
  0xbb   :  { %1293 = vmatpush.msra.mxu1 %v2592_v55  ;;  %2127 = vmatmul.msk.f32.vlgmr.msrb.gmra.mxu0 %vm2702_vm2, %v3394_v9 }
  0xbc   :  { %1236 = vmatpush.msra.mxu0 %v2510_v23  ;;  %1346 = vmatpush.msra.mxu2 %v1165_v0  ;;  %v1116_v48 = vand.u32 4294901760, %v1115_v56  ;;  %v2785_v23 = vsub.f32 %v721_v36, %v2767_v42  ;;  %v716_v0 = vld [vmem:[#allocation5 + $0x148] sm:$0xff]  ;;  %v710_v56 = vld [vmem:[#allocation5 + $0x118] sm:$0xff] }
  0xbd   :  { %1397 = vmatpush.msra.mxu3 %v2560_v43  ;;  %1295 = vmatpush.msra.mxu1 %v2605_v1  ;;  %v3397_v43 = vand.u32 4294901760, %v2773_v29 }
  0xbe   :  { %1239 = vmatpush.msra.mxu0 %v2523_v37  ;;  %1350 = vmatpush.msra.mxu2 %v1171_v16  ;;  %v2795_v37 = vsub.f32 %v720_v8, %v2777_v19 }
  0xbf   :  { %1399 = vmatpush.msra.mxu3 %v2582_v49  ;;  %1297 = vmatpush.msra.mxu1 %v2618_v18  ;;  %v717_v49 = vld [vmem:[#allocation5 + $0x150] sm:$0xff]  ;;  %v1465_v16 = vsub.f32 %v2773_v29, %v3397_v43 }
  0xc0   :  { %1117 = vmatmul.f32.vlgmr.msrb.gmra.mxu2 %v1116_v48  ;;  %1242 = vmatpush.msra.mxu0 %v2585_v50  ;;  %v2801_v50 = vand.u32 4294901760, %v718_v4  ;;  %v2815_v20 = vand.u32 4294901760, %v717_v49 }
  0xc1   :  { %1354 = vmatpush.msra.mxu2 %v1177_v58  ;;  %1401 = vmatpush.msra.mxu3 %v2592_v55  ;;  %v3396_v55 = vand.u32 4294901760, %v2785_v23  ;;  %v2813_v58 = vsub.f32 %v719_v15, %v2789_v54 }
  0xc2   :  { %1299 = vmatpush.msra.mxu1 %v2630_v38  ;;  %2129 = vmatmul.msk.f32.vlgmr.msrb.gmra.mxu3 %vm2730_vm3, %v3394_v9  ;;  %v2840_v13 = vsub.f32 %v717_v49, %v2815_v20 }
  0xc3   :  { %1245 = vmatpush.msra.mxu0 %v2595_v57  ;;  %1358 = vmatpush.msra.mxu2 %v1183_v3  ;;  %v3392_v57 = vand.u32 4294901760, %v2795_v37  ;;  %v2826_v3 = vsub.f32 %v718_v4, %v2801_v50  ;;  %v3391_v44 = vand.u32 4294901760, %v2813_v58 }
  0xc4   :  { %1403 = vmatpush.msra.mxu3 %v2605_v1  ;;  %1301 = vmatpush.msra.mxu1 %v2641_v31  ;;  %v2821_v1 = vand.u32 4294901760, %v716_v0  ;;  %v3387_v12 = vand.u32 4294901760, %v2840_v13 }
  0xc5   :  { %1248 = vmatpush.msra.mxu0 %v2608_v5  ;;  %1362 = vmatpush.msra.mxu2 %v1189_v34  ;;  %v1471_v5 = vsub.f32 %v2785_v23, %v3396_v55  ;;  %v2834_v34 = vand.u32 4294901760, %v715_v61  ;;  %v3388_v25 = vand.u32 4294901760, %v2826_v3 }
  0xc6   :  { %1405 = vmatpush.msra.mxu3 %v2618_v18  ;;  %1303 = vmatpush.msra.mxu1 %v2657_v17  ;;  %v1466_v18 = vand.u32 4294901760, %v1465_v16  ;;  %v1495_v8 = vsub.f32 %v2840_v13, %v3387_v12  ;;  %v3384_v16 = vand.u32 4294901760, %v2880_v27 }
  0xc7   :  { %1251 = vmatpush.msra.mxu0 %v2623_v24  ;;  %1366 = vmatpush.msra.mxu2 %v1195_v47  ;;  %v1477_v24 = vsub.f32 %v2795_v37, %v3392_v57  ;;  %v2849_v47 = vsub.f32 %v716_v0, %v2821_v1  ;;  %v1472_v35 = vand.u32 4294901760, %v1471_v5  ;;  %v2860_v60 = vsub.f32 %v715_v61, %v2834_v34  ;;  %v709_v0 = vld [vmem:[#allocation5 + $0x110] sm:$0xff] }
  0xc8   :  { %1407 = vmatpush.msra.mxu3 %v2630_v38  ;;  %1305 = vmatpush.msra.mxu1 %v2669_v51  ;;  %v713_v38 = vld [vmem:[#allocation5 + $0x130] sm:$0xff]  ;;  %v1489_v14 = vsub.f32 %v2826_v3, %v3388_v25  ;;  %v2910_v5 = vand.u32 4294901760, %v710_v56 }
  0xc9   :  { %1254 = vmatpush.msra.mxu0 %v2633_v21  ;;  %1370 = vmatpush.msra.mxu2 %v1201_v62  ;;  %v411_v21 = vpop.f32.mrf.mxu1  ;;  %v3424_v62 = vand.u32 4294901760, %v2682_v10  ;;  %v2867_v33 = vand.u32 4294901760, %v713_v38  ;;  %v3386_v40 = vand.u32 4294901760, %v2849_v47  ;;  %v3385_v36 = vand.u32 4294901760, %v2860_v60 }
  0xca   :  { %1409 = vmatpush.msra.mxu3 %v2641_v31  ;;  %1307 = vmatpush.msra.mxu1 %v2679_v7  ;;  %v1483_v31 = vsub.f32 %v2813_v58, %v3391_v44  ;;  %v412_v2 = vadd.f32 %v411_v21, %v385_v32  ;;  %v2922_v21 = vand.u32 4294901760, %v709_v0  ;;  %v2932_v32 = vsub.f32 %v710_v56, %v2910_v5 }
  0xcb   :  { %1257 = vmatpush.msra.mxu0 %v2644_v52  ;;  %1374 = vmatpush.msra.mxu2 %v3424_v62  ;;  %v1478_v52 = vand.u32 4294901760, %v1477_v24  ;;  %v2894_v48 = vsub.f32 %v713_v38, %v2867_v33  ;;  %v1501_v4 = vsub.f32 %v2849_v47, %v3386_v40  ;;  %v1507_v63 = vsub.f32 %v2860_v60, %v3385_v36  ;;  %v733_v36 = vld [vmem:[#allocation5 + $0x1d0] sm:$0xff] }
  0xcc   :  { %1411 = vmatpush.msra.mxu3 %v2657_v17  ;;  %1467 = vmatpush.msrb.mxu1 %v1466_v18  ;;  %v711_v17 = vld [vmem:[#allocation5 + $0x120] sm:$0xff]  ;;  %v1496_v18 = vand.u32 4294901760, %v1495_v8  ;;  %v657_v56 = vadd.s32 256, %v2699_v59 }
  0xcd   :  { %1311 = vmatmul.f32.vlgmr.msra.gmra.mxu1 %v1114_v26  ;;  %1260 = vmatpush.msra.mxu0 %v2660_v39  ;;  %v2882_v26 = vand.u32 4294901760, %v712_v11  ;;  %v435_v39 = vpop.f32.mrf.mxu2  ;;  %v2896_v15 = vand.u32 4294901760, %v711_v17  ;;  %v3383_v24 = vand.u32 4294901760, %v2894_v48 }
  0xce   :  { %1378 = vmatpush.msra.mxu2 %v3425_v45  ;;  %1413 = vmatpush.msra.mxu3 %v2669_v51  ;;  %v1484_v51 = vand.u32 4294901760, %v1483_v31  ;;  %v436_v49 = vadd.f32 %v435_v39, %v412_v2  ;;  %v2934_v2 = vand.u32 4294901760, %v708_v41  ;;  %v2944_v45 = vsub.f32 %v709_v0, %v2922_v21 }
  0xcf   :  { %1473 = vmatpush.msrb.mxu1 %v1472_v35  ;;  %2130 = vmatmul.msk.f32.vlgmr.msra.gmra.mxu2 %vm2730_vm3, %v3394_v9  ;;  %v2908_v61 = vsub.f32 %v712_v11, %v2882_v26  ;;  %v2920_v38 = vsub.f32 %v711_v17, %v2896_v15  ;;  %v707_v35 = vld [vmem:[#allocation5 + $0x100] sm:$0xff]  ;;  %v1513_v11 = vsub.f32 %v2880_v27, %v3384_v16 }
  0xd0   :  { %1565 = vmatpush.msrb.mxu2 %v2773_v29  ;;  %1263 = vmatpush.msra.mxu0 %v2672_v53  ;;  %v1490_v53 = vand.u32 4294901760, %v1489_v14  ;;  %v2946_v14 = vand.u32 4294901760, %v707_v35  ;;  %v2957_v0 = vsub.f32 %v708_v41, %v2934_v2 }
  0xd1   :  { %1415 = vmatpush.msra.mxu3 %v2679_v7  ;;  %1479 = vmatpush.msrb.mxu1 %v1478_v52  ;;  %v459_v7 = vpop.f32.mrf.mxu3  ;;  %v3382_v31 = vand.u32 4294901760, %v2908_v61  ;;  %v483_v52 = vpop.f32.mrf.mxu0  ;;  %v3381_v17 = vand.u32 4294901760, %v2920_v38 }
  0xd2   :  { %2131 = vmatmul.msk.f32.vlgmr.msra.gmra.mxu3 %vm2730_vm3, %v3394_v9  ;;  %1568 = vmatpush.msrb.mxu2 %v2785_v23  ;;  %v460_v62 = vadd.f32 %v459_v7, %v436_v49  ;;  %v505_v49 = vpop.f32.mrf.mxu1  ;;  %3426 = vst [vmem:[#allocation11_spill] sm:$0xff] %v2957_v0 }
  0xd3   :  { %1618 = vmatpush.msrb.mxu3 %v2753_v30  ;;  %1266 = vmatpush.msra.mxu0 %v2682_v10  ;;  %v1502_v10 = vand.u32 4294901760, %v1501_v4  ;;  %v1525_v8 = vsub.f32 %v2908_v61, %v3382_v31  ;;  %v3379_v4 = vand.u32 4294901760, %v2932_v32  ;;  %v1531_v7 = vsub.f32 %v2920_v38, %v3381_v17  ;;  %v734_v31 = vld [vmem:[#allocation5 + $0x1d8] sm:$0xff] }
  0xd4   :  { %1485 = vmatpush.msrb.mxu1 %v1484_v51  ;;  %1571 = vmatpush.msrb.mxu2 %v2795_v37  ;;  %v484_v39 = vadd.f32 %v483_v52, %v460_v62  ;;  %v1514_v51 = vand.u32 4294901760, %v1513_v11  ;;  %v661_v62 = vcvt.s32.f32 %v657_v56  ;;  %v3032_v40 = vand.u32 4294901760, %v734_v31 }
  0xd5   :  { %1620 = vmatpush.msrb.mxu3 %v2767_v42  ;;  %1269 = vmatpush.msra.mxu0 %v2690_v28  ;;  %v1508_v28 = vand.u32 4294901760, %v1507_v63  ;;  %v3377_v63 = vand.u32 4294901760, %v2944_v45  ;;  %v1526_v11 = vand.u32 4294901760, %v1525_v8  ;;  %v1537_v52 = vsub.f32 %v2932_v32, %v3379_v4  ;;  %v735_v4 = vld [vmem:[#allocation5 + $0x1e0] sm:$0xff]  ;;  %v531_v16 = vpop.f32.mrf.mxu2 }
  0xd6   :  { %1491 = vmatpush.msrb.mxu1 %v1490_v53  ;;  %1272 = vmatmul.f32.vlgmr.msra.gmra.mxu0 %v2742_v6  ;;  %v1519_v6 = vsub.f32 %v2894_v48, %v3383_v24  ;;  %v506_v41 = vadd.f32 %v505_v49, %v484_v39  ;;  %v1532_v39 = vand.u32 4294901760, %v1531_v7  ;;  %v3023_v24 = vand.u32 4294901760, %v735_v4 }
  0xd7   :  { %1422 = vmatpush.msrb.mxu0 %v2753_v30  ;;  %1574 = vmatpush.msrb.mxu2 %v2813_v58  ;;  %v1543_v56 = vsub.f32 %v2944_v45, %v3377_v63  ;;  %v736_v63 = vld [vmem:[#allocation5 + $0x1e8] sm:$0xff] }
  0xd8   :  { %1622 = vmatpush.msrb.mxu3 %v2777_v19  ;;  %1497 = vmatpush.msrb.mxu1 %v1496_v18  ;;  %v1520_v53 = vand.u32 4294901760, %v1519_v6  ;;  %v2967_v18 = vsub.f32 %v707_v35, %v2946_v14  ;;  %v737_v6 = vld [vmem:[#allocation5 + $0x1f0] sm:$0xff]  ;;  %vm2987_vm4 = vcmp.eq.f32.partialorder %v661_v62, %v506_v41 }
  0xd9   :  { %1424 = vmatpush.msrb.mxu0 %v2767_v42  ;;  %1577 = vmatpush.msrb.mxu2 %v2826_v3  ;;  %v2991_v49 = vand.u32 4294901760, %v737_v6  ;;  %v1544_v62 = vand.u32 4294901760, %v1543_v56  ;;  %v557_v56 = vpop.f32.mrf.mxu3 }
  0xda   :  { %1624 = vmatpush.msrb.mxu3 %v2789_v54  ;;  %1503 = vmatpush.msrb.mxu1 %v1502_v10  ;;  %3427 = vst [vmem:[#allocation12_spill] sm:$0xff] %v2967_v18  ;;  %v738_v10 = vld [vmem:[#allocation5 + $0x1f8] sm:$0xff] }
  0xdb   :  { %1426 = vmatpush.msrb.mxu0 %v2777_v19  ;;  %1580 = vmatpush.msrb.mxu2 %v2840_v13  ;;  %v2978_v35 = vand.u32 4294901760, %v738_v10 }
  0xdc   :  { %1626 = vmatpush.msrb.mxu3 %v2801_v50  ;;  %1509 = vmatpush.msrb.mxu1 %v1508_v28  ;;  %v3378_v28 = vand.u32 4294901760, %v2957_v0 }
  0xdd   :  { %1428 = vmatpush.msrb.mxu0 %v2789_v54  ;;  %1583 = vmatpush.msrb.mxu2 %v2849_v47  ;;  %v3000_v41 = vsub.f32 %v738_v10, %v2978_v35  ;;  %v3014_v10 = vsub.f32 %v737_v6, %v2991_v49 }
  0xde   :  { %1628 = vmatpush.msrb.mxu3 %v2815_v20  ;;  %1515 = vmatpush.msrb.mxu1 %v1514_v51  ;;  %v3380_v51 = vand.u32 4294901760, %v2967_v18  ;;  %v1549_v7 = vsub.f32 %v2957_v0, %v3378_v28  ;;  %v3011_v28 = vand.u32 4294901760, %v736_v63 }
  0xdf   :  { %1430 = vmatpush.msrb.mxu0 %v2801_v50  ;;  %1586 = vmatpush.msrb.mxu2 %v2860_v60  ;;  %v3389_v17 = vand.u32 4294901760, %v3000_v41 }
  0xe0   :  { %1630 = vmatpush.msrb.mxu3 %v2821_v1  ;;  %1521 = vmatpush.msrb.mxu1 %v1520_v53  ;;  %v1538_v53 = vand.u32 4294901760, %v1537_v52  ;;  %v1555_v52 = vsub.f32 %v2967_v18, %v3380_v51 }
  0xe1   :  { %1432 = vmatpush.msrb.mxu0 %v2815_v20  ;;  %1589 = vmatpush.msrb.mxu2 %v2880_v27  ;;  %v1806_v12 = vsub.f32 %v3000_v41, %v3389_v17 }
  0xe2   :  { %1632 = vmatpush.msrb.mxu3 %v2834_v34  ;;  %1527 = vmatpush.msrb.mxu1 %v1526_v11  ;;  %v2124_v11 = vsel %vm2987_vm4, 1.0, %v3390_v22  ;;  %v1556_v6 = vand.u32 4294901760, %v1555_v52  ;;  %v732_v52 = vld [vmem:[#allocation5 + $0x1c8] sm:$0xff] }
  0xe3   :  { %1434 = vmatpush.msrb.mxu0 %v2821_v1  ;;  %1592 = vmatpush.msrb.mxu2 %v2894_v48  ;;  %v3019_v51 = vsub.f32 %v2124_v11, %v2124_v11  ;;  %v558_v11 = vadd.f32 %v557_v56, %v531_v16  ;;  %v3042_v16 = vsub.f32 %v735_v4, %v3023_v24  ;;  %v731_v56 = vld [vmem:[#allocation5 + $0x1c0] sm:$0xff]  ;;  %v3052_v44 = vand.u32 4294901760, %v732_v52 }
  0xe4   :  { %1634 = vmatpush.msrb.mxu3 %v2854_v46  ;;  %1533 = vmatpush.msrb.mxu1 %v1532_v39  ;;  %v1550_v39 = vand.u32 4294901760, %v1549_v7  ;;  %v3029_v7 = vsub.f32 %v736_v63, %v3011_v28  ;;  %v3057_v4 = vsub.f32 %v734_v31, %v3032_v40  ;;  %v1807_v57 = vand.u32 4294901760, %v1806_v12 }
  0xe5   :  { %1436 = vmatpush.msrb.mxu0 %v2834_v34  ;;  %1595 = vmatpush.msrb.mxu2 %v2908_v61  ;;  %v3398_v63 = vand.u32 4294901760, %v3019_v51  ;;  %3431 = vst [vmem:[#allocation14_spill] sm:$0xff] %v3042_v16  ;;  %v3078_v43 = vsub.f32 %v732_v52, %v3052_v44  ;;  %v3433_v52 = vand.u32 4294901760, %v3042_v16 }
  0xe6   :  { %1636 = vmatpush.msrb.mxu3 %v2867_v33  ;;  %1539 = vmatpush.msrb.mxu1 %v1538_v53  ;;  %v3393_v53 = vand.u32 4294901760, %v3014_v10  ;;  %3430 = vst [vmem:[#allocation13_spill] sm:$0xff] %v3029_v7  ;;  %v3399_v17 = vand.u32 4294901760, %v3029_v7 }
  0xe7   :  { %1438 = vmatpush.msrb.mxu0 %v2854_v46  ;;  %1598 = vmatpush.msrb.mxu2 %v2920_v38  ;;  %3432 = vst [vmem:[#allocation15_spill] sm:$0xff] %v3057_v4 }
  0xe8   :  { %1638 = vmatpush.msrb.mxu3 %v2882_v26  ;;  %1545 = vmatpush.msrb.mxu1 %v1544_v62  ;;  %v581_v62 = vpop.f32.mrf.mxu0  ;;  %v1812_v25 = vsub.f32 %v3014_v10, %v3393_v53  ;;  %v1456_v53 = vsub.f32 %v3019_v51, %v3398_v63  ;;  %v1818_v9 = vsub.f32 %v3029_v7, %v3399_v17  ;;  %v729_v63 = vld [vmem:[#allocation5 + $0x1b0] sm:$0xff]  ;;  %v727_v7 = vld [vmem:[#allocation5 + $0x1a0] sm:$0xff] }
  0xe9   :  { %1440 = vmatpush.msrb.mxu0 %v2867_v33  ;;  %1601 = vmatpush.msrb.mxu2 %v2932_v32  ;;  %v582_v22 = vadd.f32 %v581_v62, %v558_v11  ;;  %v3064_v11 = vand.u32 4294901760, %v731_v56  ;;  %v730_v62 = vld [vmem:[#allocation5 + $0x1b8] sm:$0xff] }
  0xea   :  { %1640 = vmatpush.msrb.mxu3 %v2896_v15  ;;  %1551 = vmatpush.msrb.mxu1 %v1550_v39  ;;  %v3044_v39 = vand.u32 4294901760, %v733_v36  ;;  %v1813_v12 = vand.u32 4294901760, %v1812_v25  ;;  %v1457_v25 = vand.u32 4294901760, %v1456_v53 }
  0xeb   :  { %1442 = vmatpush.msrb.mxu0 %v2882_v26  ;;  %1604 = vmatpush.msrb.mxu2 %v2944_v45  ;;  %v3087_v17 = vsub.f32 %v731_v56, %v3064_v11 }
  0xec   :  { %1642 = vmatpush.msrb.mxu3 %v2910_v5  ;;  %1557 = vmatpush.msrb.mxu1 %v1556_v6  ;;  %v605_v6 = vpop.f32.mrf.mxu1  ;;  %v3070_v31 = vsub.f32 %v733_v36, %v3044_v39  ;;  %v629_v36 = vpop.f32.mrf.mxu2 }
  0xed   :  { %1444 = vmatpush.msrb.mxu0 %v2896_v15  ;;  %1607 = vmatpush.msrb.mxu2 %v2957_v0  ;;  %v606_v55 = vadd.f32 %v605_v6, %v582_v22  ;;  %v728_v22 = vld [vmem:[#allocation5 + $0x1a8] sm:$0xff]  ;;  %v651_v6 = vpop.f32.mrf.mxu3  ;;  %v3122_v0 = vand.u32 4294901760, %v727_v7 }
  0xee   :  { %1644 = vmatpush.msrb.mxu3 %v2922_v21  ;;  %1726 = vmatpush.msra.mxu1 %v2753_v30  ;;  %v3083_v30 = vand.u32 4294901760, %v730_v62  ;;  %v3469_v8 = vand.u32 4294901760, %v3070_v31 }
  0xef   :  { %1446 = vmatpush.msrb.mxu0 %v2910_v5  ;;  %1610 = vmatpush.msrb.mxu2 %v2967_v18  ;;  %v630_v56 = vadd.f32 %v629_v36, %v606_v55  ;;  %v658_v18 = vadd.s32 384, %v2699_v59  ;;  %v3435_v55 = vand.u32 4294901760, %v3019_v51  ;;  %v3436_v36 = vand.u32 4294901760, %v2773_v29 }
  0xf0   :  { %1646 = vmatpush.msrb.mxu3 %v2934_v2  ;;  %1728 = vmatpush.msra.mxu1 %v2767_v42  ;;  %v3095_v42 = vand.u32 4294901760, %v729_v63 }
  0xf1   :  { %1763 = vmatpush.msra.mxu2 %v2978_v35  ;;  %1448 = vmatpush.msrb.mxu0 %v2922_v21  ;;  %v662_v29 = vcvt.s32.f32 %v658_v18  ;;  %v3441_v18 = vand.u32 4294901760, %v3087_v17 }
  0xf2   :  { %1648 = vmatpush.msrb.mxu3 %v2946_v14  ;;  %1730 = vmatpush.msra.mxu1 %v2777_v19  ;;  %v1824_v19 = vsub.f32 %v3042_v16, %v3433_v52  ;;  %v3106_v16 = vsub.f32 %v730_v62, %v3083_v30 }
  0xf3   :  { %1765 = vmatpush.msra.mxu2 %v2991_v49  ;;  %1450 = vmatpush.msrb.mxu0 %v2934_v2 }
  0xf4   :  { %1808 = vmatpush.msra.mxu3 %v1807_v57  ;;  %1732 = vmatpush.msra.mxu1 %v2789_v54  ;;  %v1819_v57 = vand.u32 4294901760, %v1818_v9  ;;  %v3434_v54 = vand.u32 4294901760, %v3057_v4  ;;  %v726_v9 = vld [vmem:[#allocation5 + $0x198] sm:$0xff]  ;;  %v1825_v53 = vand.u32 4294901760, %v1824_v19  ;;  %v3439_v19 = vand.u32 4294901760, %v2785_v23  ;;  %v724_v23 = vld [vmem:[#allocation5 + $0x188] sm:$0xff] }
  0xf5   :  { %1613 = vmatmul.f32.vlgmr.msrb.gmra.mxu2 %v3019_v51  ;;  %1452 = vmatpush.msrb.mxu0 %v2946_v14  ;;  %v3135_v59 = vand.u32 4294901760, %v726_v9 }
  0xf6   :  { %1814 = vmatpush.msra.mxu3 %v1813_v12  ;;  %1767 = vmatpush.msra.mxu2 %v3011_v28  ;;  %v1830_v52 = vsub.f32 %v3057_v4, %v3434_v54  ;;  %v3108_v12 = vand.u32 4294901760, %v728_v22  ;;  %v3437_v54 = vand.u32 4294901760, %v3070_v31  ;;  %v3120_v4 = vsub.f32 %v729_v63, %v3095_v42 }
  0xf7   :  { %1734 = vmatpush.msra.mxu1 %v2801_v50  ;;  %1458 = vmatmul.f32.vlgmr.msrb.gmra.mxu0 %v1457_v25  ;;  %v3438_v50 = vand.u32 4294901760, %v3078_v43  ;;  %v652_v25 = vadd.f32 %v651_v6, %v630_v56  ;;  %v1853_v63 = vand.u32 4294901760, %v3106_v16  ;;  %v3147_v56 = vsub.f32 %v727_v7, %v3122_v0 }
  0xf8   :  { %1652 = vmatmul.f32.vlgmr.msrb.gmra.mxu3 %v3435_v55  ;;  %1659 = vmatpush.msra.mxu0 %v3436_v36  ;;  %v1836_v62 = vsub.f32 %v3070_v31, %v3437_v54  ;;  %v725_v55 = vld [vmem:[#allocation5 + $0x190] sm:$0xff]  ;;  %v1831_v36 = vand.u32 4294901760, %v1830_v52  ;;  %v3133_v54 = vsub.f32 %v728_v22, %v3108_v12  ;;  %v1859_v22 = vand.u32 4294901760, %v3120_v4 }
  0xf9   :  { %1769 = vmatpush.msra.mxu2 %v3023_v24  ;;  %1820 = vmatpush.msra.mxu3 %v1819_v57  ;;  %v1842_v51 = vsub.f32 %v3078_v43, %v3438_v50  ;;  %v3440_v57 = vmov 1.0   ;;  %v3149_v52 = vand.u32 4294901760, %v725_v55  ;;  %v3442_v50 = vand.u32 4294901760, %v2795_v37 }
  0xfa   :  { %1736 = vmatpush.msra.mxu1 %v2815_v20  ;;  %1663 = vmatpush.msra.mxu0 %v3439_v19  ;;  %v1848_v20 = vsub.f32 %v3087_v17, %v3441_v18  ;;  %v1837_v6 = vand.u32 4294901760, %v1836_v62  ;;  %vm3154_vm5 = vcmp.eq.f32.partialorder %v662_v29, %v652_v25  ;;  %v1865_v7 = vand.u32 4294901760, %v3133_v54  ;;  %v723_v62 = vld [vmem:[#allocation5 + $0x180] sm:$0xff] }
  0xfb   :  { %2132 = vmatmul.msk.f32.vlgmr.msrb.gmra.mxu1 %vm2987_vm4, %v3440_v57  ;;  %1771 = vmatpush.msra.mxu2 %v3032_v40  ;;  %v1843_v19 = vand.u32 4294901760, %v1842_v51  ;;  %v3166_v37 = vand.u32 4294901760, %v724_v23  ;;  %v3445_v51 = vand.u32 4294901760, %v2813_v58  ;;  %v3447_v58 = vand.u32 4294901760, %v2826_v3 }
  0xfc   :  { %1826 = vmatpush.msra.mxu3 %v1825_v53  ;;  %1738 = vmatpush.msra.mxu1 %v2821_v1  ;;  %v1854_v1 = vsub.f32 %v3106_v16, %v1853_v63  ;;  %v3164_v53 = vsub.f32 %v726_v9, %v3135_v59  ;;  %v1849_v25 = vand.u32 4294901760, %v1848_v20  ;;  %v1860_v9 = vsub.f32 %v3120_v4, %v1859_v22 }
  0xfd   :  { %1667 = vmatpush.msra.mxu0 %v3442_v50  ;;  %1773 = vmatpush.msra.mxu2 %v3044_v39  ;;  %v3180_v50 = vsub.f32 %v725_v55, %v3149_v52  ;;  %v3185_v20 = vand.u32 4294901760, %v723_v62  ;;  %v3193_v55 = vsub.f32 %v724_v23, %v3166_v37  ;;  %v3448_v3 = vand.u32 4294901760, %v2840_v13 }
  0xfe   :  { %1832 = vmatpush.msra.mxu3 %v1831_v36  ;;  %1740 = vmatpush.msra.mxu1 %v2834_v34  ;;  %v3446_v34 = vmov 0.0   ;;  %v1871_v36 = vand.u32 4294901760, %v3147_v56  ;;  %v3449_v23 = vand.u32 4294901760, %v2849_v47 }
  0xff   :  { %1671 = vmatpush.msra.mxu0 %v3445_v51  ;;  %1775 = vmatpush.msra.mxu2 %v3052_v44  ;;  %v2125_v29 = vsel %vm3154_vm5, 1.0, %v3446_v34  ;;  %v1877_v51 = vand.u32 4294901760, %v3164_v53  ;;  %v3209_v13 = vsub.f32 %v723_v62, %v3185_v20 }
 0x100   :  { %1838 = vmatpush.msra.mxu3 %v1837_v6  ;;  %1742 = vmatpush.msra.mxu1 %v2854_v46  ;;  %v1855_v46 = vand.u32 4294901760, %v1854_v1  ;;  %v1866_v6 = vsub.f32 %v3133_v54, %v1865_v7  ;;  %v3198_v34 = vsub.f32 %v2125_v29, %v2125_v29  ;;  %v1883_v1 = vand.u32 4294901760, %v3180_v50 }
 0x101   :  { %1675 = vmatpush.msra.mxu0 %v3447_v58  ;;  %1777 = vmatpush.msra.mxu2 %v3064_v11  ;;  %v1889_v29 = vand.u32 4294901760, %v3193_v55  ;;  %v3451_v58 = vand.u32 4294901760, %v2880_v27 }
 0x102   :  { %1844 = vmatpush.msra.mxu3 %v1843_v19  ;;  %1744 = vmatpush.msra.mxu1 %v2867_v33  ;;  %v1861_v33 = vand.u32 4294901760, %v1860_v9  ;;  %v1872_v19 = vsub.f32 %v3147_v56, %v1871_v36  ;;  %v3450_v9 = vand.u32 4294901760, %v2860_v60  ;;  %v1796_v47 = vand.u32 4294901760, %v3198_v34 }
 0x103   :  { %1679 = vmatpush.msra.mxu0 %v3448_v3  ;;  %1779 = vmatpush.msra.mxu2 %v3083_v30  ;;  %v1895_v60 = vand.u32 4294901760, %v3209_v13 }
 0x104   :  { %1850 = vmatpush.msra.mxu3 %v1849_v25  ;;  %1746 = vmatpush.msra.mxu1 %v2882_v26  ;;  %v1867_v25 = vand.u32 4294901760, %v1866_v6  ;;  %v1878_v26 = vsub.f32 %v3164_v53, %v1877_v51  ;;  %v1873_v62 = vand.u32 4294901760, %v1872_v19  ;;  %v3452_v6 = vand.u32 4294901760, %v2894_v48 }
 0x105   :  { %1683 = vmatpush.msra.mxu0 %v3449_v23  ;;  %1781 = vmatpush.msra.mxu2 %v3095_v42  ;;  %v1797_v27 = vsub.f32 %v3198_v34, %v1796_v47  ;;  %v1896_v48 = vsub.f32 %v3209_v13, %v1895_v60  ;;  %v3454_v19 = vand.u32 4294901760, %v2920_v38  ;;  %v3456_v38 = vand.u32 4294901760, %v3000_v41 }
 0x106   :  { %1856 = vmatpush.msra.mxu3 %v1855_v46  ;;  %1748 = vmatpush.msra.mxu1 %v2896_v15  ;;  %v1884_v15 = vsub.f32 %v3180_v50, %v1883_v1  ;;  %v1879_v46 = vand.u32 4294901760, %v1878_v26 }
 0x107   :  { %1687 = vmatpush.msra.mxu0 %v3450_v9  ;;  %1783 = vmatpush.msra.mxu2 %v3108_v12  ;;  %v1897_v23 = vand.u32 4294901760, %v1896_v48  ;;  %v3461_v9 = vld [vmem:[#allocation13_spill] sm:$0xff] }
 0x108   :  { %1862 = vmatpush.msra.mxu3 %v1861_v33  ;;  %1750 = vmatpush.msra.mxu1 %v2910_v5  ;;  %v1890_v5 = vsub.f32 %v3193_v55, %v1889_v29  ;;  %v1885_v3 = vand.u32 4294901760, %v1884_v15 }
 0x109   :  { %1691 = vmatpush.msra.mxu0 %v3451_v58  ;;  %1785 = vmatpush.msra.mxu2 %v3122_v0 }
 0x10a   :  { %1868 = vmatpush.msra.mxu3 %v1867_v25  ;;  %1752 = vmatpush.msra.mxu1 %v2922_v21  ;;  %v3453_v21 = vand.u32 4294901760, %v2908_v61  ;;  %v1891_v33 = vand.u32 4294901760, %v1890_v5  ;;  %v3455_v61 = vand.u32 4294901760, %v2932_v32  ;;  %v3458_v32 = vand.u32 4294901760, %v3014_v10  ;;  %v3459_v25 = vld [vmem:[#allocation11_spill] sm:$0xff] }
 0x10b   :  { %1695 = vmatpush.msra.mxu0 %v3452_v6  ;;  %1787 = vmatpush.msra.mxu2 %v3135_v59  ;;  %v3460_v26 = vand.u32 4294901760, %v3459_v25 }
 0x10c   :  { %1874 = vmatpush.msra.mxu3 %v1873_v62  ;;  %1754 = vmatpush.msra.mxu1 %v2934_v2  ;;  %v1798_v2 = vand.u32 4294901760, %v1797_v27  ;;  %v3463_v62 = vld [vmem:[#allocation12_spill] sm:$0xff] }
 0x10d   :  { %1699 = vmatpush.msra.mxu0 %v3453_v21  ;;  %1789 = vmatpush.msra.mxu2 %v3149_v52  ;;  %v3464_v15 = vand.u32 4294901760, %v3463_v62 }
 0x10e   :  { %1880 = vmatpush.msra.mxu3 %v1879_v46  ;;  %1756 = vmatpush.msra.mxu1 %v2946_v14  ;;  %v3457_v14 = vand.u32 4294901760, %v2944_v45  ;;  %v3462_v45 = vand.u32 4294901760, %v3461_v9 }
 0x10f   :  { %1703 = vmatpush.msra.mxu0 %v3454_v19  ;;  %2134 = vmatmul.msk.f32.vlgmr.msra.gmra.mxu1 %vm2987_vm4, %v3440_v57 }
 0x110   :  { %1791 = vmatpush.msra.mxu2 %v3166_v37  ;;  %1886 = vmatpush.msra.mxu3 %v1885_v3 }
 0x111   :  { %1959 = vmatpush.msrb.mxu1 %v2978_v35  ;;  %1707 = vmatpush.msra.mxu0 %v3455_v61 }
 0x112   :  { %1793 = vmatpush.msra.mxu2 %v3185_v20  ;;  %1892 = vmatpush.msra.mxu3 %v1891_v33 }
 0x113   :  { %1961 = vmatpush.msrb.mxu1 %v2991_v49  ;;  %1799 = vmatmul.f32.vlgmr.msra.gmra.mxu2 %v1798_v2 }
 0x114   :  { %2000 = vmatpush.msrb.mxu2 %v3456_v38  ;;  %1711 = vmatpush.msra.mxu0 %v3457_v14 }
 0x115   :  { %1898 = vmatpush.msra.mxu3 %v1897_v23  ;;  %1963 = vmatpush.msrb.mxu1 %v3011_v28 }
 0x116   :  { %2135 = vmatmul.msk.f32.vlgmr.msra.gmra.mxu3 %vm3154_vm5, %v3440_v57  ;;  %2004 = vmatpush.msrb.mxu2 %v3458_v32 }
 0x117   :  { %2067 = vmatpush.msrb.mxu3 %v2978_v35  ;;  %1715 = vmatpush.msra.mxu0 %v3460_v26  ;;  %v3465_v35 = vld [vmem:[#allocation14_spill] sm:$0xff] }
 0x118   :  { %1965 = vmatpush.msrb.mxu1 %v3023_v24  ;;  %2008 = vmatpush.msrb.mxu2 %v3462_v45  ;;  %v3466_v58 = vand.u32 4294901760, %v3465_v35 }
 0x119   :  { %2069 = vmatpush.msrb.mxu3 %v2991_v49  ;;  %1719 = vmatpush.msra.mxu0 %v3464_v15  ;;  %v3467_v49 = vld [vmem:[#allocation15_spill] sm:$0xff] }
 0x11a   :  { %1967 = vmatpush.msrb.mxu1 %v3032_v40  ;;  %2133 = vmatmul.msk.f32.vlgmr.msra.gmra.mxu0 %vm2987_vm4, %v3440_v57  ;;  %v3468_v46 = vand.u32 4294901760, %v3467_v49 }
 0x11b   :  { %1906 = vmatpush.msrb.mxu0 %v3000_v41  ;;  %2012 = vmatpush.msrb.mxu2 %v3466_v58 }
 0x11c   :  { %2071 = vmatpush.msrb.mxu3 %v3011_v28  ;;  %1969 = vmatpush.msrb.mxu1 %v3044_v39  ;;  %v3470_v28 = vand.u32 4294901760, %v3078_v43 }
 0x11d   :  { %1909 = vmatpush.msrb.mxu0 %v3014_v10  ;;  %2016 = vmatpush.msrb.mxu2 %v3468_v46 }
 0x11e   :  { %2073 = vmatpush.msrb.mxu3 %v3023_v24  ;;  %1971 = vmatpush.msrb.mxu1 %v3052_v44  ;;  %v3471_v24 = vand.u32 4294901760, %v3087_v17 }
 0x11f   :  { %1912 = vmatpush.msrb.mxu0 %v3461_v9  ;;  %2020 = vmatpush.msrb.mxu2 %v3469_v8 }
 0x120   :  { %2075 = vmatpush.msrb.mxu3 %v3032_v40  ;;  %1973 = vmatpush.msrb.mxu1 %v3064_v11 }
 0x121   :  { %1915 = vmatpush.msrb.mxu0 %v3465_v35  ;;  %2024 = vmatpush.msrb.mxu2 %v3470_v28 }
 0x122   :  { %2077 = vmatpush.msrb.mxu3 %v3044_v39  ;;  %1975 = vmatpush.msrb.mxu1 %v3083_v30 }
 0x123   :  { %1918 = vmatpush.msrb.mxu0 %v3467_v49  ;;  %2028 = vmatpush.msrb.mxu2 %v3471_v24 }
 0x124   :  { %2079 = vmatpush.msrb.mxu3 %v3052_v44  ;;  %1977 = vmatpush.msrb.mxu1 %v3095_v42 }
 0x125   :  { %1921 = vmatpush.msrb.mxu0 %v3070_v31  ;;  %2032 = vmatpush.msrb.mxu2 %v1853_v63 }
 0x126   :  { %2081 = vmatpush.msrb.mxu3 %v3064_v11  ;;  %1979 = vmatpush.msrb.mxu1 %v3108_v12  ;;  %v878_v44 = vpop.f32.mrf.mxu1 }
 0x127   :  { %1924 = vmatpush.msrb.mxu0 %v3078_v43  ;;  %2036 = vmatpush.msrb.mxu2 %v1859_v22 }
 0x128   :  { %2083 = vmatpush.msrb.mxu3 %v3083_v30  ;;  %1981 = vmatpush.msrb.mxu1 %v3122_v0 }
 0x129   :  { %1927 = vmatpush.msrb.mxu0 %v3087_v17  ;;  %2040 = vmatpush.msrb.mxu2 %v1865_v7 }
 0x12a   :  { %2085 = vmatpush.msrb.mxu3 %v3095_v42  ;;  %1983 = vmatpush.msrb.mxu1 %v3135_v59 }
 0x12b   :  { %1930 = vmatpush.msrb.mxu0 %v3106_v16  ;;  %2044 = vmatpush.msrb.mxu2 %v1871_v36 }
 0x12c   :  { %2087 = vmatpush.msrb.mxu3 %v3108_v12  ;;  %1985 = vmatpush.msrb.mxu1 %v3149_v52 }
 0x12d   :  { %1933 = vmatpush.msrb.mxu0 %v3120_v4  ;;  %2048 = vmatpush.msrb.mxu2 %v1877_v51 }
 0x12e   :  { %2089 = vmatpush.msrb.mxu3 %v3122_v0  ;;  %1987 = vmatpush.msrb.mxu1 %v3166_v37 }
 0x12f   :  { %1936 = vmatpush.msrb.mxu0 %v3133_v54  ;;  %2052 = vmatpush.msrb.mxu2 %v1883_v1  ;;  %v777_v43 = vpop.f32.mrf.mxu0  ;;  %v932_v17 = vpop.f32.mrf.mxu2 }
 0x130   :  { %2091 = vmatpush.msrb.mxu3 %v3135_v59  ;;  %1989 = vmatpush.msrb.mxu1 %v3185_v20  ;;  %v879_v40 = vadd.f32 %v878_v44, %v777_v43  ;;  %v1077_v4 = vpop.f32.mrf.mxu1 }
 0x131   :  { %1939 = vmatpush.msrb.mxu0 %v3147_v56  ;;  %1993 = vmatmul.f32.vlgmr.msrb.gmra.mxu1 %v1796_v47  ;;  %v971_v41 = vpop.f32.mrf.mxu3 }
 0x132   :  { %2056 = vmatpush.msrb.mxu2 %v1889_v29  ;;  %2093 = vmatpush.msrb.mxu3 %v3149_v52  ;;  %v933_v0 = vadd.f32 %v932_v17, %v879_v40 }
 0x133   :  { %1942 = vmatpush.msrb.mxu0 %v3164_v53 }
 0x134   :  { %2060 = vmatpush.msrb.mxu2 %v1895_v60  ;;  %2095 = vmatpush.msrb.mxu3 %v3166_v37  ;;  %v972_v16 = vadd.f32 %v971_v41, %v933_v0 }
 0x135   :  { %2136 = vmatmul.msk.f32.vlgmr.msrb.gmra.mxu2 %vm3154_vm5, %v3440_v57  ;;  %1945 = vmatpush.msrb.mxu0 %v3180_v50 }
 0x136   :  { %2097 = vmatpush.msrb.mxu3 %v3185_v20 }
 0x137   :  { %2137 = vmatmul.msk.f32.vlgmr.msrb.gmra.mxu3 %vm3154_vm5, %v3440_v57  ;;  %1948 = vmatpush.msrb.mxu0 %v3193_v55 }
 0x138   :  { %v1040_v10 = vpop.f32.mrf.mxu0 }
 0x139   :  { %1951 = vmatpush.msrb.mxu0 %v3209_v13  ;;  %v1041_v39 = vadd.f32 %v1040_v10, %v972_v16 }
 0x13a   :  { %1954 = vmatmul.f32.vlgmr.msrb.gmra.mxu0 %v3198_v34 }
 0x13b   :  { %v1078_v30 = vadd.f32 %v1077_v4, %v1041_v39 }
 0x143   :  { %v1118_v11 = vpop.f32.mrf.mxu2 }
 0x144   :  { %v1119_v31 = vadd.f32 %v1118_v11, %v1078_v30 }
 0x145   :  { %v1219_v42 = vpop.f32.mrf.mxu3 }
 0x146   :  { %v1220_v59 = vadd.f32 %v1219_v42, %v1119_v31 }
 0x14a   :  { %v1312_v54 = vpop.f32.mrf.mxu1 }
 0x152   :  { %v1381_v22 = vpop.f32.mrf.mxu2 }
 0x153   :  { %v1273_v12 = vpop.f32.mrf.mxu0 }
 0x154   :  { %v1274_v63 = vadd.f32 %v1273_v12, %v1220_v59 }
 0x155   :  { %v1418_v52 = vpop.f32.mrf.mxu3 }
 0x156   :  { %v1313_v57 = vadd.f32 %v1312_v54, %v1274_v63 }
 0x158   :  { %v1382_v56 = vadd.f32 %v1381_v22, %v1313_v57 }
 0x15a   :  { %v1419_v7 = vadd.f32 %v1418_v52, %v1382_v56 }
 0x174   :  { %v1459_v18 = vpop.f32.mrf.mxu0 }
 0x175   :  { %v1460_v53 = vadd.f32 %v1459_v18, %v1419_v7 }
 0x178   :  { %v1560_v37 = vpop.f32.mrf.mxu1  ;;  %v1614_v50 = vpop.f32.mrf.mxu2 }
 0x179   :  { %v1561_v36 = vadd.f32 %v1560_v37, %v1460_v53 }
 0x17b   :  { %v1615_v20 = vadd.f32 %v1614_v50, %v1561_v36  ;;  %v1653_v51 = vpop.f32.mrf.mxu3 }
 0x17d   :  { %v1654_v34 = vadd.f32 %v1653_v51, %v1615_v20 }
 0x18c   :  { %v1759_v13 = vpop.f32.mrf.mxu1 }
 0x196   :  { %v1800_v47 = vpop.f32.mrf.mxu2 }
 0x197   :  { %v1722_v55 = vpop.f32.mrf.mxu0 }
 0x198   :  { %v1723_v1 = vadd.f32 %v1722_v55, %v1654_v34 }
 0x199   :  { %v1901_v5 = vpop.f32.mrf.mxu3 }
 0x19a   :  { %v1760_v29 = vadd.f32 %v1759_v13, %v1723_v1 }
 0x19c   :  { %v1801_v60 = vadd.f32 %v1800_v47, %v1760_v29 }
 0x19e   :  { %v1902_v6 = vadd.f32 %v1901_v5, %v1801_v60 }
 0x1ae   :  { %v1994_v21 = vpop.f32.mrf.mxu1 }
 0x1b7   :  { %v1955_v27 = vpop.f32.mrf.mxu0 }
 0x1b8   :  { %v1956_v3 = vadd.f32 %v1955_v27, %v1902_v6  ;;  %v2063_v33 = vpop.f32.mrf.mxu2 }
 0x1ba   :  { %v1995_v48 = vadd.f32 %v1994_v21, %v1956_v3  ;;  %v2100_v2 = vpop.f32.mrf.mxu3 }
 0x1bc   :  { %v2064_v19 = vadd.f32 %v2063_v33, %v1995_v48 }
 0x1be   :  { %v2101_v61 = vadd.f32 %v2100_v2, %v2064_v19 }
 0x1c0   :  { %2103 = vst [vmem:[#allocation7] sm:$0xff] %v2101_v61 }
 0x1c1   :  { %2114 = dma.vmem_to_hbm [thread:$0]  %s2110_s2, 128, %s2112_s27, [#allocation4]  }
 0x1c2   :  { %2221 = dma.done.wait [#allocation4], 128  }
 0x1c3   :  { %2222 = vsyncadd [#allocation4], 4294967168 }
 0x1c4   :  { %2119 = vsyncpa [#allocation3], 1 }
 0x1c5   :  { %2120 = vsyncpa [#allocation6], 1 }
 0x1c6   :  { %2121 = vsyncpa [#allocation4], 1 }

</bundles_post_ra>
